<compile_context>
chip_gen: v5e
topology: v5e:2x2
jax: 0.10.0
libtpu: 0.0.40
codegen_flags: <defaults>
</compile_context>

<pallas_src>
import functools
import math

import jax
import jax.numpy as jnp
from jax import lax
from jax.experimental import pallas as pl
from jax.experimental.pallas import tpu as pltpu


# ----------------------------- config ---------------------------------------
class GPTConfig:
    vocab_size = 64
    block_size = 16
    n_layer = 2
    n_head = 4
    n_embd = 32
    embd_pdrop = 0.1   # identity in eval
    attn_pdrop = 0.1   # identity in eval
    resid_pdrop = 0.1  # identity in eval


# --------------------------- kernel helpers ----------------------------------
def _layernorm(x, w, b, eps=1e-5):
    mu = jnp.mean(x, axis=-1, keepdims=True)
    var = jnp.mean((x - mu) ** 2, axis=-1, keepdims=True)
    return (x - mu) * lax.rsqrt(var + eps) * w + b


def _gelu_exact(x):
    # PyTorch nn.GELU() default ('none') = exact erf formulation.
    return 0.5 * x * (1.0 + lax.erf(x * (1.0 / math.sqrt(2.0))))


# ------------------------- fused forward kernel -------------------------------
def gpt_fused_kernel(n_head, n_layer_run, seq_len, apply_head,
                     idx_ref,                       # (N, 1) int32, N = B*T
                     pos_ref,                       # (N, C) f32
                     bias_ref,                      # (N, N) f32 additive mask
                     tok_emb_ref,                   # (V, C) f32
                     ln1w_ref, ln1b_ref,            # (L, 1, C)
                     wq_ref, bq_ref, wk_ref, bk_ref, wv_ref, bv_ref,
                     wp_ref, bp_ref,                # (L, C, C) / (L, 1, C)
                     ln2w_ref, ln2b_ref,            # (L, 1, C)
                     w1_ref, b1_ref, w2_ref, b2_ref,   # (L, C, 4C) / (L, 4C, C)
                     lnfw_ref, lnfb_ref, headw_ref,    # (1, C), (1, C), (C, V)
                     o_ref):                        # (N, V) or (B, C)
    N = idx_ref.shape[0]
    V, C = tok_emb_ref.shape
    T = seq_len
    B = N // T
    D = C // n_head
    scale = 1.0 / math.sqrt(D)

    # ---- token embedding gather (one-hot MXU matmul) + positional add ----
    onehot = (lax.broadcasted_iota(jnp.int32, (N, V), 1)
              == idx_ref[...]).astype(jnp.float32)              # (N, V)
    x = jnp.dot(onehot, tok_emb_ref[...],
                preferred_element_type=jnp.float32) + pos_ref[...]
    # embedding dropout = identity (eval)

    # block-diagonal causal additive bias (0 where allowed, -1e30 elsewhere)
    bias = bias_ref[...]                                         # (N, N)

    # ---- transformer blocks (static unrolled loop over stacked weights) ----
    for l in range(n_layer_run):
        # attention branch: x + proj(attn(ln1(x)))
        ln1 = _layernorm(x, ln1w_ref[l], ln1b_ref[l])
        q = jnp.dot(ln1, wq_ref[l], preferred_element_type=jnp.float32) + bq_ref[l]
        k = jnp.dot(ln1, wk_ref[l], preferred_element_type=jnp.float32) + bk_ref[l]
        v = jnp.dot(ln1, wv_ref[l], preferred_element_type=jnp.float32) + bv_ref[l]

        head_outs = []
        for h in range(n_head):
            lo = h * D
            qh = q[:, lo:lo + D]
            kh = k[:, lo:lo + D]
            vh = v[:, lo:lo + D]
            att = lax.dot_general(qh, kh, (((1,), (1,)), ((), ())),
                                  preferred_element_type=jnp.float32)
            att = att * scale + bias
            att = jax.nn.softmax(att, axis=-1)      # attn dropout = identity
            head_outs.append(jnp.dot(att, vh, preferred_element_type=jnp.float32))
        y = jnp.concatenate(head_outs, axis=-1)     # (N, C)

        # single output projection over all concatenated heads
        y = jnp.dot(y, wp_ref[l], preferred_element_type=jnp.float32) + bp_ref[l]
        x = x + y                                   # resid dropout = identity

        # MLP branch: x + mlp(ln2(x))
        ln2 = _layernorm(x, ln2w_ref[l], ln2b_ref[l])
        h1 = jnp.dot(ln2, w1_ref[l], preferred_element_type=jnp.float32) + b1_ref[l]
        h1 = _gelu_exact(h1)
        h2 = jnp.dot(h1, w2_ref[l], preferred_element_type=jnp.float32) + b2_ref[l]
        x = x + h2                                  # resid dropout = identity

    if apply_head:
        # final LayerNorm + LM head, fused as epilogue
        xf = _layernorm(x, lnfw_ref[...], lnfb_ref[...])
        o_ref[...] = jnp.dot(xf, headw_ref[...],
                             preferred_element_type=jnp.float32).astype(o_ref.dtype)
    else:
        # return x[:, T-1, :] for each batch element via one-hot selection matmul
        rows = lax.broadcasted_iota(jnp.int32, (B, N), 0) * T + (T - 1)
        cols = lax.broadcasted_iota(jnp.int32, (B, N), 1)
        sel = (rows == cols).astype(jnp.float32)                 # (B, N)
        o_ref[...] = jnp.dot(sel, x,
                             preferred_element_type=jnp.float32).astype(o_ref.dtype)


# ------------------------------ wrappers --------------------------------------
def _vmem_spec():
    return pl.BlockSpec(memory_space=pltpu.MemorySpace.VMEM)


@functools.partial(jax.jit, static_argnames=('n_head', 'n_layer_run', 'apply_head'))
def _gpt_forward_jit(idx, params, n_head, n_layer_run, apply_head):
    B, T = idx.shape
    C = params['tok_emb'].shape[1]
    V = params['head_w'].shape[1]
    N = B * T

    idx2d = idx.reshape(N, 1).astype(jnp.int32)
    pos = jnp.broadcast_to(params['pos_emb'][:, :T, :], (B, T, C)).reshape(N, C)

    # Block-diagonal causal additive bias over flattened (B*T) axis.
    # Pure function of static shapes -> XLA constant-folds it; the kernel
    # just adds it to the attention scores.
    r = jnp.arange(N)
    same_batch = (r[:, None] // T) == (r[None, :] // T)
    causal = (r[None, :] % T) <= (r[:, None] % T)
    bias = jnp.where(same_batch & causal, 0.0, -1e30).astype(jnp.float32)

    ins = (idx2d, pos, bias, params['tok_emb'],
           params['ln1_w'], params['ln1_b'],
           params['wq'], params['bq'], params['wk'], params['bk'],
           params['wv'], params['bv'], params['wp'], params['bp'],
           params['ln2_w'], params['ln2_b'],
           params['w1'], params['b1'], params['w2'], params['b2'],
           params['lnf_w'], params['lnf_b'], params['head_w'])

    if apply_head:
        out_shape = jax.ShapeDtypeStruct((N, V), jnp.float32)
    else:
        out_shape = jax.ShapeDtypeStruct((B, C), jnp.float32)

    kern = functools.partial(gpt_fused_kernel, n_head, n_layer_run, T, apply_head)
    out = pl.pallas_call(
        kern,
        out_shape=out_shape,
        in_specs=[_vmem_spec() for _ in ins],
        out_specs=_vmem_spec(),
    )(*ins)

    if apply_head:
        out = out.reshape(B, T, V)
    return out


def gpt_forward(idx, params, cfg, layer=None, return_embeddings=False):
    _, T = idx.shape
    assert T <= cfg.block_size, 'Input sequence too long.'
    if return_embeddings:
        n_run = cfg.n_layer if layer is None else layer
        return _gpt_forward_jit(idx, params, cfg.n_head, n_run, False)
    return _gpt_forward_jit(idx, params, cfg.n_head, cfg.n_layer, True)


# ------------------------- deterministic param init ---------------------------
def init_params(cfg, key):
    C, V, L = cfg.n_embd, cfg.vocab_size, cfg.n_layer

    def normal(k, shape):
        return 0.02 * jax.random.normal(k, shape, dtype=jnp.float32)

    keys = jax.random.split(key, 2 + 6 * L)
    ki = iter(range(len(keys)))

    params = {
        'tok_emb': normal(keys[next(ki)], (V, C)),
        # pos_emb is nn.Parameter(torch.zeros(...)) and is NOT touched by
        # _init_weights, so it stays zero.
        'pos_emb': jnp.zeros((1, cfg.block_size, C), jnp.float32),
        'lnf_w': jnp.ones((1, C), jnp.float32),
        'lnf_b': jnp.zeros((1, C), jnp.float32),
        # head: nn.Linear(C, V, bias=False); stored transposed as (C, V)
        'head_w': normal(keys[next(ki)], (V, C)).T,
    }

    wq, wk, wv, wp, w1, w2 = [], [], [], [], [], []
    for _ in range(L):
        wq.append(normal(keys[next(ki)], (C, C)).T)
        wk.append(normal(keys[next(ki)], (C, C)).T)
        wv.append(normal(keys[next(ki)], (C, C)).T)
        wp.append(normal(keys[next(ki)], (C, C)).T)
        w1.append(normal(keys[next(ki)], (4 * C, C)).T)   # (C, 4C)
        w2.append(normal(keys[next(ki)], (C, 4 * C)).T)   # (4C, C)

    params.update({
        'ln1_w': jnp.ones((L, 1, C), jnp.float32),
        'ln1_b': jnp.zeros((L, 1, C), jnp.float32),
        'wq': jnp.stack(wq), 'bq': jnp.zeros((L, 1, C), jnp.float32),
        'wk': jnp.stack(wk), 'bk': jnp.zeros((L, 1, C), jnp.float32),
        'wv': jnp.stack(wv), 'bv': jnp.zeros((L, 1, C), jnp.float32),
        'wp': jnp.stack(wp), 'bp': jnp.zeros((L, 1, C), jnp.float32),
        'ln2_w': jnp.ones((L, 1, C), jnp.float32),
        'ln2_b': jnp.zeros((L, 1, C), jnp.float32),
        'w1': jnp.stack(w1), 'b1': jnp.zeros((L, 1, 4 * C), jnp.float32),
        'w2': jnp.stack(w2), 'b2': jnp.zeros((L, 1, C), jnp.float32),
    })
    return params


# ---------------------------------- main --------------------------------------
if __name__ == "__main__":
    cfg = GPTConfig()
    key = jax.random.PRNGKey(0)
    pkey, dkey = jax.random.split(key)
    params = init_params(cfg, pkey)

    B, T = 2, 8
    idx = jax.random.randint(dkey, (B, T), 0, cfg.vocab_size, dtype=jnp.int32)

    logits = gpt_forward(idx, params, cfg)                                 # (B, T, V)
    emb = gpt_forward(idx, params, cfg, layer=1, return_embeddings=True)   # (B, C)

    jax.block_until_ready(logits)
    jax.block_until_ready(emb)

    assert logits.shape == (B, T, cfg.vocab_size)
    assert emb.shape == (B, cfg.n_embd)
    assert bool(jnp.all(jnp.isfinite(logits)))
    assert bool(jnp.all(jnp.isfinite(emb)))
    print("KERNEL_OK")
</pallas_src>

<mosaic_0001>
module attributes {stable_mosaic.version = 11 : i64} {
  func.func @gpt_fused_kernel(%arg0: memref<16x1xi32, #tpu.memory_space<vmem>>, %arg1: memref<16x32xf32, #tpu.memory_space<vmem>>, %arg2: memref<16x16xf32, #tpu.memory_space<vmem>>, %arg3: memref<64x32xf32, #tpu.memory_space<vmem>>, %arg4: memref<2x1x32xf32, #tpu.memory_space<vmem>>, %arg5: memref<2x1x32xf32, #tpu.memory_space<vmem>>, %arg6: memref<2x32x32xf32, #tpu.memory_space<vmem>>, %arg7: memref<2x1x32xf32, #tpu.memory_space<vmem>>, %arg8: memref<2x32x32xf32, #tpu.memory_space<vmem>>, %arg9: memref<2x1x32xf32, #tpu.memory_space<vmem>>, %arg10: memref<2x32x32xf32, #tpu.memory_space<vmem>>, %arg11: memref<2x1x32xf32, #tpu.memory_space<vmem>>, %arg12: memref<2x32x32xf32, #tpu.memory_space<vmem>>, %arg13: memref<2x1x32xf32, #tpu.memory_space<vmem>>, %arg14: memref<2x1x32xf32, #tpu.memory_space<vmem>>, %arg15: memref<2x1x32xf32, #tpu.memory_space<vmem>>, %arg16: memref<2x32x128xf32, #tpu.memory_space<vmem>>, %arg17: memref<2x1x128xf32, #tpu.memory_space<vmem>>, %arg18: memref<2x128x32xf32, #tpu.memory_space<vmem>>, %arg19: memref<2x1x32xf32, #tpu.memory_space<vmem>>, %arg20: memref<1x32xf32, #tpu.memory_space<vmem>>, %arg21: memref<1x32xf32, #tpu.memory_space<vmem>>, %arg22: memref<32x64xf32, #tpu.memory_space<vmem>>, %arg23: memref<16x64xf32, #tpu.memory_space<vmem>>) attributes {dimension_semantics = [], scalar_prefetch = 0 : i64, scratch_operands = 0 : i64, tpu.core_type = #tpu.core_type<tc>} {
    %0 = tpu.iota {dimensions = array<i32: 1>} : vector<16x64xi32>
    %c0 = arith.constant 0 : index
    %c0_0 = arith.constant 0 : index
    %1 = vector.load %arg0[%c0, %c0_0] : memref<16x1xi32, #tpu.memory_space<vmem>>, vector<16x1xi32>
    %2 = vector.broadcast %1 : vector<16x1xi32> to vector<16x64xi32>
    %3 = arith.cmpi eq, %0, %2 : vector<16x64xi32>
    %4 = arith.extui %3 : vector<16x64xi1> to vector<16x64xi32>
    %5 = arith.sitofp %4 : vector<16x64xi32> to vector<16x64xf32>
    %c0_1 = arith.constant 0 : index
    %c0_2 = arith.constant 0 : index
    %6 = vector.load %arg3[%c0_1, %c0_2] : memref<64x32xf32, #tpu.memory_space<vmem>>, vector<64x32xf32>
    %cst = arith.constant dense<0.000000e+00> : vector<16x32xf32>
    %7 = tpu.matmul %5, %6, %cst {dimension_numbers = #tpu.dot_dimension_numbers<[1], [0], [0], [1], [0, 0, 1, 1], [], []>} : vector<16x64xf32>, vector<64x32xf32>, vector<16x32xf32> -> vector<16x32xf32>
    %c0_3 = arith.constant 0 : index
    %c0_4 = arith.constant 0 : index
    %8 = vector.load %arg1[%c0_3, %c0_4] : memref<16x32xf32, #tpu.memory_space<vmem>>, vector<16x32xf32>
    %9 = arith.addf %7, %8 : vector<16x32xf32>
    %c0_5 = arith.constant 0 : index
    %c0_6 = arith.constant 0 : index
    %10 = vector.load %arg2[%c0_5, %c0_6] : memref<16x16xf32, #tpu.memory_space<vmem>>, vector<16x16xf32>
    %c0_7 = arith.constant 0 : index
    %c0_8 = arith.constant 0 : index
    %c0_9 = arith.constant 0 : index
    %11 = vector.load %arg4[%c0_7, %c0_8, %c0_9] : memref<2x1x32xf32, #tpu.memory_space<vmem>>, vector<1x1x32xf32>
    %12 = vector.shape_cast %11 : vector<1x1x32xf32> to vector<1x32xf32>
    %c0_10 = arith.constant 0 : index
    %c0_11 = arith.constant 0 : index
    %c0_12 = arith.constant 0 : index
    %13 = vector.load %arg5[%c0_10, %c0_11, %c0_12] : memref<2x1x32xf32, #tpu.memory_space<vmem>>, vector<1x1x32xf32>
    %14 = vector.shape_cast %13 : vector<1x1x32xf32> to vector<1x32xf32>
    %cst_13 = arith.constant dense<0.000000e+00> : vector<16xf32>
    %15 = vector.multi_reduction <add>, %9, %cst_13 [1] : vector<16x32xf32> to vector<16xf32>
    %16 = vector.shape_cast %15 : vector<16xf32> to vector<16x1xf32>
    %cst_14 = arith.constant 3.200000e+01 : f32
    %17 = vector.broadcast %cst_14 : f32 to vector<16x1xf32>
    %18 = arith.divf %16, %17 : vector<16x1xf32>
    %19 = vector.broadcast %18 : vector<16x1xf32> to vector<16x32xf32>
    %20 = arith.subf %9, %19 : vector<16x32xf32>
    %21 = arith.mulf %20, %20 : vector<16x32xf32>
    %cst_15 = arith.constant dense<0.000000e+00> : vector<16xf32>
    %22 = vector.multi_reduction <add>, %21, %cst_15 [1] : vector<16x32xf32> to vector<16xf32>
    %23 = vector.shape_cast %22 : vector<16xf32> to vector<16x1xf32>
    %cst_16 = arith.constant 3.200000e+01 : f32
    %24 = vector.broadcast %cst_16 : f32 to vector<16x1xf32>
    %25 = arith.divf %23, %24 : vector<16x1xf32>
    %26 = vector.broadcast %18 : vector<16x1xf32> to vector<16x32xf32>
    %27 = arith.subf %9, %26 : vector<16x32xf32>
    %cst_17 = arith.constant 9.99999974E-6 : f32
    %28 = vector.broadcast %cst_17 : f32 to vector<16x1xf32>
    %29 = arith.addf %25, %28 : vector<16x1xf32>
    %30 = math.rsqrt %29 : vector<16x1xf32>
    %31 = vector.broadcast %30 : vector<16x1xf32> to vector<16x32xf32>
    %32 = arith.mulf %27, %31 : vector<16x32xf32>
    %33 = vector.broadcast %12 : vector<1x32xf32> to vector<16x32xf32>
    %34 = arith.mulf %32, %33 : vector<16x32xf32>
    %35 = vector.broadcast %14 : vector<1x32xf32> to vector<16x32xf32>
    %36 = arith.addf %34, %35 : vector<16x32xf32>
    %c0_18 = arith.constant 0 : index
    %c0_19 = arith.constant 0 : index
    %c0_20 = arith.constant 0 : index
    %37 = vector.load %arg6[%c0_18, %c0_19, %c0_20] : memref<2x32x32xf32, #tpu.memory_space<vmem>>, vector<1x32x32xf32>
    %38 = vector.shape_cast %37 : vector<1x32x32xf32> to vector<32x32xf32>
    %cst_21 = arith.constant dense<0.000000e+00> : vector<16x32xf32>
    %39 = tpu.matmul %36, %38, %cst_21 {dimension_numbers = #tpu.dot_dimension_numbers<[1], [0], [0], [1], [0, 0, 1, 1], [], []>} : vector<16x32xf32>, vector<32x32xf32>, vector<16x32xf32> -> vector<16x32xf32>
    %c0_22 = arith.constant 0 : index
    %c0_23 = arith.constant 0 : index
    %c0_24 = arith.constant 0 : index
    %40 = vector.load %arg7[%c0_22, %c0_23, %c0_24] : memref<2x1x32xf32, #tpu.memory_space<vmem>>, vector<1x1x32xf32>
    %41 = vector.shape_cast %40 : vector<1x1x32xf32> to vector<1x32xf32>
    %42 = vector.broadcast %41 : vector<1x32xf32> to vector<16x32xf32>
    %43 = arith.addf %39, %42 : vector<16x32xf32>
    %c0_25 = arith.constant 0 : index
    %c0_26 = arith.constant 0 : index
    %c0_27 = arith.constant 0 : index
    %44 = vector.load %arg8[%c0_25, %c0_26, %c0_27] : memref<2x32x32xf32, #tpu.memory_space<vmem>>, vector<1x32x32xf32>
    %45 = vector.shape_cast %44 : vector<1x32x32xf32> to vector<32x32xf32>
    %cst_28 = arith.constant dense<0.000000e+00> : vector<16x32xf32>
    %46 = tpu.matmul %36, %45, %cst_28 {dimension_numbers = #tpu.dot_dimension_numbers<[1], [0], [0], [1], [0, 0, 1, 1], [], []>} : vector<16x32xf32>, vector<32x32xf32>, vector<16x32xf32> -> vector<16x32xf32>
    %c0_29 = arith.constant 0 : index
    %c0_30 = arith.constant 0 : index
    %c0_31 = arith.constant 0 : index
    %47 = vector.load %arg9[%c0_29, %c0_30, %c0_31] : memref<2x1x32xf32, #tpu.memory_space<vmem>>, vector<1x1x32xf32>
    %48 = vector.shape_cast %47 : vector<1x1x32xf32> to vector<1x32xf32>
    %49 = vector.broadcast %48 : vector<1x32xf32> to vector<16x32xf32>
    %50 = arith.addf %46, %49 : vector<16x32xf32>
    %c0_32 = arith.constant 0 : index
    %c0_33 = arith.constant 0 : index
    %c0_34 = arith.constant 0 : index
    %51 = vector.load %arg10[%c0_32, %c0_33, %c0_34] : memref<2x32x32xf32, #tpu.memory_space<vmem>>, vector<1x32x32xf32>
    %52 = vector.shape_cast %51 : vector<1x32x32xf32> to vector<32x32xf32>
    %cst_35 = arith.constant dense<0.000000e+00> : vector<16x32xf32>
    %53 = tpu.matmul %36, %52, %cst_35 {dimension_numbers = #tpu.dot_dimension_numbers<[1], [0], [0], [1], [0, 0, 1, 1], [], []>} : vector<16x32xf32>, vector<32x32xf32>, vector<16x32xf32> -> vector<16x32xf32>
    %c0_36 = arith.constant 0 : index
    %c0_37 = arith.constant 0 : index
    %c0_38 = arith.constant 0 : index
    %54 = vector.load %arg11[%c0_36, %c0_37, %c0_38] : memref<2x1x32xf32, #tpu.memory_space<vmem>>, vector<1x1x32xf32>
    %55 = vector.shape_cast %54 : vector<1x1x32xf32> to vector<1x32xf32>
    %56 = vector.broadcast %55 : vector<1x32xf32> to vector<16x32xf32>
    %57 = arith.addf %53, %56 : vector<16x32xf32>
    %58 = vector.extract_strided_slice %43 {offsets = [0, 0], sizes = [16, 8], strides = [1, 1]} : vector<16x32xf32> to vector<16x8xf32>
    %59 = vector.extract_strided_slice %50 {offsets = [0, 0], sizes = [16, 8], strides = [1, 1]} : vector<16x32xf32> to vector<16x8xf32>
    %60 = vector.extract_strided_slice %57 {offsets = [0, 0], sizes = [16, 8], strides = [1, 1]} : vector<16x32xf32> to vector<16x8xf32>
    %cst_39 = arith.constant dense<0.000000e+00> : vector<16x16xf32>
    %61 = tpu.matmul %58, %59, %cst_39 {dimension_numbers = #tpu.dot_dimension_numbers<[1], [1], [0], [0], [0, 0, 1, 0], [], []>} : vector<16x8xf32>, vector<16x8xf32>, vector<16x16xf32> -> vector<16x16xf32>
    %cst_40 = arith.constant 0.353553385 : f32
    %62 = vector.broadcast %cst_40 : f32 to vector<16x16xf32>
    %63 = arith.mulf %61, %62 : vector<16x16xf32>
    %64 = arith.addf %63, %10 : vector<16x16xf32>
    %cst_41 = arith.constant dense<0xFF800000> : vector<16xf32>
    %65 = vector.multi_reduction <maximumf>, %64, %cst_41 [1] : vector<16x16xf32> to vector<16xf32>
    %cst_42 = arith.constant 0xFF800000 : f32
    %66 = vector.broadcast %cst_42 : f32 to vector<16xf32>
    %67 = arith.maximumf %66, %65 : vector<16xf32>
    %68 = vector.shape_cast %67 : vector<16xf32> to vector<16x1xf32>
    %69 = vector.broadcast %68 : vector<16x1xf32> to vector<16x16xf32>
    %70 = arith.subf %64, %69 : vector<16x16xf32>
    %71 = math.exp %70 : vector<16x16xf32>
    %cst_43 = arith.constant dense<0.000000e+00> : vector<16xf32>
    %72 = vector.multi_reduction <add>, %71, %cst_43 [1] : vector<16x16xf32> to vector<16xf32>
    %73 = vector.shape_cast %72 : vector<16xf32> to vector<16x1xf32>
    %74 = vector.broadcast %73 : vector<16x1xf32> to vector<16x16xf32>
    %75 = arith.divf %71, %74 : vector<16x16xf32>
    %cst_44 = arith.constant dense<0.000000e+00> : vector<16x8xf32>
    %76 = tpu.matmul %75, %60, %cst_44 {dimension_numbers = #tpu.dot_dimension_numbers<[1], [0], [0], [1], [0, 0, 1, 1], [], []>} : vector<16x16xf32>, vector<16x8xf32>, vector<16x8xf32> -> vector<16x8xf32>
    %77 = vector.extract_strided_slice %43 {offsets = [0, 8], sizes = [16, 8], strides = [1, 1]} : vector<16x32xf32> to vector<16x8xf32>
    %78 = vector.extract_strided_slice %50 {offsets = [0, 8], sizes = [16, 8], strides = [1, 1]} : vector<16x32xf32> to vector<16x8xf32>
    %79 = vector.extract_strided_slice %57 {offsets = [0, 8], sizes = [16, 8], strides = [1, 1]} : vector<16x32xf32> to vector<16x8xf32>
    %cst_45 = arith.constant dense<0.000000e+00> : vector<16x16xf32>
    %80 = tpu.matmul %77, %78, %cst_45 {dimension_numbers = #tpu.dot_dimension_numbers<[1], [1], [0], [0], [0, 0, 1, 0], [], []>} : vector<16x8xf32>, vector<16x8xf32>, vector<16x16xf32> -> vector<16x16xf32>
    %cst_46 = arith.constant 0.353553385 : f32
    %81 = vector.broadcast %cst_46 : f32 to vector<16x16xf32>
    %82 = arith.mulf %80, %81 : vector<16x16xf32>
    %83 = arith.addf %82, %10 : vector<16x16xf32>
    %cst_47 = arith.constant dense<0xFF800000> : vector<16xf32>
    %84 = vector.multi_reduction <maximumf>, %83, %cst_47 [1] : vector<16x16xf32> to vector<16xf32>
    %cst_48 = arith.constant 0xFF800000 : f32
    %85 = vector.broadcast %cst_48 : f32 to vector<16xf32>
    %86 = arith.maximumf %85, %84 : vector<16xf32>
    %87 = vector.shape_cast %86 : vector<16xf32> to vector<16x1xf32>
    %88 = vector.broadcast %87 : vector<16x1xf32> to vector<16x16xf32>
    %89 = arith.subf %83, %88 : vector<16x16xf32>
    %90 = math.exp %89 : vector<16x16xf32>
    %cst_49 = arith.constant dense<0.000000e+00> : vector<16xf32>
    %91 = vector.multi_reduction <add>, %90, %cst_49 [1] : vector<16x16xf32> to vector<16xf32>
    %92 = vector.shape_cast %91 : vector<16xf32> to vector<16x1xf32>
    %93 = vector.broadcast %92 : vector<16x1xf32> to vector<16x16xf32>
    %94 = arith.divf %90, %93 : vector<16x16xf32>
    %cst_50 = arith.constant dense<0.000000e+00> : vector<16x8xf32>
    %95 = tpu.matmul %94, %79, %cst_50 {dimension_numbers = #tpu.dot_dimension_numbers<[1], [0], [0], [1], [0, 0, 1, 1], [], []>} : vector<16x16xf32>, vector<16x8xf32>, vector<16x8xf32> -> vector<16x8xf32>
    %96 = vector.extract_strided_slice %43 {offsets = [0, 16], sizes = [16, 8], strides = [1, 1]} : vector<16x32xf32> to vector<16x8xf32>
    %97 = vector.extract_strided_slice %50 {offsets = [0, 16], sizes = [16, 8], strides = [1, 1]} : vector<16x32xf32> to vector<16x8xf32>
    %98 = vector.extract_strided_slice %57 {offsets = [0, 16], sizes = [16, 8], strides = [1, 1]} : vector<16x32xf32> to vector<16x8xf32>
    %cst_51 = arith.constant dense<0.000000e+00> : vector<16x16xf32>
    %99 = tpu.matmul %96, %97, %cst_51 {dimension_numbers = #tpu.dot_dimension_numbers<[1], [1], [0], [0], [0, 0, 1, 0], [], []>} : vector<16x8xf32>, vector<16x8xf32>, vector<16x16xf32> -> vector<16x16xf32>
    %cst_52 = arith.constant 0.353553385 : f32
    %100 = vector.broadcast %cst_52 : f32 to vector<16x16xf32>
    %101 = arith.mulf %99, %100 : vector<16x16xf32>
    %102 = arith.addf %101, %10 : vector<16x16xf32>
    %cst_53 = arith.constant dense<0xFF800000> : vector<16xf32>
    %103 = vector.multi_reduction <maximumf>, %102, %cst_53 [1] : vector<16x16xf32> to vector<16xf32>
    %cst_54 = arith.constant 0xFF800000 : f32
    %104 = vector.broadcast %cst_54 : f32 to vector<16xf32>
    %105 = arith.maximumf %104, %103 : vector<16xf32>
    %106 = vector.shape_cast %105 : vector<16xf32> to vector<16x1xf32>
    %107 = vector.broadcast %106 : vector<16x1xf32> to vector<16x16xf32>
    %108 = arith.subf %102, %107 : vector<16x16xf32>
    %109 = math.exp %108 : vector<16x16xf32>
    %cst_55 = arith.constant dense<0.000000e+00> : vector<16xf32>
    %110 = vector.multi_reduction <add>, %109, %cst_55 [1] : vector<16x16xf32> to vector<16xf32>
    %111 = vector.shape_cast %110 : vector<16xf32> to vector<16x1xf32>
    %112 = vector.broadcast %111 : vector<16x1xf32> to vector<16x16xf32>
    %113 = arith.divf %109, %112 : vector<16x16xf32>
    %cst_56 = arith.constant dense<0.000000e+00> : vector<16x8xf32>
    %114 = tpu.matmul %113, %98, %cst_56 {dimension_numbers = #tpu.dot_dimension_numbers<[1], [0], [0], [1], [0, 0, 1, 1], [], []>} : vector<16x16xf32>, vector<16x8xf32>, vector<16x8xf32> -> vector<16x8xf32>
    %115 = vector.extract_strided_slice %43 {offsets = [0, 24], sizes = [16, 8], strides = [1, 1]} : vector<16x32xf32> to vector<16x8xf32>
    %116 = vector.extract_strided_slice %50 {offsets = [0, 24], sizes = [16, 8], strides = [1, 1]} : vector<16x32xf32> to vector<16x8xf32>
    %117 = vector.extract_strided_slice %57 {offsets = [0, 24], sizes = [16, 8], strides = [1, 1]} : vector<16x32xf32> to vector<16x8xf32>
    %cst_57 = arith.constant dense<0.000000e+00> : vector<16x16xf32>
    %118 = tpu.matmul %115, %116, %cst_57 {dimension_numbers = #tpu.dot_dimension_numbers<[1], [1], [0], [0], [0, 0, 1, 0], [], []>} : vector<16x8xf32>, vector<16x8xf32>, vector<16x16xf32> -> vector<16x16xf32>
    %cst_58 = arith.constant 0.353553385 : f32
    %119 = vector.broadcast %cst_58 : f32 to vector<16x16xf32>
    %120 = arith.mulf %118, %119 : vector<16x16xf32>
    %121 = arith.addf %120, %10 : vector<16x16xf32>
    %cst_59 = arith.constant dense<0xFF800000> : vector<16xf32>
    %122 = vector.multi_reduction <maximumf>, %121, %cst_59 [1] : vector<16x16xf32> to vector<16xf32>
    %cst_60 = arith.constant 0xFF800000 : f32
    %123 = vector.broadcast %cst_60 : f32 to vector<16xf32>
    %124 = arith.maximumf %123, %122 : vector<16xf32>
    %125 = vector.shape_cast %124 : vector<16xf32> to vector<16x1xf32>
    %126 = vector.broadcast %125 : vector<16x1xf32> to vector<16x16xf32>
    %127 = arith.subf %121, %126 : vector<16x16xf32>
    %128 = math.exp %127 : vector<16x16xf32>
    %cst_61 = arith.constant dense<0.000000e+00> : vector<16xf32>
    %129 = vector.multi_reduction <add>, %128, %cst_61 [1] : vector<16x16xf32> to vector<16xf32>
    %130 = vector.shape_cast %129 : vector<16xf32> to vector<16x1xf32>
    %131 = vector.broadcast %130 : vector<16x1xf32> to vector<16x16xf32>
    %132 = arith.divf %128, %131 : vector<16x16xf32>
    %cst_62 = arith.constant dense<0.000000e+00> : vector<16x8xf32>
    %133 = tpu.matmul %132, %117, %cst_62 {dimension_numbers = #tpu.dot_dimension_numbers<[1], [0], [0], [1], [0, 0, 1, 1], [], []>} : vector<16x16xf32>, vector<16x8xf32>, vector<16x8xf32> -> vector<16x8xf32>
    %134 = tpu.concatenate %76, %95, %114, %133 in 1 : vector<16x8xf32>, vector<16x8xf32>, vector<16x8xf32>, vector<16x8xf32> -> vector<16x32xf32>
    %c0_63 = arith.constant 0 : index
    %c0_64 = arith.constant 0 : index
    %c0_65 = arith.constant 0 : index
    %135 = vector.load %arg12[%c0_63, %c0_64, %c0_65] : memref<2x32x32xf32, #tpu.memory_space<vmem>>, vector<1x32x32xf32>
    %136 = vector.shape_cast %135 : vector<1x32x32xf32> to vector<32x32xf32>
    %cst_66 = arith.constant dense<0.000000e+00> : vector<16x32xf32>
    %137 = tpu.matmul %134, %136, %cst_66 {dimension_numbers = #tpu.dot_dimension_numbers<[1], [0], [0], [1], [0, 0, 1, 1], [], []>} : vector<16x32xf32>, vector<32x32xf32>, vector<16x32xf32> -> vector<16x32xf32>
    %c0_67 = arith.constant 0 : index
    %c0_68 = arith.constant 0 : index
    %c0_69 = arith.constant 0 : index
    %138 = vector.load %arg13[%c0_67, %c0_68, %c0_69] : memref<2x1x32xf32, #tpu.memory_space<vmem>>, vector<1x1x32xf32>
    %139 = vector.shape_cast %138 : vector<1x1x32xf32> to vector<1x32xf32>
    %140 = vector.broadcast %139 : vector<1x32xf32> to vector<16x32xf32>
    %141 = arith.addf %137, %140 : vector<16x32xf32>
    %142 = arith.addf %9, %141 : vector<16x32xf32>
    %c0_70 = arith.constant 0 : index
    %c0_71 = arith.constant 0 : index
    %c0_72 = arith.constant 0 : index
    %143 = vector.load %arg14[%c0_70, %c0_71, %c0_72] : memref<2x1x32xf32, #tpu.memory_space<vmem>>, vector<1x1x32xf32>
    %144 = vector.shape_cast %143 : vector<1x1x32xf32> to vector<1x32xf32>
    %c0_73 = arith.constant 0 : index
    %c0_74 = arith.constant 0 : index
    %c0_75 = arith.constant 0 : index
    %145 = vector.load %arg15[%c0_73, %c0_74, %c0_75] : memref<2x1x32xf32, #tpu.memory_space<vmem>>, vector<1x1x32xf32>
    %146 = vector.shape_cast %145 : vector<1x1x32xf32> to vector<1x32xf32>
    %cst_76 = arith.constant dense<0.000000e+00> : vector<16xf32>
    %147 = vector.multi_reduction <add>, %142, %cst_76 [1] : vector<16x32xf32> to vector<16xf32>
    %148 = vector.shape_cast %147 : vector<16xf32> to vector<16x1xf32>
    %cst_77 = arith.constant 3.200000e+01 : f32
    %149 = vector.broadcast %cst_77 : f32 to vector<16x1xf32>
    %150 = arith.divf %148, %149 : vector<16x1xf32>
    %151 = vector.broadcast %150 : vector<16x1xf32> to vector<16x32xf32>
    %152 = arith.subf %142, %151 : vector<16x32xf32>
    %153 = arith.mulf %152, %152 : vector<16x32xf32>
    %cst_78 = arith.constant dense<0.000000e+00> : vector<16xf32>
    %154 = vector.multi_reduction <add>, %153, %cst_78 [1] : vector<16x32xf32> to vector<16xf32>
    %155 = vector.shape_cast %154 : vector<16xf32> to vector<16x1xf32>
    %cst_79 = arith.constant 3.200000e+01 : f32
    %156 = vector.broadcast %cst_79 : f32 to vector<16x1xf32>
    %157 = arith.divf %155, %156 : vector<16x1xf32>
    %158 = vector.broadcast %150 : vector<16x1xf32> to vector<16x32xf32>
    %159 = arith.subf %142, %158 : vector<16x32xf32>
    %cst_80 = arith.constant 9.99999974E-6 : f32
    %160 = vector.broadcast %cst_80 : f32 to vector<16x1xf32>
    %161 = arith.addf %157, %160 : vector<16x1xf32>
    %162 = math.rsqrt %161 : vector<16x1xf32>
    %163 = vector.broadcast %162 : vector<16x1xf32> to vector<16x32xf32>
    %164 = arith.mulf %159, %163 : vector<16x32xf32>
    %165 = vector.broadcast %144 : vector<1x32xf32> to vector<16x32xf32>
    %166 = arith.mulf %164, %165 : vector<16x32xf32>
    %167 = vector.broadcast %146 : vector<1x32xf32> to vector<16x32xf32>
    %168 = arith.addf %166, %167 : vector<16x32xf32>
    %c0_81 = arith.constant 0 : index
    %c0_82 = arith.constant 0 : index
    %c0_83 = arith.constant 0 : index
    %169 = vector.load %arg16[%c0_81, %c0_82, %c0_83] : memref<2x32x128xf32, #tpu.memory_space<vmem>>, vector<1x32x128xf32>
    %170 = vector.shape_cast %169 : vector<1x32x128xf32> to vector<32x128xf32>
    %cst_84 = arith.constant dense<0.000000e+00> : vector<16x128xf32>
    %171 = tpu.matmul %168, %170, %cst_84 {dimension_numbers = #tpu.dot_dimension_numbers<[1], [0], [0], [1], [0, 0, 1, 1], [], []>} : vector<16x32xf32>, vector<32x128xf32>, vector<16x128xf32> -> vector<16x128xf32>
    %c0_85 = arith.constant 0 : index
    %c0_86 = arith.constant 0 : index
    %c0_87 = arith.constant 0 : index
    %172 = vector.load %arg17[%c0_85, %c0_86, %c0_87] : memref<2x1x128xf32, #tpu.memory_space<vmem>>, vector<1x1x128xf32>
    %173 = vector.shape_cast %172 : vector<1x1x128xf32> to vector<1x128xf32>
    %174 = vector.broadcast %173 : vector<1x128xf32> to vector<16x128xf32>
    %175 = arith.addf %171, %174 : vector<16x128xf32>
    %cst_88 = arith.constant 5.000000e-01 : f32
    %176 = vector.broadcast %cst_88 : f32 to vector<16x128xf32>
    %177 = arith.mulf %176, %175 : vector<16x128xf32>
    %cst_89 = arith.constant 0.707106769 : f32
    %178 = vector.broadcast %cst_89 : f32 to vector<16x128xf32>
    %179 = arith.mulf %175, %178 : vector<16x128xf32>
    %180 = math.erf %179 : vector<16x128xf32>
    %cst_90 = arith.constant 1.000000e+00 : f32
    %181 = vector.broadcast %cst_90 : f32 to vector<16x128xf32>
    %182 = arith.addf %181, %180 : vector<16x128xf32>
    %183 = arith.mulf %177, %182 : vector<16x128xf32>
    %c0_91 = arith.constant 0 : index
    %c0_92 = arith.constant 0 : index
    %c0_93 = arith.constant 0 : index
    %184 = vector.load %arg18[%c0_91, %c0_92, %c0_93] : memref<2x128x32xf32, #tpu.memory_space<vmem>>, vector<1x128x32xf32>
    %185 = vector.shape_cast %184 : vector<1x128x32xf32> to vector<128x32xf32>
    %cst_94 = arith.constant dense<0.000000e+00> : vector<16x32xf32>
    %186 = tpu.matmul %183, %185, %cst_94 {dimension_numbers = #tpu.dot_dimension_numbers<[1], [0], [0], [1], [0, 0, 1, 1], [], []>} : vector<16x128xf32>, vector<128x32xf32>, vector<16x32xf32> -> vector<16x32xf32>
    %c0_95 = arith.constant 0 : index
    %c0_96 = arith.constant 0 : index
    %c0_97 = arith.constant 0 : index
    %187 = vector.load %arg19[%c0_95, %c0_96, %c0_97] : memref<2x1x32xf32, #tpu.memory_space<vmem>>, vector<1x1x32xf32>
    %188 = vector.shape_cast %187 : vector<1x1x32xf32> to vector<1x32xf32>
    %189 = vector.broadcast %188 : vector<1x32xf32> to vector<16x32xf32>
    %190 = arith.addf %186, %189 : vector<16x32xf32>
    %191 = arith.addf %142, %190 : vector<16x32xf32>
    %c1 = arith.constant 1 : index
    %c0_98 = arith.constant 0 : index
    %c0_99 = arith.constant 0 : index
    %192 = vector.load %arg4[%c1, %c0_98, %c0_99] : memref<2x1x32xf32, #tpu.memory_space<vmem>>, vector<1x1x32xf32>
    %193 = vector.shape_cast %192 : vector<1x1x32xf32> to vector<1x32xf32>
    %c1_100 = arith.constant 1 : index
    %c0_101 = arith.constant 0 : index
    %c0_102 = arith.constant 0 : index
    %194 = vector.load %arg5[%c1_100, %c0_101, %c0_102] : memref<2x1x32xf32, #tpu.memory_space<vmem>>, vector<1x1x32xf32>
    %195 = vector.shape_cast %194 : vector<1x1x32xf32> to vector<1x32xf32>
    %cst_103 = arith.constant dense<0.000000e+00> : vector<16xf32>
    %196 = vector.multi_reduction <add>, %191, %cst_103 [1] : vector<16x32xf32> to vector<16xf32>
    %197 = vector.shape_cast %196 : vector<16xf32> to vector<16x1xf32>
    %cst_104 = arith.constant 3.200000e+01 : f32
    %198 = vector.broadcast %cst_104 : f32 to vector<16x1xf32>
    %199 = arith.divf %197, %198 : vector<16x1xf32>
    %200 = vector.broadcast %199 : vector<16x1xf32> to vector<16x32xf32>
    %201 = arith.subf %191, %200 : vector<16x32xf32>
    %202 = arith.mulf %201, %201 : vector<16x32xf32>
    %cst_105 = arith.constant dense<0.000000e+00> : vector<16xf32>
    %203 = vector.multi_reduction <add>, %202, %cst_105 [1] : vector<16x32xf32> to vector<16xf32>
    %204 = vector.shape_cast %203 : vector<16xf32> to vector<16x1xf32>
    %cst_106 = arith.constant 3.200000e+01 : f32
    %205 = vector.broadcast %cst_106 : f32 to vector<16x1xf32>
    %206 = arith.divf %204, %205 : vector<16x1xf32>
    %207 = vector.broadcast %199 : vector<16x1xf32> to vector<16x32xf32>
    %208 = arith.subf %191, %207 : vector<16x32xf32>
    %cst_107 = arith.constant 9.99999974E-6 : f32
    %209 = vector.broadcast %cst_107 : f32 to vector<16x1xf32>
    %210 = arith.addf %206, %209 : vector<16x1xf32>
    %211 = math.rsqrt %210 : vector<16x1xf32>
    %212 = vector.broadcast %211 : vector<16x1xf32> to vector<16x32xf32>
    %213 = arith.mulf %208, %212 : vector<16x32xf32>
    %214 = vector.broadcast %193 : vector<1x32xf32> to vector<16x32xf32>
    %215 = arith.mulf %213, %214 : vector<16x32xf32>
    %216 = vector.broadcast %195 : vector<1x32xf32> to vector<16x32xf32>
    %217 = arith.addf %215, %216 : vector<16x32xf32>
    %c1_108 = arith.constant 1 : index
    %c0_109 = arith.constant 0 : index
    %c0_110 = arith.constant 0 : index
    %218 = vector.load %arg6[%c1_108, %c0_109, %c0_110] : memref<2x32x32xf32, #tpu.memory_space<vmem>>, vector<1x32x32xf32>
    %219 = vector.shape_cast %218 : vector<1x32x32xf32> to vector<32x32xf32>
    %cst_111 = arith.constant dense<0.000000e+00> : vector<16x32xf32>
    %220 = tpu.matmul %217, %219, %cst_111 {dimension_numbers = #tpu.dot_dimension_numbers<[1], [0], [0], [1], [0, 0, 1, 1], [], []>} : vector<16x32xf32>, vector<32x32xf32>, vector<16x32xf32> -> vector<16x32xf32>
    %c1_112 = arith.constant 1 : index
    %c0_113 = arith.constant 0 : index
    %c0_114 = arith.constant 0 : index
    %221 = vector.load %arg7[%c1_112, %c0_113, %c0_114] : memref<2x1x32xf32, #tpu.memory_space<vmem>>, vector<1x1x32xf32>
    %222 = vector.shape_cast %221 : vector<1x1x32xf32> to vector<1x32xf32>
    %223 = vector.broadcast %222 : vector<1x32xf32> to vector<16x32xf32>
    %224 = arith.addf %220, %223 : vector<16x32xf32>
    %c1_115 = arith.constant 1 : index
    %c0_116 = arith.constant 0 : index
    %c0_117 = arith.constant 0 : index
    %225 = vector.load %arg8[%c1_115, %c0_116, %c0_117] : memref<2x32x32xf32, #tpu.memory_space<vmem>>, vector<1x32x32xf32>
    %226 = vector.shape_cast %225 : vector<1x32x32xf32> to vector<32x32xf32>
    %cst_118 = arith.constant dense<0.000000e+00> : vector<16x32xf32>
    %227 = tpu.matmul %217, %226, %cst_118 {dimension_numbers = #tpu.dot_dimension_numbers<[1], [0], [0], [1], [0, 0, 1, 1], [], []>} : vector<16x32xf32>, vector<32x32xf32>, vector<16x32xf32> -> vector<16x32xf32>
    %c1_119 = arith.constant 1 : index
    %c0_120 = arith.constant 0 : index
    %c0_121 = arith.constant 0 : index
    %228 = vector.load %arg9[%c1_119, %c0_120, %c0_121] : memref<2x1x32xf32, #tpu.memory_space<vmem>>, vector<1x1x32xf32>
    %229 = vector.shape_cast %228 : vector<1x1x32xf32> to vector<1x32xf32>
    %230 = vector.broadcast %229 : vector<1x32xf32> to vector<16x32xf32>
    %231 = arith.addf %227, %230 : vector<16x32xf32>
    %c1_122 = arith.constant 1 : index
    %c0_123 = arith.constant 0 : index
    %c0_124 = arith.constant 0 : index
    %232 = vector.load %arg10[%c1_122, %c0_123, %c0_124] : memref<2x32x32xf32, #tpu.memory_space<vmem>>, vector<1x32x32xf32>
    %233 = vector.shape_cast %232 : vector<1x32x32xf32> to vector<32x32xf32>
    %cst_125 = arith.constant dense<0.000000e+00> : vector<16x32xf32>
    %234 = tpu.matmul %217, %233, %cst_125 {dimension_numbers = #tpu.dot_dimension_numbers<[1], [0], [0], [1], [0, 0, 1, 1], [], []>} : vector<16x32xf32>, vector<32x32xf32>, vector<16x32xf32> -> vector<16x32xf32>
    %c1_126 = arith.constant 1 : index
    %c0_127 = arith.constant 0 : index
    %c0_128 = arith.constant 0 : index
    %235 = vector.load %arg11[%c1_126, %c0_127, %c0_128] : memref<2x1x32xf32, #tpu.memory_space<vmem>>, vector<1x1x32xf32>
    %236 = vector.shape_cast %235 : vector<1x1x32xf32> to vector<1x32xf32>
    %237 = vector.broadcast %236 : vector<1x32xf32> to vector<16x32xf32>
    %238 = arith.addf %234, %237 : vector<16x32xf32>
    %239 = vector.extract_strided_slice %224 {offsets = [0, 0], sizes = [16, 8], strides = [1, 1]} : vector<16x32xf32> to vector<16x8xf32>
    %240 = vector.extract_strided_slice %231 {offsets = [0, 0], sizes = [16, 8], strides = [1, 1]} : vector<16x32xf32> to vector<16x8xf32>
    %241 = vector.extract_strided_slice %238 {offsets = [0, 0], sizes = [16, 8], strides = [1, 1]} : vector<16x32xf32> to vector<16x8xf32>
    %cst_129 = arith.constant dense<0.000000e+00> : vector<16x16xf32>
    %242 = tpu.matmul %239, %240, %cst_129 {dimension_numbers = #tpu.dot_dimension_numbers<[1], [1], [0], [0], [0, 0, 1, 0], [], []>} : vector<16x8xf32>, vector<16x8xf32>, vector<16x16xf32> -> vector<16x16xf32>
    %cst_130 = arith.constant 0.353553385 : f32
    %243 = vector.broadcast %cst_130 : f32 to vector<16x16xf32>
    %244 = arith.mulf %242, %243 : vector<16x16xf32>
    %245 = arith.addf %244, %10 : vector<16x16xf32>
    %cst_131 = arith.constant dense<0xFF800000> : vector<16xf32>
    %246 = vector.multi_reduction <maximumf>, %245, %cst_131 [1] : vector<16x16xf32> to vector<16xf32>
    %cst_132 = arith.constant 0xFF800000 : f32
    %247 = vector.broadcast %cst_132 : f32 to vector<16xf32>
    %248 = arith.maximumf %247, %246 : vector<16xf32>
    %249 = vector.shape_cast %248 : vector<16xf32> to vector<16x1xf32>
    %250 = vector.broadcast %249 : vector<16x1xf32> to vector<16x16xf32>
    %251 = arith.subf %245, %250 : vector<16x16xf32>
    %252 = math.exp %251 : vector<16x16xf32>
    %cst_133 = arith.constant dense<0.000000e+00> : vector<16xf32>
    %253 = vector.multi_reduction <add>, %252, %cst_133 [1] : vector<16x16xf32> to vector<16xf32>
    %254 = vector.shape_cast %253 : vector<16xf32> to vector<16x1xf32>
    %255 = vector.broadcast %254 : vector<16x1xf32> to vector<16x16xf32>
    %256 = arith.divf %252, %255 : vector<16x16xf32>
    %cst_134 = arith.constant dense<0.000000e+00> : vector<16x8xf32>
    %257 = tpu.matmul %256, %241, %cst_134 {dimension_numbers = #tpu.dot_dimension_numbers<[1], [0], [0], [1], [0, 0, 1, 1], [], []>} : vector<16x16xf32>, vector<16x8xf32>, vector<16x8xf32> -> vector<16x8xf32>
    %258 = vector.extract_strided_slice %224 {offsets = [0, 8], sizes = [16, 8], strides = [1, 1]} : vector<16x32xf32> to vector<16x8xf32>
    %259 = vector.extract_strided_slice %231 {offsets = [0, 8], sizes = [16, 8], strides = [1, 1]} : vector<16x32xf32> to vector<16x8xf32>
    %260 = vector.extract_strided_slice %238 {offsets = [0, 8], sizes = [16, 8], strides = [1, 1]} : vector<16x32xf32> to vector<16x8xf32>
    %cst_135 = arith.constant dense<0.000000e+00> : vector<16x16xf32>
    %261 = tpu.matmul %258, %259, %cst_135 {dimension_numbers = #tpu.dot_dimension_numbers<[1], [1], [0], [0], [0, 0, 1, 0], [], []>} : vector<16x8xf32>, vector<16x8xf32>, vector<16x16xf32> -> vector<16x16xf32>
    %cst_136 = arith.constant 0.353553385 : f32
    %262 = vector.broadcast %cst_136 : f32 to vector<16x16xf32>
    %263 = arith.mulf %261, %262 : vector<16x16xf32>
    %264 = arith.addf %263, %10 : vector<16x16xf32>
    %cst_137 = arith.constant dense<0xFF800000> : vector<16xf32>
    %265 = vector.multi_reduction <maximumf>, %264, %cst_137 [1] : vector<16x16xf32> to vector<16xf32>
    %cst_138 = arith.constant 0xFF800000 : f32
    %266 = vector.broadcast %cst_138 : f32 to vector<16xf32>
    %267 = arith.maximumf %266, %265 : vector<16xf32>
    %268 = vector.shape_cast %267 : vector<16xf32> to vector<16x1xf32>
    %269 = vector.broadcast %268 : vector<16x1xf32> to vector<16x16xf32>
    %270 = arith.subf %264, %269 : vector<16x16xf32>
    %271 = math.exp %270 : vector<16x16xf32>
    %cst_139 = arith.constant dense<0.000000e+00> : vector<16xf32>
    %272 = vector.multi_reduction <add>, %271, %cst_139 [1] : vector<16x16xf32> to vector<16xf32>
    %273 = vector.shape_cast %272 : vector<16xf32> to vector<16x1xf32>
    %274 = vector.broadcast %273 : vector<16x1xf32> to vector<16x16xf32>
    %275 = arith.divf %271, %274 : vector<16x16xf32>
    %cst_140 = arith.constant dense<0.000000e+00> : vector<16x8xf32>
    %276 = tpu.matmul %275, %260, %cst_140 {dimension_numbers = #tpu.dot_dimension_numbers<[1], [0], [0], [1], [0, 0, 1, 1], [], []>} : vector<16x16xf32>, vector<16x8xf32>, vector<16x8xf32> -> vector<16x8xf32>
    %277 = vector.extract_strided_slice %224 {offsets = [0, 16], sizes = [16, 8], strides = [1, 1]} : vector<16x32xf32> to vector<16x8xf32>
    %278 = vector.extract_strided_slice %231 {offsets = [0, 16], sizes = [16, 8], strides = [1, 1]} : vector<16x32xf32> to vector<16x8xf32>
    %279 = vector.extract_strided_slice %238 {offsets = [0, 16], sizes = [16, 8], strides = [1, 1]} : vector<16x32xf32> to vector<16x8xf32>
    %cst_141 = arith.constant dense<0.000000e+00> : vector<16x16xf32>
    %280 = tpu.matmul %277, %278, %cst_141 {dimension_numbers = #tpu.dot_dimension_numbers<[1], [1], [0], [0], [0, 0, 1, 0], [], []>} : vector<16x8xf32>, vector<16x8xf32>, vector<16x16xf32> -> vector<16x16xf32>
    %cst_142 = arith.constant 0.353553385 : f32
    %281 = vector.broadcast %cst_142 : f32 to vector<16x16xf32>
    %282 = arith.mulf %280, %281 : vector<16x16xf32>
    %283 = arith.addf %282, %10 : vector<16x16xf32>
    %cst_143 = arith.constant dense<0xFF800000> : vector<16xf32>
    %284 = vector.multi_reduction <maximumf>, %283, %cst_143 [1] : vector<16x16xf32> to vector<16xf32>
    %cst_144 = arith.constant 0xFF800000 : f32
    %285 = vector.broadcast %cst_144 : f32 to vector<16xf32>
    %286 = arith.maximumf %285, %284 : vector<16xf32>
    %287 = vector.shape_cast %286 : vector<16xf32> to vector<16x1xf32>
    %288 = vector.broadcast %287 : vector<16x1xf32> to vector<16x16xf32>
    %289 = arith.subf %283, %288 : vector<16x16xf32>
    %290 = math.exp %289 : vector<16x16xf32>
    %cst_145 = arith.constant dense<0.000000e+00> : vector<16xf32>
    %291 = vector.multi_reduction <add>, %290, %cst_145 [1] : vector<16x16xf32> to vector<16xf32>
    %292 = vector.shape_cast %291 : vector<16xf32> to vector<16x1xf32>
    %293 = vector.broadcast %292 : vector<16x1xf32> to vector<16x16xf32>
    %294 = arith.divf %290, %293 : vector<16x16xf32>
    %cst_146 = arith.constant dense<0.000000e+00> : vector<16x8xf32>
    %295 = tpu.matmul %294, %279, %cst_146 {dimension_numbers = #tpu.dot_dimension_numbers<[1], [0], [0], [1], [0, 0, 1, 1], [], []>} : vector<16x16xf32>, vector<16x8xf32>, vector<16x8xf32> -> vector<16x8xf32>
    %296 = vector.extract_strided_slice %224 {offsets = [0, 24], sizes = [16, 8], strides = [1, 1]} : vector<16x32xf32> to vector<16x8xf32>
    %297 = vector.extract_strided_slice %231 {offsets = [0, 24], sizes = [16, 8], strides = [1, 1]} : vector<16x32xf32> to vector<16x8xf32>
    %298 = vector.extract_strided_slice %238 {offsets = [0, 24], sizes = [16, 8], strides = [1, 1]} : vector<16x32xf32> to vector<16x8xf32>
    %cst_147 = arith.constant dense<0.000000e+00> : vector<16x16xf32>
    %299 = tpu.matmul %296, %297, %cst_147 {dimension_numbers = #tpu.dot_dimension_numbers<[1], [1], [0], [0], [0, 0, 1, 0], [], []>} : vector<16x8xf32>, vector<16x8xf32>, vector<16x16xf32> -> vector<16x16xf32>
    %cst_148 = arith.constant 0.353553385 : f32
    %300 = vector.broadcast %cst_148 : f32 to vector<16x16xf32>
    %301 = arith.mulf %299, %300 : vector<16x16xf32>
    %302 = arith.addf %301, %10 : vector<16x16xf32>
    %cst_149 = arith.constant dense<0xFF800000> : vector<16xf32>
    %303 = vector.multi_reduction <maximumf>, %302, %cst_149 [1] : vector<16x16xf32> to vector<16xf32>
    %cst_150 = arith.constant 0xFF800000 : f32
    %304 = vector.broadcast %cst_150 : f32 to vector<16xf32>
    %305 = arith.maximumf %304, %303 : vector<16xf32>
    %306 = vector.shape_cast %305 : vector<16xf32> to vector<16x1xf32>
    %307 = vector.broadcast %306 : vector<16x1xf32> to vector<16x16xf32>
    %308 = arith.subf %302, %307 : vector<16x16xf32>
    %309 = math.exp %308 : vector<16x16xf32>
    %cst_151 = arith.constant dense<0.000000e+00> : vector<16xf32>
    %310 = vector.multi_reduction <add>, %309, %cst_151 [1] : vector<16x16xf32> to vector<16xf32>
    %311 = vector.shape_cast %310 : vector<16xf32> to vector<16x1xf32>
    %312 = vector.broadcast %311 : vector<16x1xf32> to vector<16x16xf32>
    %313 = arith.divf %309, %312 : vector<16x16xf32>
    %cst_152 = arith.constant dense<0.000000e+00> : vector<16x8xf32>
    %314 = tpu.matmul %313, %298, %cst_152 {dimension_numbers = #tpu.dot_dimension_numbers<[1], [0], [0], [1], [0, 0, 1, 1], [], []>} : vector<16x16xf32>, vector<16x8xf32>, vector<16x8xf32> -> vector<16x8xf32>
    %315 = tpu.concatenate %257, %276, %295, %314 in 1 : vector<16x8xf32>, vector<16x8xf32>, vector<16x8xf32>, vector<16x8xf32> -> vector<16x32xf32>
    %c1_153 = arith.constant 1 : index
    %c0_154 = arith.constant 0 : index
    %c0_155 = arith.constant 0 : index
    %316 = vector.load %arg12[%c1_153, %c0_154, %c0_155] : memref<2x32x32xf32, #tpu.memory_space<vmem>>, vector<1x32x32xf32>
    %317 = vector.shape_cast %316 : vector<1x32x32xf32> to vector<32x32xf32>
    %cst_156 = arith.constant dense<0.000000e+00> : vector<16x32xf32>
    %318 = tpu.matmul %315, %317, %cst_156 {dimension_numbers = #tpu.dot_dimension_numbers<[1], [0], [0], [1], [0, 0, 1, 1], [], []>} : vector<16x32xf32>, vector<32x32xf32>, vector<16x32xf32> -> vector<16x32xf32>
    %c1_157 = arith.constant 1 : index
    %c0_158 = arith.constant 0 : index
    %c0_159 = arith.constant 0 : index
    %319 = vector.load %arg13[%c1_157, %c0_158, %c0_159] : memref<2x1x32xf32, #tpu.memory_space<vmem>>, vector<1x1x32xf32>
    %320 = vector.shape_cast %319 : vector<1x1x32xf32> to vector<1x32xf32>
    %321 = vector.broadcast %320 : vector<1x32xf32> to vector<16x32xf32>
    %322 = arith.addf %318, %321 : vector<16x32xf32>
    %323 = arith.addf %191, %322 : vector<16x32xf32>
    %c1_160 = arith.constant 1 : index
    %c0_161 = arith.constant 0 : index
    %c0_162 = arith.constant 0 : index
    %324 = vector.load %arg14[%c1_160, %c0_161, %c0_162] : memref<2x1x32xf32, #tpu.memory_space<vmem>>, vector<1x1x32xf32>
    %325 = vector.shape_cast %324 : vector<1x1x32xf32> to vector<1x32xf32>
    %c1_163 = arith.constant 1 : index
    %c0_164 = arith.constant 0 : index
    %c0_165 = arith.constant 0 : index
    %326 = vector.load %arg15[%c1_163, %c0_164, %c0_165] : memref<2x1x32xf32, #tpu.memory_space<vmem>>, vector<1x1x32xf32>
    %327 = vector.shape_cast %326 : vector<1x1x32xf32> to vector<1x32xf32>
    %cst_166 = arith.constant dense<0.000000e+00> : vector<16xf32>
    %328 = vector.multi_reduction <add>, %323, %cst_166 [1] : vector<16x32xf32> to vector<16xf32>
    %329 = vector.shape_cast %328 : vector<16xf32> to vector<16x1xf32>
    %cst_167 = arith.constant 3.200000e+01 : f32
    %330 = vector.broadcast %cst_167 : f32 to vector<16x1xf32>
    %331 = arith.divf %329, %330 : vector<16x1xf32>
    %332 = vector.broadcast %331 : vector<16x1xf32> to vector<16x32xf32>
    %333 = arith.subf %323, %332 : vector<16x32xf32>
    %334 = arith.mulf %333, %333 : vector<16x32xf32>
    %cst_168 = arith.constant dense<0.000000e+00> : vector<16xf32>
    %335 = vector.multi_reduction <add>, %334, %cst_168 [1] : vector<16x32xf32> to vector<16xf32>
    %336 = vector.shape_cast %335 : vector<16xf32> to vector<16x1xf32>
    %cst_169 = arith.constant 3.200000e+01 : f32
    %337 = vector.broadcast %cst_169 : f32 to vector<16x1xf32>
    %338 = arith.divf %336, %337 : vector<16x1xf32>
    %339 = vector.broadcast %331 : vector<16x1xf32> to vector<16x32xf32>
    %340 = arith.subf %323, %339 : vector<16x32xf32>
    %cst_170 = arith.constant 9.99999974E-6 : f32
    %341 = vector.broadcast %cst_170 : f32 to vector<16x1xf32>
    %342 = arith.addf %338, %341 : vector<16x1xf32>
    %343 = math.rsqrt %342 : vector<16x1xf32>
    %344 = vector.broadcast %343 : vector<16x1xf32> to vector<16x32xf32>
    %345 = arith.mulf %340, %344 : vector<16x32xf32>
    %346 = vector.broadcast %325 : vector<1x32xf32> to vector<16x32xf32>
    %347 = arith.mulf %345, %346 : vector<16x32xf32>
    %348 = vector.broadcast %327 : vector<1x32xf32> to vector<16x32xf32>
    %349 = arith.addf %347, %348 : vector<16x32xf32>
    %c1_171 = arith.constant 1 : index
    %c0_172 = arith.constant 0 : index
    %c0_173 = arith.constant 0 : index
    %350 = vector.load %arg16[%c1_171, %c0_172, %c0_173] : memref<2x32x128xf32, #tpu.memory_space<vmem>>, vector<1x32x128xf32>
    %351 = vector.shape_cast %350 : vector<1x32x128xf32> to vector<32x128xf32>
    %cst_174 = arith.constant dense<0.000000e+00> : vector<16x128xf32>
    %352 = tpu.matmul %349, %351, %cst_174 {dimension_numbers = #tpu.dot_dimension_numbers<[1], [0], [0], [1], [0, 0, 1, 1], [], []>} : vector<16x32xf32>, vector<32x128xf32>, vector<16x128xf32> -> vector<16x128xf32>
    %c1_175 = arith.constant 1 : index
    %c0_176 = arith.constant 0 : index
    %c0_177 = arith.constant 0 : index
    %353 = vector.load %arg17[%c1_175, %c0_176, %c0_177] : memref<2x1x128xf32, #tpu.memory_space<vmem>>, vector<1x1x128xf32>
    %354 = vector.shape_cast %353 : vector<1x1x128xf32> to vector<1x128xf32>
    %355 = vector.broadcast %354 : vector<1x128xf32> to vector<16x128xf32>
    %356 = arith.addf %352, %355 : vector<16x128xf32>
    %cst_178 = arith.constant 5.000000e-01 : f32
    %357 = vector.broadcast %cst_178 : f32 to vector<16x128xf32>
    %358 = arith.mulf %357, %356 : vector<16x128xf32>
    %cst_179 = arith.constant 0.707106769 : f32
    %359 = vector.broadcast %cst_179 : f32 to vector<16x128xf32>
    %360 = arith.mulf %356, %359 : vector<16x128xf32>
    %361 = math.erf %360 : vector<16x128xf32>
    %cst_180 = arith.constant 1.000000e+00 : f32
    %362 = vector.broadcast %cst_180 : f32 to vector<16x128xf32>
    %363 = arith.addf %362, %361 : vector<16x128xf32>
    %364 = arith.mulf %358, %363 : vector<16x128xf32>
    %c1_181 = arith.constant 1 : index
    %c0_182 = arith.constant 0 : index
    %c0_183 = arith.constant 0 : index
    %365 = vector.load %arg18[%c1_181, %c0_182, %c0_183] : memref<2x128x32xf32, #tpu.memory_space<vmem>>, vector<1x128x32xf32>
    %366 = vector.shape_cast %365 : vector<1x128x32xf32> to vector<128x32xf32>
    %cst_184 = arith.constant dense<0.000000e+00> : vector<16x32xf32>
    %367 = tpu.matmul %364, %366, %cst_184 {dimension_numbers = #tpu.dot_dimension_numbers<[1], [0], [0], [1], [0, 0, 1, 1], [], []>} : vector<16x128xf32>, vector<128x32xf32>, vector<16x32xf32> -> vector<16x32xf32>
    %c1_185 = arith.constant 1 : index
    %c0_186 = arith.constant 0 : index
    %c0_187 = arith.constant 0 : index
    %368 = vector.load %arg19[%c1_185, %c0_186, %c0_187] : memref<2x1x32xf32, #tpu.memory_space<vmem>>, vector<1x1x32xf32>
    %369 = vector.shape_cast %368 : vector<1x1x32xf32> to vector<1x32xf32>
    %370 = vector.broadcast %369 : vector<1x32xf32> to vector<16x32xf32>
    %371 = arith.addf %367, %370 : vector<16x32xf32>
    %372 = arith.addf %323, %371 : vector<16x32xf32>
    %c0_188 = arith.constant 0 : index
    %c0_189 = arith.constant 0 : index
    %373 = vector.load %arg20[%c0_188, %c0_189] : memref<1x32xf32, #tpu.memory_space<vmem>>, vector<1x32xf32>
    %c0_190 = arith.constant 0 : index
    %c0_191 = arith.constant 0 : index
    %374 = vector.load %arg21[%c0_190, %c0_191] : memref<1x32xf32, #tpu.memory_space<vmem>>, vector<1x32xf32>
    %cst_192 = arith.constant dense<0.000000e+00> : vector<16xf32>
    %375 = vector.multi_reduction <add>, %372, %cst_192 [1] : vector<16x32xf32> to vector<16xf32>
    %376 = vector.shape_cast %375 : vector<16xf32> to vector<16x1xf32>
    %cst_193 = arith.constant 3.200000e+01 : f32
    %377 = vector.broadcast %cst_193 : f32 to vector<16x1xf32>
    %378 = arith.divf %376, %377 : vector<16x1xf32>
    %379 = vector.broadcast %378 : vector<16x1xf32> to vector<16x32xf32>
    %380 = arith.subf %372, %379 : vector<16x32xf32>
    %381 = arith.mulf %380, %380 : vector<16x32xf32>
    %cst_194 = arith.constant dense<0.000000e+00> : vector<16xf32>
    %382 = vector.multi_reduction <add>, %381, %cst_194 [1] : vector<16x32xf32> to vector<16xf32>
    %383 = vector.shape_cast %382 : vector<16xf32> to vector<16x1xf32>
    %cst_195 = arith.constant 3.200000e+01 : f32
    %384 = vector.broadcast %cst_195 : f32 to vector<16x1xf32>
    %385 = arith.divf %383, %384 : vector<16x1xf32>
    %386 = vector.broadcast %378 : vector<16x1xf32> to vector<16x32xf32>
    %387 = arith.subf %372, %386 : vector<16x32xf32>
    %cst_196 = arith.constant 9.99999974E-6 : f32
    %388 = vector.broadcast %cst_196 : f32 to vector<16x1xf32>
    %389 = arith.addf %385, %388 : vector<16x1xf32>
    %390 = math.rsqrt %389 : vector<16x1xf32>
    %391 = vector.broadcast %390 : vector<16x1xf32> to vector<16x32xf32>
    %392 = arith.mulf %387, %391 : vector<16x32xf32>
    %393 = vector.broadcast %373 : vector<1x32xf32> to vector<16x32xf32>
    %394 = arith.mulf %392, %393 : vector<16x32xf32>
    %395 = vector.broadcast %374 : vector<1x32xf32> to vector<16x32xf32>
    %396 = arith.addf %394, %395 : vector<16x32xf32>
    %c0_197 = arith.constant 0 : index
    %c0_198 = arith.constant 0 : index
    %397 = vector.load %arg22[%c0_197, %c0_198] : memref<32x64xf32, #tpu.memory_space<vmem>>, vector<32x64xf32>
    %cst_199 = arith.constant dense<0.000000e+00> : vector<16x64xf32>
    %398 = tpu.matmul %396, %397, %cst_199 {dimension_numbers = #tpu.dot_dimension_numbers<[1], [0], [0], [1], [0, 0, 1, 1], [], []>} : vector<16x32xf32>, vector<32x64xf32>, vector<16x64xf32> -> vector<16x64xf32>
    %c0_200 = arith.constant 0 : index
    %c0_201 = arith.constant 0 : index
    %399 = vector.load %arg23[%c0_200, %c0_201] : memref<16x64xf32, #tpu.memory_space<vmem>>, vector<16x64xf32>
    tpu.vector_store %arg23[%c0_200, %c0_201], %398 {strides = array<i32>} : memref<16x64xf32, #tpu.memory_space<vmem>>, vector<16x64xf32>,
    return
  }
}

</mosaic_0001>

<bundles_post_ra>
// kernel: _gpt_forward_jit.1
= control target key start
LH: loop header
LB: loop body
LE: loop exit
PB: predicated region body
PF: predicated region fallthrough
CT: control target
= control target key end

     0   :  { %s3453_s0 = inlined_call_operand.vmem [shape: s32[16,1], index: 0, kind: input, shape index: {}]   ;;  %s3454_s1 = inlined_call_operand.vmem [shape: f32[16,32], index: 1, kind: input, shape index: {}]   ;;  %s3455_s2 = inlined_call_operand.vmem [shape: f32[16,16], index: 2, kind: input, shape index: {}]   ;;  %s3456_s3 = inlined_call_operand.vmem [shape: f32[64,32], index: 3, kind: input, shape index: {}]   ;;  %s3457_s4 = inlined_call_operand.vmem [shape: f32[2,1,32], index: 4, kind: input, shape index: {}]   ;;  %s3458_s5 = inlined_call_operand.vmem [shape: f32[2,1,32], index: 5, kind: input, shape index: {}]   ;;  %s3459_s6 = inlined_call_operand.vmem [shape: f32[2,32,32], index: 6, kind: input, shape index: {}]   ;;  %s3460_s7 = inlined_call_operand.vmem [shape: f32[2,1,32], index: 7, kind: input, shape index: {}]   ;;  %s3461_s8 = inlined_call_operand.vmem [shape: f32[2,32,32], index: 8, kind: input, shape index: {}]   ;;  %s3462_s9 = inlined_call_operand.vmem [shape: f32[2,1,32], index: 9, kind: input, shape index: {}]   ;;  %s3463_s10 = inlined_call_operand.vmem [shape: f32[2,32,32], index: 10, kind: input, shape index: {}]   ;;  %s3464_s11 = inlined_call_operand.vmem [shape: f32[2,1,32], index: 11, kind: input, shape index: {}]   ;;  %s3465_s12 = inlined_call_operand.vmem [shape: f32[2,32,32], index: 12, kind: input, shape index: {}]   ;;  %s3466_s13 = inlined_call_operand.vmem [shape: f32[2,1,32], index: 13, kind: input, shape index: {}]   ;;  %s3467_s14 = inlined_call_operand.vmem [shape: f32[2,1,32], index: 14, kind: input, shape index: {}]   ;;  %s3468_s15 = inlined_call_operand.vmem [shape: f32[2,1,32], index: 15, kind: input, shape index: {}]   ;;  %s3469_s16 = inlined_call_operand.vmem [shape: f32[2,32,128], index: 16, kind: input, shape index: {}]   ;;  %s3470_s17 = inlined_call_operand.vmem [shape: f32[2,1,128], index: 17, kind: input, shape index: {}]   ;;  %s3471_s18 = inlined_call_operand.vmem [shape: f32[2,128,32], index: 18, kind: input, shape index: {}]   ;;  %s3472_s19 = inlined_call_operand.vmem [shape: f32[2,1,32], index: 19, kind: input, shape index: {}]   ;;  %s3473_s20 = inlined_call_operand.vmem [shape: f32[1,32], index: 20, kind: input, shape index: {}]   ;;  %s3474_s21 = inlined_call_operand.vmem [shape: f32[1,32], index: 21, kind: input, shape index: {}]   ;;  %s3475_s22 = inlined_call_operand.vmem [shape: f32[32,64], index: 22, kind: input, shape index: {}]   ;;  %s3476_s23 = inlined_call_operand.hbm [shape: f32[16,64], index: 23, kind: output, shape index: {}]  }
   0x1   :  { %3498 = sst [smem:[#allocation5_spill]] %s3453_s0 }
   0x2   :  { %3499 = sst [smem:[#allocation6_spill]] %s3454_s1 }
   0x3   :  { %3500 = sst [smem:[#allocation7_spill]] %s3455_s2 }
   0x4   :  { %3501 = sst [smem:[#allocation8_spill]] %s3456_s3 }
   0x5   :  { %3502 = sst [smem:[#allocation9_spill]] %s3457_s4 }
   0x6   :  { %3503 = sst [smem:[#allocation10_spill]] %s3458_s5 }
   0x7   :  { %3504 = sst [smem:[#allocation11_spill]] %s3459_s6 }
   0x8   :  { %3505 = sst [smem:[#allocation12_spill]] %s3460_s7 }
   0x9   :  { %3506 = sst [smem:[#allocation13_spill]] %s3470_s17 }
   0xa   :  { %s3507_s24 = sld [smem:[#allocation5_spill]]  ;;  %v2473_v2 = vmov 0  }
   0xb   :  { %s3508_s17 = sld [smem:[#allocation8_spill]]  ;;  %2298 = vset.pattern.permute.xlu0 %v2473_v2 }
  0x10   :  { %v77_v0 = vld [vmem:[%s3507_s24] sm:$0xff]  ;;  %v78_v7 = vld [vmem:[%s3507_s24 + $0x8] sm:$0xff] }
  0x11   :  { %v98_v1 = vld [vmem:[%s3508_s17 + $0x38] sm:$0xff]  ;;  %v97_v3 = vld [vmem:[%s3508_s17 + $0x30] sm:$0xff]  ;;  %80 = vperm.xlu0 %2298, %v77_v0   ;;  %v96_v4 = vld [vmem:[%s3508_s17 + $0x28] sm:$0xff] }
  0x12   :  { %116 = vmatpush.msra.mxu0 %v98_v1  ;;  %v95_v5 = vld [vmem:[%s3508_s17 + $0x20] sm:$0xff]  ;;  %v94_v6 = vld [vmem:[%s3508_s17 + $0x18] sm:$0xff]  ;;  %v93_v8 = vld [vmem:[%s3508_s17 + $0x10] sm:$0xff] }
  0x13   :  { %v92_v9 = vld [vmem:[%s3508_s17 + $0x8] sm:$0xff] }
  0x14   :  { %117 = vmatpush.msra.mxu0 %v97_v3 }
  0x16   :  { %118 = vmatpush.msra.mxu0 %v96_v4 }
  0x18   :  { %119 = vmatpush.msra.mxu0 %v95_v5 }
  0x19   :  { %83 = vperm.xlu0 %2298, %v78_v7  }
  0x1a   :  { %120 = vmatpush.msra.mxu0 %v94_v6 }
  0x1b   :  { %28 = vsyncpa [#allocation3], 0  ;;  %v91_v10 = vld [vmem:[%s3508_s17] sm:$0xff]  ;;  %v75_v11 = vlaneseq  ;;  %vm101_vm0 = vcmask 523264   ;;  %v2474_v14 = vmov 0.0   ;;  %s3509_s6 = sld [smem:[#allocation6_spill]] }
  0x1c   :  { %121 = vmatpush.msra.mxu0 %v93_v8  ;;  %vm135_vm3 = vcmask 261120   ;;  %v2475_v26 = vmov 32.0   ;;  %s3510_s29 = sld [smem:[#allocation11_spill]]  ;;  %v237_v44 = vld [vmem:[%s3461_s8 + $0x18] sm:$0xff]  ;;  %v236_v47 = vld [vmem:[%s3461_s8 + $0x10] sm:$0xff]  ;;  %v235_v50 = vld [vmem:[%s3461_s8 + $0x8] sm:$0xff] }
  0x1d   :  { %v76_v12 = vand.u32 127, %v75_v11  ;;  %2351 = vrcp.f32 %v2475_v26  ;;  %v268_v45 = vld [vmem:[%s3463_s10 + $0x18] sm:$0xff]  ;;  %v267_v48 = vld [vmem:[%s3463_s10 + $0x10] sm:$0xff]  ;;  %v266_v51 = vld [vmem:[%s3463_s10 + $0x8] sm:$0xff]  ;;  %s3511_s2 = sld [smem:[#allocation9_spill]]  ;;  %s3496_s30 = smov 120  }
  0x1e   :  { %122 = vmatpush.msra.mxu0 %v92_v9  ;;  %285 = vmatpush.msra.mxu3 %v268_v45  ;;  %v234_v53 = vld [vmem:[%s3461_s8] sm:$0xff]  ;;  %s3512_s27 = sld [smem:[#allocation10_spill]]  ;;  %vm296_vm11 = vcmask 64512   ;;  %s3494_s25 = smov 104   ;;  %vm336_vm12 = vcmask 130048  }
  0x1f   :  { %v265_v54 = vld [vmem:[%s3463_s10] sm:$0xff]  ;;  %s3513_s3 = sld [smem:[#allocation12_spill]]  ;;  %s3488_s5 = smov 112  }
  0x20   :  { %123 = vmatpush.msra.mxu0 %v91_v10  ;;  %286 = vmatpush.msra.mxu3 %v267_v48  ;;  %s3514_s17 = sld [smem:[#allocation7_spill]]  ;;  %s3486_s0 = smov 8  }
  0x21   :  { %v99_v18 = vld [vmem:[%s3509_s6] sm:$0xff]  ;;  %v100_v22 = vld [vmem:[%s3509_s6 + $0x8] sm:$0xff]  ;;  %s3490_s4 = smov 16   ;;  %s3492_s1 = smov 24  }
  0x22   :  { %v200_v43 = vld [vmem:[%s3510_s29 + $0x18] sm:$0xff]  ;;  %254 = vmatpush.msrb.mxu0 %v237_v44  ;;  %v199_v46 = vld [vmem:[%s3510_s29 + $0x10] sm:$0xff]  ;;  %v198_v49 = vld [vmem:[%s3510_s29 + $0x8] sm:$0xff]  ;;  %287 = vmatpush.msra.mxu3 %v266_v51  ;;  %s3524_s6 = smov 16  }
  0x23   :  { %v2352_v27 = vpop.eup %2351  ;;  %223 = vmatpush.msra.mxu1 %v200_v43  ;;  %v197_v52 = vld [vmem:[%s3510_s29] sm:$0xff] }
  0x24   :  { %v143_v28 = vmul.f32 32.0, %v2352_v27  ;;  %vm147_vm4 = vweird.f32 %v2352_v27  ;;  %255 = vmatpush.msrb.mxu0 %v236_v47  ;;  %288 = vmatpush.msra.mxu3 %v265_v54  ;;  %v2329_v5 = vld [vmem:[%s3511_s2] ss:$0 sm:$0xff] }
  0x25   :  { %224 = vmatpush.msra.mxu1 %v199_v46  ;;  %v2330_v9 = vld [vmem:[%s3512_s27] ss:$0 sm:$0xff] }
  0x26   :  { %v144_v29 = vsub.f32 1.0, %v143_v28  ;;  %256 = vmatpush.msrb.mxu0 %v235_v50  ;;  %v131_v44 = vld [vmem:[%s3514_s17] sm:$0xff]  ;;  %v132_v51 = vld [vmem:[%s3514_s17 + $0x8] sm:$0xff] }
  0x27   :  { %225 = vmatpush.msra.mxu1 %v198_v49 }
  0x28   :  { %v145_v30 = vmul.f32 %v2352_v27, %v144_v29  ;;  %257 = vmatpush.msrb.mxu0 %v234_v53 }
  0x29   :  { %226 = vmatpush.msra.mxu1 %v197_v52 }
  0x2a   :  { %v146_v31 = vadd.f32 %v2352_v27, %v145_v30  ;;  %v2333_v30 = vld [vmem:[%s3464_s11] ss:$0 sm:$0xff] }
  0x2c   :  { %v2650_v32 = vsel %vm147_vm4, %v2352_v27, %v146_v31 }
  0x83   :  { %v81_v13 = vpop.permute.xlu0 %80 }
  0x84   :  { %vm85_vm1 = vcmp.eq.s32.totalorder %v76_v12, %v81_v13 }
  0x85   :  { %v2161_v15 = vsel %vm85_vm1, 1.0, %v2474_v14 }
  0x86   :  { %2163 = vmatmul.msk.f32.vlgmr.msra.gmra.mxu0 %vm101_vm0, %v2161_v15 }
  0x8b   :  { %v84_v16 = vpop.permute.xlu0 %83 }
  0x8c   :  { %vm86_vm2 = vcmp.eq.s32.totalorder %v76_v12, %v84_v16 }
  0x8d   :  { %v2162_v17 = vsel %vm86_vm2, 1.0, %v2474_v14 }
  0x8e   :  { %2164 = vmatmul.msk.f32.gmra.mxu0 %vm101_vm0, %v2162_v17 }
 0x103   :  { %v125_v19 = vpop.f32.mrf.mxu0 }
 0x104   :  { %v2639_v20 = vadd.f32 %v125_v19, %v99_v18  ;;  %v2331_v19 = vld [vmem:[%s3513_s3] ss:$0 sm:$0xff] }
 0x106   :  { %v136_v21 = vsel %vm135_vm3, %v2639_v20, 0.0 }
 0x107   :  { %137 = vadd.xlane.f32.xlu1 %v136_v21  ;;  %v2332_v21 = vld [vmem:[%s3462_s9] ss:$0 sm:$0xff] }
 0x10b   :  { %v128_v23 = vpop.f32.mrf.mxu0 }
 0x10c   :  { %v2646_v24 = vadd.f32 %v128_v23, %v100_v22 }
 0x10e   :  { %v139_v25 = vsel %vm135_vm3, %v2646_v24, 0.0 }
 0x10f   :  { %140 = vadd.xlane.f32.xlu1 %v139_v25 }
 0x17a   :  { %v138_v33 = vpop.xlane.xlu1 %137 }
 0x17b   :  { %v149_v34 = vmul.f32 %v2650_v32, %v138_v33 }
 0x17d   :  { %v151_v35 = vsub.f32 %v2639_v20, %v149_v34 }
 0x17f   :  { %v153_v36 = vmul.f32 %v151_v35, %v151_v35 }
 0x181   :  { %v155_v37 = vsel %vm135_vm3, %v153_v36, 0.0 }
 0x182   :  { %156 = vadd.xlane.f32.xlu2 %v155_v37  ;;  %v141_v38 = vpop.xlane.xlu1 %140 }
 0x183   :  { %v150_v39 = vmul.f32 %v2650_v32, %v141_v38 }
 0x185   :  { %v2657_v40 = vsub.f32 %v2646_v24, %v150_v39 }
 0x187   :  { %v154_v41 = vmul.f32 %v2657_v40, %v2657_v40 }
 0x189   :  { %v158_v42 = vsel %vm135_vm3, %v154_v41, 0.0 }
 0x18a   :  { %159 = vadd.xlane.f32.xlu2 %v158_v42 }
 0x1f5   :  { %v157_v55 = vpop.xlane.xlu2 %156 }
 0x1f6   :  { %v161_v56 = vmul.f32 %v157_v55, %v2650_v32 }
 0x1f8   :  { %v163_v57 = vadd.f32 1e-05, %v161_v56 }
 0x1fa   :  { %2353 = vrsqrt.f32 %v163_v57  ;;  %vm171_vm6 = vweird.f32 %v163_v57 }
 0x1fd   :  { %v160_v58 = vpop.xlane.xlu2 %159 }
 0x1fe   :  { %v162_v59 = vmul.f32 %v160_v58, %v2650_v32 }
 0x200   :  { %v2354_v60 = vpop.eup %2353  ;;  %v164_v61 = vadd.f32 1e-05, %v162_v59 }
 0x201   :  { %v166_v62 = vmul.f32 %v2354_v60, %v163_v57  ;;  %vm172_vm5 = vweird.f32 %v2354_v60 }
 0x202   :  { %2355 = vrsqrt.f32 %v164_v61  ;;  %vm173_vm7 = vmor %vm171_vm6, %vm172_vm5  ;;  %vm181_vm9 = vweird.f32 %v164_v61 }
 0x203   :  { %v167_v63 = vmul.f32 %v2354_v60, %v166_v62 }
 0x205   :  { %v168_v0 = vmul.f32 0.5, %v167_v63 }
 0x207   :  { %v169_v1 = vsub.f32 1.5, %v168_v0 }
 0x208   :  { %v2356_v2 = vpop.eup %2355 }
 0x209   :  { %v170_v3 = vmul.f32 %v2354_v60, %v169_v1  ;;  %v176_v4 = vmul.f32 %v2356_v2, %v164_v61  ;;  %vm182_vm8 = vweird.f32 %v2356_v2 }
 0x20a   :  { %vm183_vm10 = vmor %vm181_vm9, %vm182_vm8 }
 0x20b   :  { %v174_v6 = vsel %vm173_vm7, %v2354_v60, %v170_v3  ;;  %v177_v7 = vmul.f32 %v2356_v2, %v176_v4 }
 0x20c   :  { %v185_v8 = vmul.f32 %v174_v6, %v151_v35 }
 0x20d   :  { %v178_v10 = vmul.f32 0.5, %v177_v7 }
 0x20e   :  { %v190_v11 = vmul.f32 %v2329_v5, %v185_v8 }
 0x20f   :  { %v179_v12 = vsub.f32 1.5, %v178_v10 }
 0x210   :  { %v195_v13 = vadd.f32 %v2330_v9, %v190_v11 }
 0x211   :  { %v180_v14 = vmul.f32 %v2356_v2, %v179_v12 }
 0x212   :  { %2165 = vmatmul.msk.f32.vlgmr.msra.gmra.mxu1 %vm135_vm3, %v195_v13  ;;  %2167 = vmatmul.msk.f32.vlgmr.msrb.gmra.mxu0 %vm135_vm3, %v195_v13 }
 0x213   :  { %v184_v15 = vsel %vm183_vm10, %v2356_v2, %v180_v14  ;;  %2169 = vmatmul.msk.f32.vlgmr.msra.gmra.mxu3 %vm135_vm3, %v195_v13 }
 0x214   :  { %v186_v16 = vmul.f32 %v184_v15, %v2657_v40 }
 0x216   :  { %v191_v17 = vmul.f32 %v2329_v5, %v186_v16 }
 0x218   :  { %v196_v18 = vadd.f32 %v2330_v9, %v191_v17 }
 0x21a   :  { %2166 = vmatmul.msk.f32.gmra.mxu1 %vm135_vm3, %v196_v18  ;;  %2168 = vmatmul.msk.f32.gmra.mxu0 %vm135_vm3, %v196_v18 }
 0x21b   :  { %2170 = vmatmul.msk.f32.gmra.mxu3 %vm135_vm3, %v196_v18 }
 0x28f   :  { %v228_v22 = vpop.f32.mrf.mxu1  ;;  %v259_v23 = vpop.f32.mrf.mxu0 }
 0x290   :  { %v229_v25 = vadd.f32 %v2331_v19, %v228_v22  ;;  %v260_v26 = vadd.f32 %v2332_v21, %v259_v23 }
 0x292   :  { %418 = vrot.lane.b32.xlu1 %v260_v26, %s3496_s30  ;;  %414 = vrot.lane.b32.xlu2 %v229_v25, %s3496_s30 }
 0x296   :  { %v290_v27 = vpop.f32.mrf.mxu3 }
 0x297   :  { %v262_v28 = vpop.f32.mrf.mxu0  ;;  %v231_v31 = vpop.f32.mrf.mxu1  ;;  %v291_v34 = vadd.f32 %v2333_v30, %v290_v27 }
 0x298   :  { %v263_v29 = vadd.f32 %v2332_v21, %v262_v28  ;;  %v232_v36 = vadd.f32 %v2331_v19, %v231_v31 }
 0x29a   :  { %672 = vrot.lane.b32.xlu1 %v260_v26, %s3494_s25  ;;  %546 = vrot.lane.b32.xlu2 %v260_v26, %s3488_s5 }
 0x29b   :  { %420 = vrot.lane.b32.xlu0 %v263_v29, %s3496_s30  ;;  %2171 = vmatpush.xpose.msk.msrb.mxu1 %vm296_vm11, %v263_v29 }
 0x29e   :  { %v293_v33 = vpop.f32.mrf.mxu3 }
 0x29f   :  { %v294_v35 = vadd.f32 %v2333_v30, %v293_v33  ;;  %2172 = vmatpush.xpose.msk.msrb.mxu1 %vm296_vm11, %v260_v26 }
 0x2a1   :  { %405 = vmatpush.msra.mxu2 %v294_v35  ;;  %v2729_v37 = vpack.i.bf16 %v291_v34, %v294_v35 }
 0x2a2   :  { %2173 = vmatmul.msk.f32.vlgmr.msrb.gmra.mxu1 %vm296_vm11, %v229_v25  ;;  %668 = vrot.lane.b32.xlu2 %v229_v25, %s3494_s25 }
 0x2a3   :  { %406 = vmatpush.msra.mxu2 %v291_v34  ;;  %544 = vrot.lane.b32.xlu1 %v232_v36, %s3488_s5 }
 0x2a4   :  { %416 = vrot.lane.b32.xlu0 %v232_v36, %s3496_s30 }
 0x2aa   :  { %2174 = vmatmul.msk.f32.gmra.mxu1 %vm296_vm11, %v232_v36 }
 0x2ac   :  { %548 = vrot.lane.b32.xlu0 %v263_v29, %s3488_s5 }
 0x2b4   :  { %674 = vrot.lane.b32.xlu0 %v263_v29, %s3494_s25 }
 0x2bc   :  { %542 = vrot.lane.b32.xlu0 %v229_v25, %s3488_s5 }
 0x2c4   :  { %670 = vrot.lane.b32.xlu0 %v232_v36, %s3494_s25 }
 0x2ec   :  { %v415_v40 = vpop.permute.xlu2 %414 }
 0x2f4   :  { %v547_v46 = vpop.permute.xlu2 %546 }
 0x2fc   :  { %v669_v56 = vpop.permute.xlu2 %668 }
 0x304   :  { %v419_v39 = vpop.permute.xlu1 %418 }
 0x30c   :  { %v673_v53 = vpop.permute.xlu1 %672 }
 0x30d   :  { %v421_v38 = vpop.permute.xlu0 %420 }
 0x30e   :  { %2177 = vmatpush.xpose.msk.msrb.mxu3 %vm296_vm11, %v421_v38 }
 0x312   :  { %2178 = vmatpush.xpose.msk.msrb.mxu3 %vm296_vm11, %v419_v39 }
 0x315   :  { %2179 = vmatmul.msk.f32.vlgmr.msrb.gmra.mxu3 %vm296_vm11, %v415_v40  ;;  %v545_v58 = vpop.permute.xlu1 %544 }
 0x316   :  { %v417_v41 = vpop.permute.xlu0 %416 }
 0x31d   :  { %2180 = vmatmul.msk.f32.gmra.mxu3 %vm296_vm11, %v417_v41 }
 0x31e   :  { %v549_v42 = vpop.permute.xlu0 %548 }
 0x31f   :  { %2183 = vmatpush.xpose.msk.msra.mxu1 %vm296_vm11, %v549_v42  ;;  %v326_v43 = vpop.f32.mrf.mxu1 }
 0x320   :  { %v332_v45 = vmul.f32 0.35355338, %v326_v43 }
 0x322   :  { %v334_v47 = vadd.f32 %v332_v45, %v131_v44 }
 0x323   :  { %2184 = vmatpush.xpose.msk.msra.mxu1 %vm296_vm11, %v547_v46 }
 0x324   :  { %v337_v48 = vsel %vm336_vm12, %v334_v47, -inf }
 0x325   :  { %338 = vmax.xlane.f32.xlu2 %v337_v48 }
 0x326   :  { %v675_v49 = vpop.permute.xlu0 %674 }
 0x327   :  { %2189 = vmatpush.xpose.msk.msra.mxu3 %vm296_vm11, %v675_v49  ;;  %v329_v50 = vpop.f32.mrf.mxu1 }
 0x328   :  { %v333_v52 = vmul.f32 0.35355338, %v329_v50 }
 0x32a   :  { %v335_v54 = vadd.f32 %v333_v52, %v132_v51 }
 0x32b   :  { %2190 = vmatpush.xpose.msk.msra.mxu3 %vm296_vm11, %v673_v53 }
 0x32c   :  { %v340_v55 = vsel %vm336_vm12, %v335_v54, -inf }
 0x32d   :  { %341 = vmax.xlane.f32.xlu1 %v340_v55 }
 0x32e   :  { %v543_v57 = vpop.permute.xlu0 %542  ;;  %2191 = vmatmul.msk.f32.vlgmr.msra.gmra.mxu3 %vm296_vm11, %v669_v56 }
 0x32f   :  { %2185 = vmatmul.msk.f32.vlgmr.msra.gmra.mxu1 %vm296_vm11, %v543_v57 }
 0x336   :  { %v671_v59 = vpop.permute.xlu0 %670 }
 0x337   :  { %2186 = vmatmul.msk.f32.gmra.mxu1 %vm296_vm11, %v545_v58  ;;  %2192 = vmatmul.msk.f32.gmra.mxu3 %vm296_vm11, %v671_v59 }
 0x398   :  { %v447_v60 = vpop.f32.mrf.mxu3  ;;  %v339_v4 = vpop.xlane.xlu2 %338 }
 0x399   :  { %v453_v61 = vmul.f32 0.35355338, %v447_v60  ;;  %v343_v6 = vsub.f32 %v334_v47, %v339_v4 }
 0x39b   :  { %v455_v62 = vadd.f32 %v453_v61, %v131_v44  ;;  %v345_v11 = vmul.f32 1.442695, %v343_v6 }
 0x39d   :  { %v457_v63 = vsel %vm336_vm12, %v455_v62, -inf  ;;  %2357 = vpow2.f32 %v345_v11 }
 0x39e   :  { %458 = vmax.xlane.f32.xlu2 %v457_v63 }
 0x3a0   :  { %v450_v0 = vpop.f32.mrf.mxu3  ;;  %v342_v7 = vpop.xlane.xlu1 %341 }
 0x3a1   :  { %v454_v1 = vmul.f32 0.35355338, %v450_v0  ;;  %v344_v10 = vsub.f32 %v335_v54, %v342_v7 }
 0x3a3   :  { %v456_v2 = vadd.f32 %v454_v1, %v132_v51  ;;  %v347_v15 = vmul.f32 1.442695, %v344_v10  ;;  %v2765_v25 = vpop.eup %2357 }
 0x3a4   :  { %v349_v29 = vsel %vm336_vm12, %v2765_v25, 0.0 }
 0x3a5   :  { %v460_v3 = vsel %vm336_vm12, %v456_v2, -inf  ;;  %2359 = vpow2.f32 %v347_v15 }
 0x3a6   :  { %461 = vmax.xlane.f32.xlu0 %v460_v3 }
 0x3ab   :  { %v2767_v28 = vpop.eup %2359 }
 0x3ac   :  { %v575_v5 = vpop.f32.mrf.mxu1  ;;  %v352_v31 = vsel %vm336_vm12, %v2767_v28, 0.0 }
 0x3ad   :  { %v581_v8 = vmul.f32 0.35355338, %v575_v5 }
 0x3af   :  { %v583_v9 = vadd.f32 %v581_v8, %v131_v44 }
 0x3b1   :  { %v701_v12 = vpop.f32.mrf.mxu3  ;;  %v585_v13 = vsel %vm336_vm12, %v583_v9, -inf }
 0x3b2   :  { %v707_v14 = vmul.f32 0.35355338, %v701_v12  ;;  %586 = vmax.xlane.f32.xlu1 %v585_v13 }
 0x3b4   :  { %v578_v16 = vpop.f32.mrf.mxu1  ;;  %v709_v17 = vadd.f32 %v707_v14, %v131_v44 }
 0x3b5   :  { %v582_v18 = vmul.f32 0.35355338, %v578_v16 }
 0x3b6   :  { %v711_v19 = vsel %vm336_vm12, %v709_v17, -inf }
 0x3b7   :  { %712 = vmax.xlane.f32.xlu2 %v711_v19  ;;  %v584_v21 = vadd.f32 %v582_v18, %v132_v51 }
 0x3b9   :  { %v588_v22 = vsel %vm336_vm12, %v584_v21, -inf }
 0x3ba   :  { %v704_v23 = vpop.f32.mrf.mxu3  ;;  %589 = vmax.xlane.f32.xlu0 %v588_v22 }
 0x3bb   :  { %v708_v26 = vmul.f32 0.35355338, %v704_v23 }
 0x3bd   :  { %v710_v27 = vadd.f32 %v708_v26, %v132_v51 }
 0x3bf   :  { %350 = vadd.xlane.f32.xlu2 %v349_v29  ;;  %v714_v30 = vsel %vm336_vm12, %v710_v27, -inf }
 0x3c0   :  { %715 = vmax.xlane.f32.xlu1 %v714_v30 }
 0x3c2   :  { %353 = vadd.xlane.f32.xlu0 %v352_v31 }
 0x411   :  { %v459_v33 = vpop.xlane.xlu2 %458 }
 0x412   :  { %v463_v34 = vsub.f32 %v455_v62, %v459_v33 }
 0x414   :  { %v465_v35 = vmul.f32 1.442695, %v463_v34 }
 0x416   :  { %2361 = vpow2.f32 %v465_v35 }
 0x419   :  { %v462_v36 = vpop.xlane.xlu0 %461 }
 0x41a   :  { %v464_v38 = vsub.f32 %v456_v2, %v462_v36 }
 0x41c   :  { %v2774_v39 = vpop.eup %2361  ;;  %v467_v40 = vmul.f32 1.442695, %v464_v38 }
 0x41d   :  { %v469_v41 = vsel %vm336_vm12, %v2774_v39, 0.0 }
 0x41e   :  { %2363 = vpow2.f32 %v467_v40  ;;  %470 = vadd.xlane.f32.xlu2 %v469_v41 }
 0x424   :  { %v2778_v42 = vpop.eup %2363 }
 0x425   :  { %v587_v43 = vpop.xlane.xlu1 %586  ;;  %v472_v44 = vsel %vm336_vm12, %v2778_v42, 0.0 }
 0x426   :  { %v591_v45 = vsub.f32 %v583_v9, %v587_v43  ;;  %473 = vadd.xlane.f32.xlu1 %v472_v44 }
 0x428   :  { %v593_v46 = vmul.f32 1.442695, %v591_v45 }
 0x42a   :  { %2365 = vpow2.f32 %v593_v46  ;;  %v713_v47 = vpop.xlane.xlu2 %712 }
 0x42b   :  { %v717_v48 = vsub.f32 %v709_v17, %v713_v47 }
 0x42d   :  { %v719_v49 = vmul.f32 1.442695, %v717_v48  ;;  %v590_v50 = vpop.xlane.xlu0 %589 }
 0x42e   :  { %v592_v51 = vsub.f32 %v584_v21, %v590_v50 }
 0x42f   :  { %2367 = vpow2.f32 %v719_v49 }
 0x430   :  { %v2782_v52 = vpop.eup %2365  ;;  %v595_v53 = vmul.f32 1.442695, %v592_v51 }
 0x431   :  { %v597_v54 = vsel %vm336_vm12, %v2782_v52, 0.0 }
 0x432   :  { %2369 = vpow2.f32 %v595_v53  ;;  %v351_v55 = vpop.xlane.xlu2 %350  ;;  %598 = vadd.xlane.f32.xlu0 %v597_v54 }
 0x433   :  { %2371 = vrcp.f32 %v351_v55  ;;  %v716_v56 = vpop.xlane.xlu1 %715  ;;  %v366_v4 = vand.u32 2147483648, %v351_v55  ;;  %v364_v8 = vand.u32 2147483647, %v351_v55  ;;  %vm360_vm14 = vweird.f32 %v351_v55 }
 0x434   :  { %v718_v57 = vsub.f32 %v710_v27, %v716_v56 }
 0x435   :  { %v2786_v58 = vpop.eup %2367  ;;  %v354_v59 = vpop.xlane.xlu0 %353  ;;  %v367_v12 = vor.u32 1.1754944e-38, %v366_v4  ;;  %vm365_vm1 = vcmp.eq.f32.partialorder %v364_v8, 8.507059e+37 }
 0x436   :  { %v721_v60 = vmul.f32 1.442695, %v718_v57  ;;  %2373 = vrcp.f32 %v354_v59  ;;  %v723_v61 = vsel %vm336_vm12, %v2786_v58, 0.0  ;;  %v381_v15 = vand.u32 2147483648, %v354_v59 }
 0x437   :  { %724 = vadd.xlane.f32.xlu1 %v723_v61  ;;  %vm375_vm4 = vweird.f32 %v354_v59  ;;  %v379_v19 = vand.u32 2147483647, %v354_v59 }
 0x438   :  { %v2790_v62 = vpop.eup %2369  ;;  %2375 = vpow2.f32 %v721_v60  ;;  %v382_v22 = vor.u32 1.1754944e-38, %v381_v15 }
 0x439   :  { %v2372_v63 = vpop.eup %2371  ;;  %v600_v0 = vsel %vm336_vm12, %v2790_v62, 0.0  ;;  %vm380_vm6 = vcmp.eq.f32.partialorder %v379_v19, 8.507059e+37 }
 0x43a   :  { %v356_v1 = vmul.f32 %v2372_v63, %v351_v55  ;;  %601 = vadd.xlane.f32.xlu2 %v600_v0  ;;  %vm361_vm13 = vweird.f32 %v2372_v63 }
 0x43b   :  { %vm362_vm15 = vmor %vm360_vm14, %vm361_vm13 }
 0x43c   :  { %v2374_v2 = vpop.eup %2373  ;;  %v357_v3 = vsub.f32 1.0, %v356_v1 }
 0x43d   :  { %v371_v5 = vmul.f32 %v2374_v2, %v354_v59  ;;  %vm376_vm2 = vweird.f32 %v2374_v2 }
 0x43e   :  { %v2794_v6 = vpop.eup %2375  ;;  %v358_v7 = vmul.f32 %v2372_v63, %v357_v3  ;;  %vm377_vm5 = vmor %vm375_vm4, %vm376_vm2 }
 0x43f   :  { %v372_v9 = vsub.f32 1.0, %v371_v5  ;;  %v726_v10 = vsel %vm336_vm12, %v2794_v6, 0.0 }
 0x440   :  { %727 = vadd.xlane.f32.xlu1 %v726_v10  ;;  %v359_v11 = vadd.f32 %v2372_v63, %v358_v7 }
 0x441   :  { %v373_v13 = vmul.f32 %v2374_v2, %v372_v9 }
 0x442   :  { %v363_v14 = vsel %vm362_vm15, %v2372_v63, %v359_v11 }
 0x443   :  { %v368_v16 = vsel %vm365_vm1, %v367_v12, %v363_v14  ;;  %v374_v17 = vadd.f32 %v2374_v2, %v373_v13 }
 0x444   :  { %v369_v18 = vmul.f32 %v2765_v25, %v368_v16 }
 0x445   :  { %v378_v21 = vsel %vm377_vm5, %v2374_v2, %v374_v17 }
 0x446   :  { %2175 = vmatmul.msk.f32.vlgmr.msra.gmra.mxu2 %vm336_vm12, %v369_v18  ;;  %2300 = vrot.lane.b32.xlu0 %v2729_v37, %s3496_s30  ;;  %v383_v23 = vsel %vm380_vm6, %v382_v22, %v378_v21 }
 0x447   :  { %v384_v26 = vmul.f32 %v2767_v28, %v383_v23 }
 0x44e   :  { %2176 = vmatmul.msk.f32.gmra.mxu2 %vm336_vm12, %v384_v26 }
 0x452   :  { %2305 = vrot.lane.b32.xlu2 %v2729_v37, %s3488_s5 }
 0x459   :  { %2310 = vrot.lane.b32.xlu1 %v2729_v37, %s3494_s25 }
 0x491   :  { %v471_v25 = vpop.xlane.xlu2 %470 }
 0x492   :  { %2377 = vrcp.f32 %v471_v25  ;;  %vm480_vm9 = vweird.f32 %v471_v25  ;;  %v486_v47 = vand.u32 2147483648, %v471_v25  ;;  %v484_v51 = vand.u32 2147483647, %v471_v25 }
 0x494   :  { %v487_v63 = vor.u32 1.1754944e-38, %v486_v47  ;;  %vm485_vm15 = vcmp.eq.f32.partialorder %v484_v51, 8.507059e+37 }
 0x498   :  { %v2378_v29 = vpop.eup %2377 }
 0x499   :  { %v474_v27 = vpop.xlane.xlu1 %473  ;;  %v476_v33 = vmul.f32 %v2378_v29, %v471_v25  ;;  %vm481_vm7 = vweird.f32 %v2378_v29 }
 0x49a   :  { %2379 = vrcp.f32 %v474_v27  ;;  %v501_v48 = vand.u32 2147483648, %v474_v27  ;;  %vm2823_vm10 = vmor %vm480_vm9, %vm481_vm7  ;;  %vm495_vm13 = vweird.f32 %v474_v27  ;;  %v499_v53 = vand.u32 2147483647, %v474_v27 }
 0x49b   :  { %v477_v28 = vsub.f32 1.0, %v476_v33 }
 0x49c   :  { %v502_v0 = vor.u32 1.1754944e-38, %v501_v48  ;;  %vm500_vm1 = vcmp.eq.f32.partialorder %v499_v53, 8.507059e+37 }
 0x49d   :  { %v478_v37 = vmul.f32 %v2378_v29, %v477_v28 }
 0x49f   :  { %v479_v44 = vadd.f32 %v2378_v29, %v478_v37 }
 0x4a0   :  { %v2380_v30 = vpop.eup %2379 }
 0x4a1   :  { %v491_v34 = vmul.f32 %v2380_v30, %v474_v27  ;;  %vm496_vm8 = vweird.f32 %v2380_v30  ;;  %v483_v57 = vsel %vm2823_vm10, %v2378_v29, %v479_v44 }
 0x4a2   :  { %vm2827_vm14 = vmor %vm495_vm13, %vm496_vm8  ;;  %v488_v2 = vsel %vm485_vm15, %v487_v63, %v483_v57  ;;  %v827_v63 = vld [vmem:[%s3465_s12 + $0x10] sm:$0xff] }
 0x4a3   :  { %v492_v35 = vsub.f32 1.0, %v491_v34  ;;  %v489_v13 = vmul.f32 %v2774_v39, %v488_v2 }
 0x4a5   :  { %v2808_v31 = vpop.xlane.xlu0 %598  ;;  %v493_v41 = vmul.f32 %v2380_v30, %v492_v35 }
 0x4a6   :  { %2381 = vrcp.f32 %v2808_v31  ;;  %v614_v10 = vand.u32 2147483648, %v2808_v31  ;;  %vm608_vm4 = vweird.f32 %v2808_v31  ;;  %v612_v12 = vand.u32 2147483647, %v2808_v31 }
 0x4a7   :  { %v494_v45 = vadd.f32 %v2380_v30, %v493_v41 }
 0x4a8   :  { %v615_v21 = vor.u32 1.1754944e-38, %v614_v10  ;;  %vm613_vm6 = vcmp.eq.f32.partialorder %v612_v12, 8.507059e+37 }
 0x4a9   :  { %v498_v61 = vsel %vm2827_vm14, %v2380_v30, %v494_v45 }
 0x4aa   :  { %v2811_v36 = vpop.xlane.xlu1 %724  ;;  %v503_v5 = vsel %vm500_vm1, %v502_v0, %v498_v61  ;;  %v828_v61 = vld [vmem:[%s3465_s12 + $0x18] sm:$0xff]  ;;  %v826_v0 = vld [vmem:[%s3465_s12 + $0x8] sm:$0xff] }
 0x4ab   :  { %v504_v14 = vmul.f32 %v2778_v42, %v503_v5  ;;  %v740_v33 = vand.u32 2147483648, %v2811_v36  ;;  %vm734_vm13 = vweird.f32 %v2811_v36  ;;  %v738_v28 = vand.u32 2147483647, %v2811_v36  ;;  %851 = vmatpush.msrb.mxu1 %v828_v61 }
 0x4ac   :  { %v2813_v38 = vpop.eup %2381 }
 0x4ad   :  { %v2815_v40 = vpop.xlane.xlu2 %601  ;;  %v604_v43 = vmul.f32 %v2813_v38, %v2808_v31  ;;  %vm609_vm2 = vweird.f32 %v2813_v38  ;;  %v741_v37 = vor.u32 1.1754944e-38, %v740_v33  ;;  %vm739_vm1 = vcmp.eq.f32.partialorder %v738_v28, 8.507059e+37  ;;  %852 = vmatpush.msrb.mxu1 %v827_v63  ;;  %v922_v28 = vld [vmem:[%s3469_s16 + $0x10] sm:$0xff] }
 0x4ae   :  { %2383 = vrcp.f32 %v2815_v40  ;;  %vm610_vm5 = vmor %vm608_vm4, %vm609_vm2  ;;  %v629_v25 = vand.u32 2147483648, %v2815_v40  ;;  %vm623_vm8 = vweird.f32 %v2815_v40  ;;  %v627_v29 = vand.u32 2147483647, %v2815_v40 }
 0x4af   :  { %2385 = vrcp.f32 %v2811_v36  ;;  %v605_v46 = vsub.f32 1.0, %v604_v43  ;;  %853 = vmatpush.msrb.mxu1 %v826_v0 }
 0x4b0   :  { %v630_v35 = vor.u32 1.1754944e-38, %v629_v25  ;;  %vm628_vm15 = vcmp.eq.f32.partialorder %v627_v29, 8.507059e+37 }
 0x4b1   :  { %v606_v59 = vmul.f32 %v2813_v38, %v605_v46 }
 0x4b3   :  { %v2831_v55 = vpop.xlane.xlu1 %727  ;;  %v607_v7 = vadd.f32 %v2813_v38, %v606_v59 }
 0x4b4   :  { %v2821_v49 = vpop.eup %2383  ;;  %2387 = vrcp.f32 %v2831_v55  ;;  %v755_v47 = vand.u32 2147483648, %v2831_v55  ;;  %vm749_vm4 = vweird.f32 %v2831_v55 }
 0x4b5   :  { %v2833_v56 = vpop.eup %2385  ;;  %v619_v60 = vmul.f32 %v2821_v49, %v2815_v40  ;;  %v2306_v9 = vpop.permute.xlu2 %2305  ;;  %v611_v18 = vsel %vm610_vm5, %v2813_v38, %v607_v7  ;;  %vm624_vm7 = vweird.f32 %v2821_v49 }
 0x4b6   :  { %v730_v3 = vmul.f32 %v2833_v56, %v2811_v36  ;;  %v2307_v16 = vunpack.i.l.bf16 %v2306_v9  ;;  %v2308_v22 = vunpack.i.h.bf16 %v2306_v9  ;;  %v616_v39 = vsel %vm613_vm6, %v615_v21, %v611_v18  ;;  %vm625_vm10 = vmor %vm623_vm8, %vm624_vm7 }
 0x4b7   :  { %v620_v8 = vsub.f32 1.0, %v619_v60  ;;  %v617_v27 = vmul.f32 %v2782_v52, %v616_v39  ;;  %vm735_vm9 = vweird.f32 %v2833_v56  ;;  %vm822_vm7 = vcmask 195584  }
 0x4b8   :  { %v2301_v1 = vpop.permute.xlu0 %2300  ;;  %v731_v15 = vsub.f32 1.0, %v730_v3  ;;  %vm736_vm14 = vmor %vm734_vm13, %vm735_vm9 }
 0x4b9   :  { %v2302_v4 = vunpack.i.l.bf16 %v2301_v1  ;;  %v2303_v11 = vunpack.i.h.bf16 %v2301_v1  ;;  %v621_v19 = vmul.f32 %v2821_v49, %v620_v8  ;;  %v825_v1 = vld [vmem:[%s3465_s12] sm:$0xff] }
 0x4ba   :  { %v2388_v17 = vpop.eup %2387  ;;  %v732_v42 = vmul.f32 %v2833_v56, %v731_v15  ;;  %854 = vmatpush.msrb.mxu1 %v825_v1  ;;  %v2334_v15 = vld [vmem:[%s3466_s13] ss:$0 sm:$0xff] }
 0x4bb   :  { %533 = vmatpush.msra.mxu0 %v2302_v4  ;;  %2285 = vmatpush.msrb.mxu2 %v2302_v4  ;;  %v745_v23 = vmul.f32 %v2388_v17, %v2831_v55  ;;  %v622_v26 = vadd.f32 %v2821_v49, %v621_v19  ;;  %vm750_vm2 = vweird.f32 %v2388_v17 }
 0x4bc   :  { %v733_v30 = vadd.f32 %v2833_v56, %v732_v42  ;;  %vm751_vm5 = vmor %vm749_vm4, %vm750_vm2 }
 0x4bd   :  { %534 = vmatpush.msra.mxu0 %v2303_v11  ;;  %2286 = vmatpush.msrb.mxu2 %v2303_v11  ;;  %v746_v31 = vsub.f32 1.0, %v745_v23  ;;  %v626_v34 = vsel %vm625_vm10, %v2821_v49, %v622_v26  ;;  %v753_v49 = vand.u32 2147483647, %v2831_v55 }
 0x4be   :  { %2181 = vmatmul.msk.f32.vlgmr.msra.gmra.mxu0 %vm336_vm12, %v489_v13  ;;  %2182 = vmatmul.msk.f32.vlgmr.msrb.gmra.mxu2 %vm336_vm12, %v504_v14  ;;  %v737_v52 = vsel %vm736_vm14, %v2833_v56, %v733_v30  ;;  %v631_v40 = vsel %vm628_vm15, %v630_v35, %v626_v34  ;;  %v923_v34 = vld [vmem:[%s3469_s16 + $0x18] sm:$0xff]  ;;  %v921_v35 = vld [vmem:[%s3469_s16 + $0x8] sm:$0xff] }
 0x4bf   :  { %659 = vmatpush.msra.mxu2 %v2307_v16  ;;  %v747_v38 = vmul.f32 %v2388_v17, %v746_v31  ;;  %v742_v43 = vsel %vm739_vm1, %v741_v37, %v737_v52  ;;  %v632_v45 = vmul.f32 %v2790_v62, %v631_v40  ;;  %v756_v62 = vor.u32 1.1754944e-38, %v755_v47  ;;  %v920_v52 = vld [vmem:[%s3469_s16] sm:$0xff] }
 0x4c0   :  { %v743_v36 = vmul.f32 %v2786_v58, %v742_v43  ;;  %vm754_vm6 = vcmp.eq.f32.partialorder %v753_v49, 8.507059e+37 }
 0x4c1   :  { %660 = vmatpush.msra.mxu2 %v2308_v22  ;;  %v748_v46 = vadd.f32 %v2388_v17, %v747_v38 }
 0x4c3   :  { %v752_v50 = vsel %vm751_vm5, %v2388_v17, %v748_v46  ;;  %946 = vmatpush.msrb.mxu2 %v923_v34  ;;  %v1048_v34 = vld [vmem:[%s3471_s18 + $0x18] sm:$0xff] }
 0x4c4   :  { %v757_v51 = vsel %vm754_vm6, %v756_v62, %v752_v50 }
 0x4c5   :  { %v758_v53 = vmul.f32 %v2794_v6, %v757_v51  ;;  %947 = vmatpush.msrb.mxu2 %v922_v28  ;;  %v2335_v51 = vld [vmem:[%s3467_s14] ss:$0 sm:$0xff] }
 0x4c6   :  { %2187 = vmatmul.msk.f32.vlgmr.msra.gmra.mxu2 %vm336_vm12, %v617_v27 }
 0x4c7   :  { %948 = vmatpush.msrb.mxu2 %v921_v35 }
 0x4c9   :  { %v408_v54 = vpop.f32.mrf.mxu2  ;;  %949 = vmatpush.msrb.mxu2 %v920_v52 }
 0x4cb   :  { %v2311_v41 = vpop.permute.xlu1 %2310 }
 0x4cc   :  { %v2312_v44 = vunpack.i.l.bf16 %v2311_v41  ;;  %v2313_v48 = vunpack.i.h.bf16 %v2311_v41 }
 0x4ce   :  { %2188 = vmatmul.msk.f32.gmra.mxu2 %vm336_vm12, %v632_v45  ;;  %785 = vmatpush.msrb.mxu0 %v2312_v44 }
 0x4d0   :  { %786 = vmatpush.msrb.mxu0 %v2313_v48 }
 0x4d1   :  { %2193 = vmatmul.msk.f32.vlgmr.msrb.gmra.mxu0 %vm336_vm12, %v743_v36  ;;  %v411_v56 = vpop.f32.mrf.mxu2 }
 0x4d9   :  { %2194 = vmatmul.msk.f32.gmra.mxu0 %vm336_vm12, %v758_v53 }
 0x53b   :  { %v536_v57 = vpop.f32.mrf.mxu0 }
 0x53c   :  { %796 = vrot.lane.b32.xlu0 %v536_v57, %s3486_s0  ;;  %v2336_v57 = vld [vmem:[%s3468_s15] ss:$0 sm:$0xff] }
 0x541   :  { %v539_v58 = vpop.f32.mrf.mxu2 }
 0x542   :  { %798 = vrot.lane.b32.xlu1 %v539_v58, %s3486_s0  ;;  %s3520_s0 = smov 120  }
 0x549   :  { %v662_v55 = vpop.f32.mrf.mxu2 }
 0x54a   :  { %804 = vrot.lane.b32.xlu0 %v662_v55, %s3490_s4 }
 0x54e   :  { %v788_v59 = vpop.f32.mrf.mxu0 }
 0x54f   :  { %812 = vrot.lane.b32.xlu2 %v788_v59, %s3492_s1 }
 0x551   :  { %v665_v6 = vpop.f32.mrf.mxu2 }
 0x552   :  { %806 = vrot.lane.b32.xlu0 %v665_v6, %s3490_s4  ;;  %s3521_s4 = smov 104  }
 0x556   :  { %v791_v60 = vpop.f32.mrf.mxu0 }
 0x557   :  { %814 = vrot.lane.b32.xlu2 %v791_v60, %s3492_s1  ;;  %s3519_s1 = sld [smem:[#allocation13_spill]] }
 0x5a9   :  { %v813_v3 = vpop.permute.xlu2 %812 }
 0x5ae   :  { %v797_v2 = vpop.permute.xlu0 %796 }
 0x5af   :  { %v818_v4 = vsel %vm296_vm11, %v408_v54, %v797_v2  ;;  %v1060_v2 = vld [vmem:[%s3471_s18 + $0x78] sm:$0xff] }
 0x5b0   :  { %1065 = vmatpush.msrb.mxu3 %v1060_v2 }
 0x5b1   :  { %v815_v12 = vpop.permute.xlu2 %814 }
 0x5b4   :  { %v799_v9 = vpop.permute.xlu1 %798 }
 0x5b5   :  { %v819_v10 = vsel %vm296_vm11, %v411_v56, %v799_v9 }
 0x5bc   :  { %v805_v5 = vpop.permute.xlu0 %804 }
 0x5bd   :  { %v820_v7 = vsel %vm336_vm12, %v818_v4, %v805_v5  ;;  %v1058_v4 = vld [vmem:[%s3471_s18 + $0x68] sm:$0xff]  ;;  %v2337_v5 = vld [vmem:[%s3519_s1] ss:$0 sm:$0xff] }
 0x5be   :  { %v823_v8 = vsel %vm822_vm7, %v820_v7, %v813_v3  ;;  %v1059_v3 = vld [vmem:[%s3471_s18 + $0x70] sm:$0xff]  ;;  %v1057_v7 = vld [vmem:[%s3471_s18 + $0x60] sm:$0xff] }
 0x5bf   :  { %2195 = vmatmul.msk.f32.vlgmr.msrb.gmra.mxu1 %vm135_vm3, %v823_v8  ;;  %1066 = vmatpush.msrb.mxu3 %v1059_v3  ;;  %v1056_v8 = vld [vmem:[%s3471_s18 + $0x58] sm:$0xff] }
 0x5c1   :  { %1067 = vmatpush.msrb.mxu3 %v1058_v4 }
 0x5c3   :  { %1068 = vmatpush.msrb.mxu3 %v1057_v7 }
 0x5c4   :  { %v807_v11 = vpop.permute.xlu0 %806 }
 0x5c5   :  { %v821_v13 = vsel %vm336_vm12, %v819_v10, %v807_v11  ;;  %1069 = vmatpush.msrb.mxu3 %v1056_v8  ;;  %v1055_v11 = vld [vmem:[%s3471_s18 + $0x50] sm:$0xff] }
 0x5c6   :  { %v824_v14 = vsel %vm822_vm7, %v821_v13, %v815_v12  ;;  %v1054_v13 = vld [vmem:[%s3471_s18 + $0x48] sm:$0xff] }
 0x5c7   :  { %2196 = vmatmul.msk.f32.gmra.mxu1 %vm135_vm3, %v824_v14  ;;  %1070 = vmatpush.msrb.mxu3 %v1055_v11 }
 0x5c9   :  { %1071 = vmatpush.msrb.mxu3 %v1054_v13 }
 0x63c   :  { %v856_v16 = vpop.f32.mrf.mxu1 }
 0x63d   :  { %v857_v17 = vadd.f32 %v2334_v15, %v856_v16 }
 0x63f   :  { %v2911_v18 = vadd.f32 %v857_v17, %v2639_v20  ;;  %v1052_v17 = vld [vmem:[%s3471_s18 + $0x38] sm:$0xff] }
 0x641   :  { %v866_v19 = vsel %vm135_vm3, %v2911_v18, 0.0 }
 0x642   :  { %867 = vadd.xlane.f32.xlu1 %v866_v19 }
 0x644   :  { %v859_v21 = vpop.f32.mrf.mxu1 }
 0x645   :  { %v860_v22 = vadd.f32 %v2334_v15, %v859_v21  ;;  %v1053_v15 = vld [vmem:[%s3471_s18 + $0x40] sm:$0xff] }
 0x646   :  { %1072 = vmatpush.msrb.mxu3 %v1053_v15 }
 0x647   :  { %v2916_v39 = vadd.f32 %v860_v22, %v2646_v24 }
 0x648   :  { %1073 = vmatpush.msrb.mxu3 %v1052_v17 }
 0x649   :  { %v869_v42 = vsel %vm135_vm3, %v2916_v39, 0.0 }
 0x64a   :  { %870 = vadd.xlane.f32.xlu0 %v869_v42 }
 0x6b5   :  { %v868_v23 = vpop.xlane.xlu1 %867 }
 0x6b6   :  { %v872_v26 = vmul.f32 %v868_v23, %v2650_v32  ;;  %v1051_v23 = vld [vmem:[%s3471_s18 + $0x30] sm:$0xff] }
 0x6b7   :  { %1074 = vmatpush.msrb.mxu3 %v1051_v23 }
 0x6b8   :  { %v874_v25 = vsub.f32 %v2911_v18, %v872_v26 }
 0x6ba   :  { %v876_v20 = vmul.f32 %v874_v25, %v874_v25 }
 0x6bc   :  { %v878_v27 = vsel %vm135_vm3, %v876_v20, 0.0  ;;  %v1050_v20 = vld [vmem:[%s3471_s18 + $0x28] sm:$0xff] }
 0x6bd   :  { %879 = vadd.xlane.f32.xlu2 %v878_v27  ;;  %v871_v29 = vpop.xlane.xlu0 %870  ;;  %1075 = vmatpush.msrb.mxu3 %v1050_v20 }
 0x6be   :  { %v873_v30 = vmul.f32 %v871_v29, %v2650_v32 }
 0x6c0   :  { %v875_v31 = vsub.f32 %v2916_v39, %v873_v30 }
 0x6c2   :  { %v877_v24 = vmul.f32 %v875_v31, %v875_v31 }
 0x6c4   :  { %v881_v33 = vsel %vm135_vm3, %v877_v24, 0.0 }
 0x6c5   :  { %882 = vadd.xlane.f32.xlu1 %v881_v33 }
 0x730   :  { %v880_v38 = vpop.xlane.xlu2 %879 }
 0x731   :  { %v884_v40 = vmul.f32 %v880_v38, %v2650_v32  ;;  %v1047_v38 = vld [vmem:[%s3471_s18 + $0x10] sm:$0xff] }
 0x733   :  { %v886_v37 = vadd.f32 1e-05, %v884_v40 }
 0x735   :  { %2389 = vrsqrt.f32 %v886_v37  ;;  %vm894_vm9 = vweird.f32 %v886_v37 }
 0x738   :  { %v883_v41 = vpop.xlane.xlu1 %882 }
 0x739   :  { %v885_v43 = vmul.f32 %v883_v41, %v2650_v32 }
 0x73b   :  { %v2390_v44 = vpop.eup %2389  ;;  %v887_v45 = vadd.f32 1e-05, %v885_v43  ;;  %v1046_v43 = vld [vmem:[%s3471_s18 + $0x8] sm:$0xff] }
 0x73c   :  { %v889_v46 = vmul.f32 %v2390_v44, %v886_v37  ;;  %vm895_vm8 = vweird.f32 %v2390_v44 }
 0x73d   :  { %2391 = vrsqrt.f32 %v887_v45  ;;  %vm896_vm10 = vmor %vm894_vm9, %vm895_vm8  ;;  %vm904_vm14 = vweird.f32 %v887_v45 }
 0x73e   :  { %v890_v47 = vmul.f32 %v2390_v44, %v889_v46  ;;  %v1045_v46 = vld [vmem:[%s3471_s18] sm:$0xff] }
 0x740   :  { %v891_v48 = vmul.f32 0.5, %v890_v47 }
 0x742   :  { %v892_v36 = vsub.f32 1.5, %v891_v48 }
 0x743   :  { %v2392_v49 = vpop.eup %2391 }
 0x744   :  { %v893_v50 = vmul.f32 %v2390_v44, %v892_v36  ;;  %v899_v62 = vmul.f32 %v2392_v49, %v887_v45  ;;  %vm905_vm13 = vweird.f32 %v2392_v49 }
 0x745   :  { %vm906_vm15 = vmor %vm904_vm14, %vm905_vm13 }
 0x746   :  { %v897_v53 = vsel %vm896_vm10, %v2390_v44, %v893_v50  ;;  %v900_v54 = vmul.f32 %v2392_v49, %v899_v62 }
 0x747   :  { %v908_v56 = vmul.f32 %v897_v53, %v874_v25 }
 0x748   :  { %v901_v58 = vmul.f32 0.5, %v900_v54 }
 0x749   :  { %v913_v55 = vmul.f32 %v2335_v51, %v908_v56 }
 0x74a   :  { %v902_v59 = vsub.f32 1.5, %v901_v58 }
 0x74b   :  { %v918_v6 = vadd.f32 %v2336_v57, %v913_v55 }
 0x74c   :  { %v903_v60 = vmul.f32 %v2392_v49, %v902_v59 }
 0x74d   :  { %2197 = vmatmul.msk.f32.vlgmr.msrb.gmra.mxu2 %vm135_vm3, %v918_v6 }
 0x74e   :  { %v907_v61 = vsel %vm906_vm15, %v2392_v49, %v903_v60 }
 0x74f   :  { %v909_v63 = vmul.f32 %v907_v61, %v875_v31  ;;  %v1049_v31 = vld [vmem:[%s3471_s18 + $0x20] sm:$0xff] }
 0x750   :  { %1076 = vmatpush.msrb.mxu3 %v1049_v31 }
 0x751   :  { %v914_v0 = vmul.f32 %v2335_v51, %v909_v63 }
 0x752   :  { %1077 = vmatpush.msrb.mxu3 %v1048_v34 }
 0x753   :  { %v919_v1 = vadd.f32 %v2336_v57, %v914_v0 }
 0x754   :  { %1078 = vmatpush.msrb.mxu3 %v1047_v38 }
 0x755   :  { %2198 = vmatmul.msk.f32.gmra.mxu2 %vm135_vm3, %v919_v1 }
 0x756   :  { %1079 = vmatpush.msrb.mxu3 %v1046_v43 }
 0x758   :  { %1080 = vmatpush.msrb.mxu3 %v1045_v46 }
 0x7d0   :  { %v951_v9 = vpop.f32.mrf.mxu2 }
 0x7d1   :  { %v2966_v10 = vadd.f32 %v2337_v5, %v951_v9 }
 0x7d3   :  { %v2972_v12 = vmul.f32 0.70710677, %v2966_v10  ;;  %v957_v34 = vmul.f32 0.5, %v2966_v10  ;;  %v2338_v10 = vld [vmem:[%s3472_s19] ss:$0 sm:$0xff] }
 0x7d5   :  { %v961_v14 = vmul.f32 %v2972_v12, %v2972_v12 }
 0x7d7   :  { %v962_v16 = vmin.f32 %v961_v14, 16.0 }
 0x7d8   :  { %v954_v19 = vpop.f32.mrf.mxu2 }
 0x7d9   :  { %v963_v21 = vmul.f32 2.1237322e-06, %v962_v16  ;;  %v974_v22 = vmul.f32 3.8918573e-05, %v962_v16  ;;  %v2985_v42 = vadd.f32 %v2337_v5, %v954_v19 }
 0x7db   :  { %v964_v26 = vadd.f32 0.00028619796, %v963_v21  ;;  %v975_v25 = vadd.f32 0.001143296, %v974_v22  ;;  %v2994_v27 = vmul.f32 0.70710677, %v2985_v42 }
 0x7dd   :  { %v965_v29 = vmul.f32 %v964_v26, %v962_v16  ;;  %v976_v30 = vmul.f32 %v975_v25, %v962_v16  ;;  %v1001_v24 = vmul.f32 %v2994_v27, %v2994_v27 }
 0x7df   :  { %v977_v33 = vadd.f32 0.014752088, %v976_v30  ;;  %v966_v28 = vadd.f32 0.0036580483, %v965_v29  ;;  %v1002_v35 = vmin.f32 %v1001_v24, 16.0 }
 0x7e1   :  { %v978_v52 = vmul.f32 %v977_v33, %v962_v16  ;;  %v1003_v40 = vmul.f32 2.1237322e-06, %v1002_v35  ;;  %v1014_v37 = vmul.f32 3.8918573e-05, %v1002_v35  ;;  %v967_v44 = vmul.f32 %v966_v28, %v962_v16 }
 0x7e3   :  { %v979_v41 = vadd.f32 0.112945676, %v978_v52  ;;  %v1004_v45 = vadd.f32 0.00028619796, %v1003_v40  ;;  %v1015_v47 = vadd.f32 0.001143296, %v1014_v37 }
 0x7e4   :  { %v968_v62 = vadd.f32 0.05243302, %v967_v44  ;;  %v958_v44 = vmul.f32 0.5, %v2985_v42 }
 0x7e5   :  { %v980_v48 = vmul.f32 %v979_v41, %v962_v16  ;;  %v1005_v36 = vmul.f32 %v1004_v45, %v1002_v35  ;;  %v1016_v49 = vmul.f32 %v1015_v47, %v1002_v35 }
 0x7e6   :  { %v969_v58 = vmul.f32 %v968_v62, %v962_v16 }
 0x7e7   :  { %v981_v50 = vadd.f32 0.4994258, %v980_v48  ;;  %v1017_v51 = vadd.f32 0.014752088, %v1016_v49  ;;  %v1006_v54 = vadd.f32 0.0036580483, %v1005_v36 }
 0x7e8   :  { %v970_v60 = vadd.f32 0.18741608, %v969_v58 }
 0x7e9   :  { %v982_v53 = vmul.f32 %v981_v50, %v962_v16  ;;  %v1018_v56 = vmul.f32 %v1017_v51, %v1002_v35  ;;  %v1007_v59 = vmul.f32 %v1006_v54, %v1002_v35 }
 0x7ea   :  { %v971_v2 = vmul.f32 %v970_v60, %v962_v16  ;;  %v2213_v60 = vld [vmem:[%s3461_s8 + $0x38] sm:$0xff] }
 0x7eb   :  { %v983_v57 = vadd.f32 1.0, %v982_v53  ;;  %v1019_v55 = vadd.f32 0.112945676, %v1018_v56  ;;  %v1008_v63 = vadd.f32 0.05243302, %v1007_v59  ;;  %1209 = vmatpush.msra.mxu1 %v2213_v60 }
 0x7ec   :  { %v972_v9 = vadd.f32 1.1283791, %v971_v2  ;;  %v2204_v2 = vld [vmem:[%s3510_s29 + $0x28] sm:$0xff] }
 0x7ed   :  { %2393 = vrcp.f32 %v983_v57  ;;  %v1020_v6 = vmul.f32 %v1019_v55, %v1002_v35  ;;  %v1009_v5 = vmul.f32 %v1008_v63, %v1002_v35  ;;  %v995_v8 = vand.u32 2147483648, %v983_v57  ;;  %v2205_v63 = vld [vmem:[%s3510_s29 + $0x30] sm:$0xff] }
 0x7ee   :  { %v993_v13 = vand.u32 2147483647, %v983_v57  ;;  %vm989_vm2 = vweird.f32 %v983_v57  ;;  %v973_v21 = vmul.f32 %v972_v9, %v2972_v12 }
 0x7ef   :  { %v1021_v61 = vadd.f32 0.4994258, %v1020_v6  ;;  %v1010_v14 = vadd.f32 0.18741608, %v1009_v5  ;;  %v996_v17 = vor.u32 1.1754944e-38, %v995_v8  ;;  %v2206_v6 = vld [vmem:[%s3510_s29 + $0x38] sm:$0xff] }
 0x7f0   :  { %vm994_vm5 = vcmp.eq.f32.partialorder %v993_v13, 8.507059e+37  ;;  %1176 = vmatpush.msra.mxu0 %v2206_v6  ;;  %v2203_v5 = vld [vmem:[%s3510_s29 + $0x20] sm:$0xff] }
 0x7f1   :  { %v1022_v0 = vmul.f32 %v1021_v61, %v1002_v35  ;;  %v1011_v23 = vmul.f32 %v1010_v14, %v1002_v35  ;;  %v2220_v61 = vld [vmem:[%s3463_s10 + $0x38] sm:$0xff]  ;;  %v2217_v8 = vld [vmem:[%s3463_s10 + $0x20] sm:$0xff] }
 0x7f2   :  { %1242 = vmatpush.msra.mxu2 %v2220_v61  ;;  %1177 = vmatpush.msra.mxu0 %v2205_v63 }
 0x7f3   :  { %v2394_v1 = vpop.eup %2393  ;;  %v1023_v4 = vadd.f32 1.0, %v1022_v0  ;;  %v1012_v31 = vadd.f32 1.1283791, %v1011_v23  ;;  %v2212_v0 = vld [vmem:[%s3461_s8 + $0x30] sm:$0xff] }
 0x7f4   :  { %v985_v3 = vmul.f32 %v2394_v1, %v983_v57  ;;  %vm990_vm1 = vweird.f32 %v2394_v1  ;;  %1210 = vmatpush.msra.mxu1 %v2212_v0  ;;  %1178 = vmatpush.msra.mxu0 %v2204_v2 }
 0x7f5   :  { %2395 = vrcp.f32 %v1023_v4  ;;  %vm991_vm4 = vmor %vm989_vm2, %vm990_vm1  ;;  %v1035_v30 = vand.u32 2147483648, %v1023_v4  ;;  %v1033_v33 = vand.u32 2147483647, %v1023_v4  ;;  %vm1029_vm8 = vweird.f32 %v1023_v4 }
 0x7f6   :  { %v986_v7 = vsub.f32 1.0, %v985_v3  ;;  %v1013_v40 = vmul.f32 %v1012_v31, %v2994_v27  ;;  %v2211_v3 = vld [vmem:[%s3461_s8 + $0x28] sm:$0xff]  ;;  %1179 = vmatpush.msra.mxu0 %v2203_v5 }
 0x7f7   :  { %v1036_v12 = vor.u32 1.1754944e-38, %v1035_v30  ;;  %vm1034_vm10 = vcmp.eq.f32.partialorder %v1033_v33, 8.507059e+37  ;;  %1211 = vmatpush.msra.mxu1 %v2211_v3  ;;  %v2340_v33 = vld [vmem:[%s3512_s27 + $0x1] ss:$0 sm:$0xff] }
 0x7f8   :  { %v987_v11 = vmul.f32 %v2394_v1, %v986_v7  ;;  %v2210_v7 = vld [vmem:[%s3461_s8 + $0x20] sm:$0xff]  ;;  %s3525_s8 = smov 24  }
 0x7f9   :  { %1212 = vmatpush.msra.mxu1 %v2210_v7 }
 0x7fa   :  { %v988_v15 = vadd.f32 %v2394_v1, %v987_v11 }
 0x7fb   :  { %v2396_v19 = vpop.eup %2395 }
 0x7fc   :  { %v992_v22 = vsel %vm991_vm4, %v2394_v1, %v988_v15  ;;  %v1025_v26 = vmul.f32 %v2396_v19, %v1023_v4  ;;  %vm1030_vm6 = vweird.f32 %v2396_v19  ;;  %v2219_v1 = vld [vmem:[%s3463_s10 + $0x30] sm:$0xff]  ;;  %v2218_v4 = vld [vmem:[%s3463_s10 + $0x28] sm:$0xff] }
 0x7fd   :  { %v997_v16 = vsel %vm994_vm5, %v996_v17, %v992_v22  ;;  %vm1031_vm9 = vmor %vm1029_vm8, %vm1030_vm6  ;;  %1243 = vmatpush.msra.mxu2 %v2219_v1 }
 0x7fe   :  { %v998_v25 = vmul.f32 %v997_v16, %v973_v21  ;;  %v1026_v20 = vsub.f32 1.0, %v1025_v26 }
 0x7ff   :  { %1244 = vmatpush.msra.mxu2 %v2218_v4  ;;  %v2445_v4 = vld [vmem:[%s3514_s17] sm:$0xff] }
 0x800   :  { %v2199_v29 = vclamps-f32 %v998_v25, 1.0  ;;  %v1027_v24 = vmul.f32 %v2396_v19, %v1026_v20  ;;  %v2339_v20 = vld [vmem:[%s3511_s2 + $0x1] ss:$0 sm:$0xff] }
 0x801   :  { %1245 = vmatpush.msra.mxu2 %v2217_v8 }
 0x802   :  { %v1041_v28 = vadd.f32 1.0, %v2199_v29  ;;  %v1028_v52 = vadd.f32 %v2396_v19, %v1027_v24 }
 0x804   :  { %v1043_v38 = vmul.f32 %v1041_v28, %v957_v34  ;;  %v1032_v35 = vsel %vm1031_vm9, %v2396_v19, %v1028_v52 }
 0x805   :  { %v1037_v37 = vsel %vm1034_vm10, %v1036_v12, %v1032_v35 }
 0x806   :  { %1081 = vmatmul.f32.vlgmr.msrb.gmra.mxu3 %v1043_v38  ;;  %v1038_v41 = vmul.f32 %v1037_v37, %v1013_v40 }
 0x808   :  { %v2200_v43 = vclamps-f32 %v1038_v41, 1.0 }
 0x80a   :  { %v1042_v45 = vadd.f32 1.0, %v2200_v43  ;;  %v2341_v43 = vld [vmem:[%s3513_s3 + $0x1] ss:$0 sm:$0xff] }
 0x80c   :  { %v1044_v46 = vmul.f32 %v1042_v45, %v958_v44  ;;  %v2342_v44 = vld [vmem:[%s3462_s9 + $0x1] ss:$0 sm:$0xff]  ;;  %s3522_s9 = smov 112  }
 0x80e   :  { %1084 = vmatmul.f32.gmra.mxu3 %v1044_v46 }
 0x889   :  { %v1082_v47 = vpop.f32.mrf.mxu3 }
 0x88a   :  { %v1083_v48 = vadd.f32 %v2338_v10, %v1082_v47 }
 0x88c   :  { %v3021_v36 = vadd.f32 %v1083_v48, %v2911_v18 }
 0x88e   :  { %v1094_v27 = vsel %vm135_vm3, %v3021_v36, 0.0 }
 0x88f   :  { %1095 = vadd.xlane.f32.xlu0 %v1094_v27 }
 0x891   :  { %v1085_v49 = vpop.f32.mrf.mxu3 }
 0x892   :  { %v1086_v50 = vadd.f32 %v2338_v10, %v1085_v49 }
 0x894   :  { %v3026_v42 = vadd.f32 %v1086_v50, %v2916_v39  ;;  %v2343_v50 = vld [vmem:[%s3464_s11 + $0x1] ss:$0 sm:$0xff] }
 0x896   :  { %v1097_v62 = vsel %vm135_vm3, %v3026_v42, 0.0 }
 0x897   :  { %1098 = vadd.xlane.f32.xlu2 %v1097_v62 }
 0x902   :  { %v1096_v51 = vpop.xlane.xlu0 %1095 }
 0x903   :  { %v1100_v53 = vmul.f32 %v1096_v51, %v2650_v32 }
 0x905   :  { %v1102_v54 = vsub.f32 %v3021_v36, %v1100_v53 }
 0x907   :  { %v1104_v18 = vmul.f32 %v1102_v54, %v1102_v54 }
 0x909   :  { %v1106_v56 = vsel %vm135_vm3, %v1104_v18, 0.0 }
 0x90a   :  { %1107 = vadd.xlane.f32.xlu1 %v1106_v56  ;;  %v1099_v57 = vpop.xlane.xlu2 %1098 }
 0x90b   :  { %v1101_v58 = vmul.f32 %v1099_v57, %v2650_v32 }
 0x90d   :  { %v3035_v55 = vsub.f32 %v3026_v42, %v1101_v58 }
 0x90f   :  { %v1105_v39 = vmul.f32 %v3035_v55, %v3035_v55 }
 0x911   :  { %v1109_v59 = vsel %vm135_vm3, %v1105_v39, 0.0 }
 0x912   :  { %1110 = vadd.xlane.f32.xlu0 %v1109_v59 }
 0x97d   :  { %v1108_v9 = vpop.xlane.xlu1 %1107 }
 0x97e   :  { %v1112_v11 = vmul.f32 %v1108_v9, %v2650_v32 }
 0x980   :  { %v1114_v13 = vadd.f32 1e-05, %v1112_v11 }
 0x982   :  { %2397 = vrsqrt.f32 %v1114_v13  ;;  %vm1122_vm14 = vweird.f32 %v1114_v13 }
 0x985   :  { %v1111_v14 = vpop.xlane.xlu0 %1110 }
 0x986   :  { %v1113_v15 = vmul.f32 %v1111_v14, %v2650_v32 }
 0x988   :  { %v2398_v17 = vpop.eup %2397  ;;  %v1115_v21 = vadd.f32 1e-05, %v1113_v15 }
 0x989   :  { %v1117_v19 = vmul.f32 %v2398_v17, %v1114_v13  ;;  %vm1123_vm13 = vweird.f32 %v2398_v17 }
 0x98a   :  { %2399 = vrsqrt.f32 %v1115_v21  ;;  %vm1124_vm15 = vmor %vm1122_vm14, %vm1123_vm13  ;;  %vm1132_vm2 = vweird.f32 %v1115_v21 }
 0x98b   :  { %v1118_v22 = vmul.f32 %v2398_v17, %v1117_v19 }
 0x98d   :  { %v1119_v16 = vmul.f32 0.5, %v1118_v22  ;;  %v2446_v22 = vld [vmem:[%s3514_s17 + $0x8] sm:$0xff]  ;;  %s3523_s17 = smov 8  }
 0x98f   :  { %v1120_v23 = vsub.f32 1.5, %v1119_v16 }
 0x990   :  { %v2400_v26 = vpop.eup %2399 }
 0x991   :  { %v1121_v25 = vmul.f32 %v2398_v17, %v1120_v23  ;;  %v1127_v29 = vmul.f32 %v2400_v26, %v1115_v21  ;;  %vm1133_vm1 = vweird.f32 %v2400_v26 }
 0x992   :  { %vm1134_vm4 = vmor %vm1132_vm2, %vm1133_vm1 }
 0x993   :  { %v1125_v30 = vsel %vm1124_vm15, %v2398_v17, %v1121_v25  ;;  %v1128_v24 = vmul.f32 %v2400_v26, %v1127_v29 }
 0x994   :  { %v1136_v31 = vmul.f32 %v1125_v30, %v1102_v54 }
 0x995   :  { %v1129_v28 = vmul.f32 0.5, %v1128_v24 }
 0x996   :  { %v1141_v34 = vmul.f32 %v2339_v20, %v1136_v31 }
 0x997   :  { %v1130_v52 = vsub.f32 1.5, %v1129_v28 }
 0x998   :  { %v1146_v38 = vadd.f32 %v2340_v33, %v1141_v34 }
 0x999   :  { %v1131_v12 = vmul.f32 %v2400_v26, %v1130_v52 }
 0x99a   :  { %2208 = vmatmul.msk.f32.vlgmr.msra.gmra.mxu0 %vm135_vm3, %v1146_v38  ;;  %2215 = vmatmul.msk.f32.vlgmr.msra.gmra.mxu1 %vm135_vm3, %v1146_v38 }
 0x99b   :  { %2222 = vmatmul.msk.f32.vlgmr.msra.gmra.mxu2 %vm135_vm3, %v1146_v38  ;;  %v1135_v40 = vsel %vm1134_vm4, %v2400_v26, %v1131_v12 }
 0x99c   :  { %v1137_v35 = vmul.f32 %v1135_v40, %v3035_v55 }
 0x99e   :  { %v1142_v37 = vmul.f32 %v2339_v20, %v1137_v35 }
 0x9a0   :  { %v1147_v41 = vadd.f32 %v2340_v33, %v1142_v37 }
 0x9a2   :  { %2209 = vmatmul.msk.f32.gmra.mxu0 %vm135_vm3, %v1147_v41  ;;  %2216 = vmatmul.msk.f32.gmra.mxu1 %vm135_vm3, %v1147_v41 }
 0x9a3   :  { %2223 = vmatmul.msk.f32.gmra.mxu2 %vm135_vm3, %v1147_v41 }
 0xa17   :  { %v1181_v45 = vpop.f32.mrf.mxu0  ;;  %v1214_v46 = vpop.f32.mrf.mxu1 }
 0xa18   :  { %v1182_v10 = vadd.f32 %v2341_v43, %v1181_v45  ;;  %v1215_v47 = vadd.f32 %v2342_v44, %v1214_v46 }
 0xa1a   :  { %1373 = vrot.lane.b32.xlu1 %v1215_v47, %s3520_s0  ;;  %1369 = vrot.lane.b32.xlu0 %v1182_v10, %s3520_s0 }
 0xa1e   :  { %v1247_v48 = vpop.f32.mrf.mxu2 }
 0xa1f   :  { %v1217_v27 = vpop.f32.mrf.mxu1  ;;  %v1184_v62 = vpop.f32.mrf.mxu0  ;;  %v1248_v53 = vadd.f32 %v2343_v50, %v1247_v48 }
 0xa20   :  { %v1218_v49 = vadd.f32 %v2342_v44, %v1217_v27  ;;  %v1185_v18 = vadd.f32 %v2341_v43, %v1184_v62 }
 0xa22   :  { %1627 = vrot.lane.b32.xlu1 %v1215_v47, %s3521_s4  ;;  %1629 = vrot.lane.b32.xlu0 %v1218_v49, %s3521_s4 }
 0xa23   :  { %1375 = vrot.lane.b32.xlu2 %v1218_v49, %s3520_s0  ;;  %2224 = vmatpush.xpose.msk.msrb.mxu0 %vm296_vm11, %v1218_v49 }
 0xa26   :  { %v1250_v51 = vpop.f32.mrf.mxu2 }
 0xa27   :  { %v1251_v54 = vadd.f32 %v2343_v50, %v1250_v51  ;;  %2225 = vmatpush.xpose.msk.msrb.mxu0 %vm296_vm11, %v1215_v47 }
 0xa29   :  { %1360 = vmatpush.msrb.mxu1 %v1251_v54  ;;  %v3108_v56 = vpack.i.bf16 %v1248_v53, %v1251_v54 }
 0xa2a   :  { %1501 = vrot.lane.b32.xlu1 %v1215_v47, %s3522_s9  ;;  %2226 = vmatmul.msk.f32.vlgmr.msrb.gmra.mxu0 %vm296_vm11, %v1182_v10 }
 0xa2b   :  { %1503 = vrot.lane.b32.xlu0 %v1218_v49, %s3522_s9  ;;  %1361 = vmatpush.msrb.mxu1 %v1248_v53 }
 0xa2c   :  { %1371 = vrot.lane.b32.xlu2 %v1185_v18, %s3520_s0 }
 0xa32   :  { %1499 = vrot.lane.b32.xlu1 %v1185_v18, %s3522_s9  ;;  %2227 = vmatmul.msk.f32.gmra.mxu0 %vm296_vm11, %v1185_v18 }
 0xa33   :  { %1497 = vrot.lane.b32.xlu0 %v1182_v10, %s3522_s9 }
 0xa34   :  { %1623 = vrot.lane.b32.xlu2 %v1182_v10, %s3521_s4 }
 0xa3c   :  { %1625 = vrot.lane.b32.xlu2 %v1185_v18, %s3521_s4 }
 0xa7d   :  { %v1376_v57 = vpop.permute.xlu2 %1375 }
 0xa7e   :  { %2230 = vmatpush.xpose.msk.msrb.mxu2 %vm296_vm11, %v1376_v57 }
 0xa86   :  { %v1372_v39 = vpop.permute.xlu2 %1371 }
 0xa8c   :  { %v1374_v58 = vpop.permute.xlu1 %1373  ;;  %v1370_v55 = vpop.permute.xlu0 %1369 }
 0xa8d   :  { %2231 = vmatpush.xpose.msk.msrb.mxu2 %vm296_vm11, %v1374_v58 }
 0xa8e   :  { %v1624_v60 = vpop.permute.xlu2 %1623 }
 0xa90   :  { %2232 = vmatmul.msk.f32.vlgmr.msrb.gmra.mxu2 %vm296_vm11, %v1370_v55 }
 0xa94   :  { %v1630_v59 = vpop.permute.xlu0 %1629  ;;  %v1628_v6 = vpop.permute.xlu1 %1627 }
 0xa95   :  { %2242 = vmatpush.xpose.msk.msra.mxu2 %vm296_vm11, %v1630_v59 }
 0xa96   :  { %v1626_v1 = vpop.permute.xlu2 %1625 }
 0xa98   :  { %2233 = vmatmul.msk.f32.gmra.mxu2 %vm296_vm11, %v1372_v39 }
 0xa99   :  { %2243 = vmatpush.xpose.msk.msra.mxu2 %vm296_vm11, %v1628_v6 }
 0xa9c   :  { %v1502_v63 = vpop.permute.xlu1 %1501 }
 0xa9d   :  { %v1504_v61 = vpop.permute.xlu0 %1503 }
 0xa9e   :  { %2236 = vmatpush.xpose.msk.msra.mxu0 %vm296_vm11, %v1504_v61 }
 0xaa0   :  { %2244 = vmatmul.msk.f32.vlgmr.msra.gmra.mxu2 %vm296_vm11, %v1624_v60 }
 0xaa2   :  { %2237 = vmatpush.xpose.msk.msra.mxu0 %vm296_vm11, %v1502_v63 }
 0xaa4   :  { %v1500_v7 = vpop.permute.xlu1 %1499 }
 0xaa5   :  { %v1498_v0 = vpop.permute.xlu0 %1497 }
 0xaa6   :  { %2238 = vmatmul.msk.f32.vlgmr.msra.gmra.mxu0 %vm296_vm11, %v1498_v0 }
 0xaa7   :  { %v1282_v2 = vpop.f32.mrf.mxu0 }
 0xaa8   :  { %2245 = vmatmul.msk.f32.gmra.mxu2 %vm296_vm11, %v1626_v1  ;;  %v1288_v3 = vmul.f32 0.35355338, %v1282_v2 }
 0xaaa   :  { %v1290_v5 = vadd.f32 %v2445_v4, %v1288_v3 }
 0xaac   :  { %v1292_v8 = vsel %vm336_vm12, %v1290_v5, -inf }
 0xaad   :  { %1293 = vmax.xlane.f32.xlu0 %v1292_v8 }
 0xaae   :  { %2239 = vmatmul.msk.f32.gmra.mxu0 %vm296_vm11, %v1500_v7 }
 0xaaf   :  { %v1285_v13 = vpop.f32.mrf.mxu0 }
 0xab0   :  { %v1289_v15 = vmul.f32 0.35355338, %v1285_v13 }
 0xab2   :  { %v1291_v16 = vadd.f32 %v2446_v22, %v1289_v15 }
 0xab4   :  { %v1295_v26 = vsel %vm336_vm12, %v1291_v16, -inf }
 0xb13   :  { %v1402_v9 = vpop.f32.mrf.mxu2 }
 0xb14   :  { %v1408_v11 = vmul.f32 0.35355338, %v1402_v9 }
 0xb16   :  { %v1410_v14 = vadd.f32 %v2445_v4, %v1408_v11 }
 0xb18   :  { %v1412_v17 = vsel %vm336_vm12, %v1410_v14, -inf }
 0xb19   :  { %1413 = vmax.xlane.f32.xlu2 %v1412_v17 }
 0xb1b   :  { %v1405_v19 = vpop.f32.mrf.mxu2 }
 0xb1c   :  { %v1409_v21 = vmul.f32 0.35355338, %v1405_v19 }
 0xb1e   :  { %v1411_v23 = vadd.f32 %v2446_v22, %v1409_v21 }
 0xb20   :  { %v1415_v25 = vsel %vm336_vm12, %v1411_v23, -inf  ;;  %v1294_v30 = vpop.xlane.xlu0 %1293 }
 0xb21   :  { %1296 = vmax.xlane.f32.xlu2 %v1295_v26  ;;  %1416 = vmax.xlane.f32.xlu1 %v1415_v25  ;;  %v1298_v28 = vsub.f32 %v1290_v5, %v1294_v30 }
 0xb23   :  { %v1530_v20 = vpop.f32.mrf.mxu0  ;;  %v1656_v29 = vpop.f32.mrf.mxu2  ;;  %v1300_v12 = vmul.f32 1.442695, %v1298_v28 }
 0xb24   :  { %v1536_v31 = vmul.f32 0.35355338, %v1530_v20  ;;  %v1662_v24 = vmul.f32 0.35355338, %v1656_v29 }
 0xb25   :  { %2401 = vpow2.f32 %v1300_v12 }
 0xb26   :  { %v1664_v33 = vadd.f32 %v2445_v4, %v1662_v24  ;;  %v1538_v34 = vadd.f32 %v2445_v4, %v1536_v31 }
 0xb28   :  { %v1666_v52 = vsel %vm336_vm12, %v1664_v33, -inf  ;;  %v1540_v38 = vsel %vm336_vm12, %v1538_v34, -inf }
 0xb29   :  { %1667 = vmax.xlane.f32.xlu0 %v1666_v52  ;;  %1541 = vmax.xlane.f32.xlu1 %v1540_v38 }
 0xb2b   :  { %v1533_v40 = vpop.f32.mrf.mxu0  ;;  %v1659_v35 = vpop.f32.mrf.mxu2 }
 0xb2c   :  { %v1537_v37 = vmul.f32 0.35355338, %v1533_v40  ;;  %v1663_v41 = vmul.f32 0.35355338, %v1659_v35  ;;  %v3144_v10 = vpop.eup %2401 }
 0xb2d   :  { %v1304_v47 = vsel %vm336_vm12, %v3144_v10, 0.0 }
 0xb2e   :  { %v1665_v43 = vadd.f32 %v2446_v22, %v1663_v41  ;;  %v1539_v44 = vadd.f32 %v2446_v22, %v1537_v37 }
 0xb30   :  { %v1669_v45 = vsel %vm336_vm12, %v1665_v43, -inf  ;;  %v1543_v46 = vsel %vm336_vm12, %v1539_v44, -inf }
 0xb31   :  { %1670 = vmax.xlane.f32.xlu2 %v1669_v45  ;;  %1544 = vmax.xlane.f32.xlu0 %v1543_v46 }
 0xb39   :  { %1305 = vadd.xlane.f32.xlu2 %v1304_v47 }
 0xb8c   :  { %v1414_v48 = vpop.xlane.xlu2 %1413 }
 0xb8d   :  { %v1418_v51 = vsub.f32 %v1410_v14, %v1414_v48 }
 0xb8f   :  { %v1420_v18 = vmul.f32 1.442695, %v1418_v51 }
 0xb94   :  { %v1297_v27 = vpop.xlane.xlu2 %1296  ;;  %v1417_v49 = vpop.xlane.xlu1 %1416 }
 0xb95   :  { %v1299_v50 = vsub.f32 %v1291_v16, %v1297_v27  ;;  %v1419_v62 = vsub.f32 %v1411_v23, %v1417_v49 }
 0xb97   :  { %v1302_v53 = vmul.f32 1.442695, %v1299_v50  ;;  %v1422_v54 = vmul.f32 1.442695, %v1419_v62 }
 0xb99   :  { %2403 = vpow2.f32 %v1302_v53 }
 0xb9a   :  { %2405 = vpow2.f32 %v1422_v54 }
 0xb9b   :  { %2407 = vpow2.f32 %v1420_v18 }
 0xb9c   :  { %v1542_v57 = vpop.xlane.xlu1 %1541  ;;  %v1668_v58 = vpop.xlane.xlu0 %1667 }
 0xb9d   :  { %v1672_v55 = vsub.f32 %v1664_v33, %v1668_v58  ;;  %v1546_v59 = vsub.f32 %v1538_v34, %v1542_v57 }
 0xb9f   :  { %v3148_v39 = vpop.eup %2403  ;;  %v1674_v6 = vmul.f32 1.442695, %v1672_v55  ;;  %v1548_v0 = vmul.f32 1.442695, %v1546_v59 }
 0xba0   :  { %v3150_v60 = vpop.eup %2405  ;;  %v1307_v61 = vsel %vm336_vm12, %v3148_v39, 0.0 }
 0xba1   :  { %1308 = vadd.xlane.f32.xlu1 %v1307_v61  ;;  %v1427_v63 = vsel %vm336_vm12, %v3150_v60, 0.0  ;;  %2409 = vpow2.f32 %v1674_v6  ;;  %v3156_v3 = vpop.eup %2407 }
 0xba2   :  { %1428 = vadd.xlane.f32.xlu0 %v1427_v63  ;;  %2411 = vpow2.f32 %v1548_v0  ;;  %v1424_v9 = vsel %vm336_vm12, %v3156_v3, 0.0 }
 0xba4   :  { %v1671_v1 = vpop.xlane.xlu2 %1670  ;;  %v1545_v2 = vpop.xlane.xlu0 %1544 }
 0xba5   :  { %v1673_v4 = vsub.f32 %v1665_v43, %v1671_v1  ;;  %v1547_v7 = vsub.f32 %v1539_v44, %v1545_v2 }
 0xba7   :  { %v1676_v5 = vmul.f32 1.442695, %v1673_v4  ;;  %v3158_v8 = vpop.eup %2409  ;;  %v1550_v13 = vmul.f32 1.442695, %v1547_v7 }
 0xba8   :  { %v1678_v11 = vsel %vm336_vm12, %v3158_v8, 0.0  ;;  %v3164_v15 = vpop.eup %2411 }
 0xba9   :  { %2413 = vpow2.f32 %v1676_v5  ;;  %1425 = vadd.xlane.f32.xlu1 %v1424_v9  ;;  %1679 = vadd.xlane.f32.xlu2 %v1678_v11  ;;  %v1552_v19 = vsel %vm336_vm12, %v3164_v15, 0.0 }
 0xbac   :  { %v1306_v14 = vpop.xlane.xlu2 %1305 }
 0xbad   :  { %2415 = vrcp.f32 %v1306_v14  ;;  %v1321_v25 = vand.u32 2147483648, %v1306_v14  ;;  %v1319_v29 = vand.u32 2147483647, %v1306_v14  ;;  %vm1315_vm6 = vweird.f32 %v1306_v14 }
 0xbae   :  { %2417 = vpow2.f32 %v1550_v13 }
 0xbaf   :  { %v3166_v17 = vpop.eup %2413  ;;  %v1322_v24 = vor.u32 1.1754944e-38, %v1321_v25  ;;  %vm1320_vm9 = vcmp.eq.f32.partialorder %v1319_v29, 8.507059e+37 }
 0xbb0   :  { %v1681_v21 = vsel %vm336_vm12, %v3166_v17, 0.0 }
 0xbb1   :  { %1553 = vadd.xlane.f32.xlu1 %v1552_v19  ;;  %1682 = vadd.xlane.f32.xlu2 %v1681_v21 }
 0xbb3   :  { %v2416_v22 = vpop.eup %2415 }
 0xbb4   :  { %v1311_v16 = vmul.f32 %v2416_v22, %v1306_v14  ;;  %v3172_v23 = vpop.eup %2417  ;;  %vm1316_vm5 = vweird.f32 %v2416_v22 }
 0xbb5   :  { %v1555_v30 = vsel %vm336_vm12, %v3172_v23, 0.0  ;;  %vm1317_vm8 = vmor %vm1315_vm6, %vm1316_vm5 }
 0xbb6   :  { %v1312_v26 = vsub.f32 1.0, %v1311_v16  ;;  %2315 = vrot.lane.b32.xlu0 %v3108_v56, %s3520_s0 }
 0xbb8   :  { %v1313_v20 = vmul.f32 %v2416_v22, %v1312_v26 }
 0xbb9   :  { %1556 = vadd.xlane.f32.xlu1 %v1555_v30 }
 0xbba   :  { %v1314_v31 = vadd.f32 %v2416_v22, %v1313_v20 }
 0xbbc   :  { %v1318_v33 = vsel %vm1317_vm8, %v2416_v22, %v1314_v31 }
 0xbbd   :  { %v1323_v34 = vsel %vm1320_vm9, %v1322_v24, %v1318_v33 }
 0xbbe   :  { %v1324_v28 = vmul.f32 %v3144_v10, %v1323_v34 }
 0xbc0   :  { %2228 = vmatmul.msk.f32.vlgmr.msrb.gmra.mxu1 %vm336_vm12, %v1324_v28 }
 0xbc9   :  { %2320 = vrot.lane.b32.xlu2 %v3108_v56, %s3521_s4 }
 0xbd2   :  { %2325 = vrot.lane.b32.xlu1 %v3108_v56, %s3522_s9 }
 0xc14   :  { %v1309_v52 = vpop.xlane.xlu1 %1308 }
 0xc15   :  { %2419 = vrcp.f32 %v1309_v52  ;;  %v3184_v38 = vpop.xlane.xlu0 %1428  ;;  %v1336_v56 = vand.u32 2147483648, %v1309_v52  ;;  %vm1330_vm13 = vweird.f32 %v1309_v52  ;;  %v1334_v10 = vand.u32 2147483647, %v1309_v52 }
 0xc16   :  { %2421 = vrcp.f32 %v3184_v38  ;;  %v1456_v14 = vand.u32 2147483648, %v3184_v38  ;;  %vm1450_vm8 = vweird.f32 %v3184_v38  ;;  %v1454_v26 = vand.u32 2147483647, %v3184_v38 }
 0xc17   :  { %v1337_v50 = vor.u32 1.1754944e-38, %v1336_v56  ;;  %vm1335_vm15 = vcmp.eq.f32.partialorder %v1334_v10, 8.507059e+37 }
 0xc18   :  { %v1457_v31 = vor.u32 1.1754944e-38, %v1456_v14  ;;  %v2251_v14 = vld [vmem:[%s3465_s12 + $0x38] sm:$0xff] }
 0xc19   :  { %1807 = vmatpush.msrb.mxu0 %v2251_v14 }
 0xc1b   :  { %v2420_v12 = vpop.eup %2419 }
 0xc1c   :  { %v1326_v40 = vmul.f32 %v2420_v12, %v1309_v52  ;;  %v1426_v35 = vpop.xlane.xlu1 %1425  ;;  %v3187_v37 = vpop.xlane.xlu2 %1679  ;;  %vm1331_vm10 = vweird.f32 %v2420_v12 }
 0xc1d   :  { %2423 = vrcp.f32 %v1426_v35  ;;  %v3189_v41 = vpop.eup %2421  ;;  %vm1332_vm14 = vmor %vm1330_vm13, %vm1331_vm10  ;;  %v1439_v18 = vand.u32 2147483647, %v1426_v35  ;;  %v1441_v57 = vand.u32 2147483648, %v1426_v35  ;;  %vm1435_vm2 = vweird.f32 %v1426_v35 }
 0xc1e   :  { %v1327_v43 = vsub.f32 1.0, %v1326_v40  ;;  %2425 = vrcp.f32 %v3187_v37  ;;  %v1446_v45 = vmul.f32 %v3189_v41, %v3184_v38  ;;  %vm1451_vm6 = vweird.f32 %v3189_v41 }
 0xc1f   :  { %v1442_v2 = vor.u32 1.1754944e-38, %v1441_v57  ;;  %vm1440_vm5 = vcmp.eq.f32.partialorder %v1439_v18, 8.507059e+37  ;;  %vm1452_vm9 = vmor %vm1450_vm8, %vm1451_vm6  ;;  %vm1455_vm10 = vcmp.eq.f32.partialorder %v1454_v26, 8.507059e+37  ;;  %v1695_v28 = vand.u32 2147483648, %v3187_v37 }
 0xc20   :  { %v1328_v44 = vmul.f32 %v2420_v12, %v1327_v43  ;;  %v1447_v62 = vsub.f32 1.0, %v1446_v45 }
 0xc21   :  { %v1696_v43 = vor.u32 1.1754944e-38, %v1695_v28 }
 0xc22   :  { %v1329_v46 = vadd.f32 %v2420_v12, %v1328_v44  ;;  %v1448_v61 = vmul.f32 %v3189_v41, %v1447_v62 }
 0xc23   :  { %v2424_v47 = vpop.eup %2423 }
 0xc24   :  { %v1431_v48 = vmul.f32 %v2424_v47, %v1426_v35  ;;  %v3194_v27 = vpop.xlane.xlu1 %1553  ;;  %v1333_v49 = vsel %vm1332_vm14, %v2420_v12, %v1329_v46  ;;  %v3196_v51 = vpop.xlane.xlu2 %1682  ;;  %vm1436_vm1 = vweird.f32 %v2424_v47  ;;  %v1449_v11 = vadd.f32 %v3189_v41, %v1448_v61 }
 0xc25   :  { %v3198_v53 = vpop.eup %2425  ;;  %v1338_v58 = vsel %vm1335_vm15, %v1337_v50, %v1333_v49  ;;  %2427 = vrcp.f32 %v3196_v51  ;;  %vm1437_vm4 = vmor %vm1435_vm2, %vm1436_vm1  ;;  %vm1689_vm14 = vweird.f32 %v3187_v37  ;;  %v1693_v12 = vand.u32 2147483647, %v3187_v37 }
 0xc26   :  { %v1432_v54 = vsub.f32 1.0, %v1431_v48  ;;  %v1339_v6 = vmul.f32 %v3148_v39, %v1338_v58  ;;  %v1685_v63 = vmul.f32 %v3198_v53, %v3187_v37  ;;  %2429 = vrcp.f32 %v3194_v27 }
 0xc27   :  { %v1453_v30 = vsel %vm1452_vm9, %v3189_v41, %v1449_v11  ;;  %vm1690_vm13 = vweird.f32 %v3198_v53  ;;  %vm1694_vm1 = vcmp.eq.f32.partialorder %v1693_v12, 8.507059e+37  ;;  %v1708_v49 = vand.u32 2147483647, %v3196_v51 }
 0xc28   :  { %v1433_v55 = vmul.f32 %v2424_v47, %v1432_v54  ;;  %v2316_v59 = vpop.permute.xlu0 %2315  ;;  %2229 = vmatmul.msk.f32.gmra.mxu1 %vm336_vm12, %v1339_v6  ;;  %v1686_v39 = vsub.f32 1.0, %v1685_v63  ;;  %vm1691_vm15 = vmor %vm1689_vm14, %vm1690_vm13  ;;  %vm1563_vm6 = vweird.f32 %v3194_v27  ;;  %v1567_v50 = vand.u32 2147483647, %v3194_v27 }
 0xc29   :  { %v2317_v0 = vunpack.i.l.bf16 %v2316_v59  ;;  %v2318_v4 = vunpack.i.h.bf16 %v2316_v59 }
 0xc2a   :  { %v1434_v1 = vadd.f32 %v2424_v47, %v1433_v55  ;;  %v1687_v20 = vmul.f32 %v3198_v53, %v1686_v39  ;;  %vm1568_vm13 = vcmp.eq.f32.partialorder %v1567_v50, 8.507059e+37  ;;  %v2260_v50 = vld [vmem:[%s3469_s16 + $0x38] sm:$0xff] }
 0xc2b   :  { %1488 = vmatpush.msra.mxu3 %v2317_v0  ;;  %v3209_v13 = vpop.eup %2427 }
 0xc2c   :  { %v1438_v5 = vsel %vm1437_vm4, %v2424_v47, %v1434_v1  ;;  %v2321_v9 = vpop.permute.xlu2 %2320  ;;  %v3212_v21 = vpop.xlane.xlu1 %1556  ;;  %v1700_v29 = vmul.f32 %v3209_v13, %v3196_v51  ;;  %v1688_v33 = vadd.f32 %v3198_v53, %v1687_v20  ;;  %vm1705_vm2 = vweird.f32 %v3209_v13 }
 0xc2d   :  { %v1443_v7 = vsel %vm1440_vm5, %v1442_v2, %v1438_v5  ;;  %1489 = vmatpush.msra.mxu3 %v2318_v4  ;;  %v2322_v19 = vunpack.i.l.bf16 %v2321_v9  ;;  %v2430_v22 = vpop.eup %2429  ;;  %v2323_v25 = vunpack.i.h.bf16 %v2321_v9  ;;  %2431 = vrcp.f32 %v3212_v21 }
 0xc2e   :  { %v1444_v16 = vmul.f32 %v3156_v3, %v1443_v7  ;;  %v1559_v24 = vmul.f32 %v2430_v22, %v3194_v27  ;;  %v1458_v3 = vsel %vm1455_vm10, %v1457_v31, %v1453_v30  ;;  %v1701_v34 = vsub.f32 1.0, %v1700_v29 }
 0xc2f   :  { %1740 = vmatpush.msrb.mxu3 %v2322_v19  ;;  %v1459_v40 = vmul.f32 %v3150_v60, %v1458_v3  ;;  %v1692_v35 = vsel %vm1691_vm15, %v3198_v53, %v1688_v33  ;;  %vm1564_vm4 = vweird.f32 %v2430_v22  ;;  %v1710_v60 = vand.u32 2147483648, %v3196_v51  ;;  %v2250_v19 = vld [vmem:[%s3465_s12 + $0x30] sm:$0xff] }
 0xc30   :  { %2234 = vmatmul.msk.f32.vlgmr.msra.gmra.mxu3 %vm336_vm12, %v1444_v16  ;;  %v1560_v52 = vsub.f32 1.0, %v1559_v24  ;;  %v1702_v41 = vmul.f32 %v3209_v13, %v1701_v34  ;;  %v1697_v45 = vsel %vm1694_vm1, %v1696_v43, %v1692_v35  ;;  %v1569_v47 = vand.u32 2147483648, %v3194_v27  ;;  %vm1565_vm9 = vmor %vm1563_vm6, %vm1564_vm4  ;;  %1808 = vmatpush.msrb.mxu0 %v2250_v19 }
 0xc31   :  { %1741 = vmatpush.msrb.mxu3 %v2323_v25  ;;  %vm1704_vm5 = vweird.f32 %v3196_v51  ;;  %v1698_v48 = vmul.f32 %v3158_v8, %v1697_v45  ;;  %v1711_v54 = vor.u32 1.1754944e-38, %v1710_v60  ;;  %vm1709_vm10 = vcmp.eq.f32.partialorder %v1708_v49, 8.507059e+37 }
 0xc32   :  { %v1561_v44 = vmul.f32 %v2430_v22, %v1560_v52  ;;  %v1703_v46 = vadd.f32 %v3209_v13, %v1702_v41  ;;  %vm1706_vm8 = vmor %vm1704_vm5, %vm1705_vm2  ;;  %v1570_v57 = vor.u32 1.1754944e-38, %v1569_v47  ;;  %v1584_v27 = vand.u32 2147483648, %v3212_v21  ;;  %v2344_v52 = vld [vmem:[%s3466_s13 + $0x1] ss:$0 sm:$0xff] }
 0xc33   :  { %v2432_v38 = vpop.eup %2431  ;;  %vm1578_vm15 = vweird.f32 %v3212_v21  ;;  %v1582_v0 = vand.u32 2147483647, %v3212_v21 }
 0xc34   :  { %v1574_v56 = vmul.f32 %v2432_v38, %v3212_v21  ;;  %v1562_v37 = vadd.f32 %v2430_v22, %v1561_v44  ;;  %v1707_v62 = vsel %vm1706_vm8, %v3209_v13, %v1703_v46  ;;  %vm1579_vm14 = vweird.f32 %v2432_v38  ;;  %v2249_v21 = vld [vmem:[%s3465_s12 + $0x28] sm:$0xff] }
 0xc35   :  { %v1712_v8 = vsel %vm1709_vm10, %v1711_v54, %v1707_v62  ;;  %vm1580_vm1 = vmor %vm1578_vm15, %vm1579_vm14  ;;  %v1585_v2 = vor.u32 1.1754944e-38, %v1584_v27  ;;  %vm1583_vm2 = vcmp.eq.f32.partialorder %v1582_v0, 8.507059e+37  ;;  %1809 = vmatpush.msrb.mxu0 %v2249_v21  ;;  %v2259_v62 = vld [vmem:[%s3469_s16 + $0x30] sm:$0xff]  ;;  %v2258_v54 = vld [vmem:[%s3469_s16 + $0x28] sm:$0xff] }
 0xc36   :  { %v1575_v10 = vsub.f32 1.0, %v1574_v56  ;;  %v1566_v53 = vsel %vm1565_vm9, %v2430_v22, %v1562_v37  ;;  %v1713_v61 = vmul.f32 %v3166_v17, %v1712_v8  ;;  %v2248_v22 = vld [vmem:[%s3465_s12 + $0x20] sm:$0xff] }
 0xc37   :  { %v1571_v55 = vsel %vm1568_vm13, %v1570_v57, %v1566_v53  ;;  %1810 = vmatpush.msrb.mxu0 %v2248_v22  ;;  %v2257_v57 = vld [vmem:[%s3469_s16 + $0x20] sm:$0xff]  ;;  %s2149_s16 = sshll.u32 %s3476_s23, 4  ;;  %s2150_s16 = int_to_ptr.hbm [resolvable:$true] %s2149_s16 }
 0xc38   :  { %2235 = vmatmul.msk.f32.gmra.mxu3 %vm336_vm12, %v1459_v40  ;;  %v1576_v18 = vmul.f32 %v2432_v38, %v1575_v10  ;;  %v1572_v63 = vmul.f32 %v3164_v15, %v1571_v55 }
 0xc3a   :  { %v1577_v59 = vadd.f32 %v2432_v38, %v1576_v18 }
 0xc3c   :  { %v1581_v1 = vsel %vm1580_vm1, %v2432_v38, %v1577_v59 }
 0xc3d   :  { %v1586_v4 = vsel %vm1583_vm2, %v1585_v2, %v1581_v1  ;;  %v1363_v7 = vpop.f32.mrf.mxu1  ;;  %v2345_v2 = vld [vmem:[%s3467_s14 + $0x1] ss:$0 sm:$0xff]  ;;  %s2483_s14 = smov 128  }
 0xc3e   :  { %v1587_v5 = vmul.f32 %v3172_v23, %v1586_v4 }
 0xc40   :  { %2246 = vmatmul.msk.f32.vlgmr.msrb.gmra.mxu3 %vm336_vm12, %v1698_v48 }
 0xc44   :  { %v2326_v58 = vpop.permute.xlu1 %2325 }
 0xc45   :  { %v2327_v51 = vunpack.i.l.bf16 %v2326_v58  ;;  %v2328_v6 = vunpack.i.h.bf16 %v2326_v58 }
 0xc47   :  { %1614 = vmatpush.msra.mxu1 %v2327_v51 }
 0xc48   :  { %2247 = vmatmul.msk.f32.gmra.mxu3 %vm336_vm12, %v1713_v61 }
 0xc49   :  { %1615 = vmatpush.msra.mxu1 %v2328_v6 }
 0xc4a   :  { %2240 = vmatmul.msk.f32.vlgmr.msra.gmra.mxu1 %vm336_vm12, %v1572_v63 }
 0xc4b   :  { %1906 = vmatpush.msrb.mxu1 %v2260_v50  ;;  %v2272_v50 = vld [vmem:[%s3471_s18 + $0xb0] sm:$0xff] }
 0xc4d   :  { %1907 = vmatpush.msrb.mxu1 %v2259_v62 }
 0xc4f   :  { %1908 = vmatpush.msrb.mxu1 %v2258_v54 }
 0xc51   :  { %1909 = vmatpush.msrb.mxu1 %v2257_v57  ;;  %v2271_v57 = vld [vmem:[%s3471_s18 + $0xa8] sm:$0xff] }
 0xc52   :  { %2241 = vmatmul.msk.f32.gmra.mxu1 %vm336_vm12, %v1587_v5 }
 0xca5   :  { %v1366_v15 = vpop.f32.mrf.mxu1 }
 0xcb3   :  { %v1491_v17 = vpop.f32.mrf.mxu3 }
 0xcbb   :  { %v1494_v39 = vpop.f32.mrf.mxu3 }
 0xcbc   :  { %1753 = vrot.lane.b32.xlu2 %v1494_v39, %s3523_s17  ;;  %v2346_v39 = vld [vmem:[%s3468_s15 + $0x1] ss:$0 sm:$0xff] }
 0xcc3   :  { %v1743_v9 = vpop.f32.mrf.mxu3 }
 0xcc7   :  { %v1617_v11 = vpop.f32.mrf.mxu1 }
 0xcc8   :  { %1759 = vrot.lane.b32.xlu0 %v1617_v11, %s3524_s6 }
 0xccb   :  { %v1746_v13 = vpop.f32.mrf.mxu3 }
 0xccc   :  { %1769 = vrot.lane.b32.xlu1 %v1746_v13, %s3525_s8 }
 0xccf   :  { %v1620_v23 = vpop.f32.mrf.mxu1 }
 0xcd0   :  { %1751 = vrot.lane.b32.xlu0 %v1491_v17, %s3523_s17 }
 0xcd8   :  { %1767 = vrot.lane.b32.xlu0 %v1743_v9, %s3525_s8  ;;  %s2482_s8 = smov [#allocation2]  }
 0xcd9   :  { %s2147_s10 = sshll.u32 %s2482_s8, 4  ;;  %s2148_s10 = int_to_ptr.vmem [resolvable:$true] %s2147_s10 }
 0xce0   :  { %1761 = vrot.lane.b32.xlu0 %v1620_v23, %s3524_s6 }
 0xd16   :  { %v1754_v31 = vpop.permute.xlu2 %1753 }
 0xd17   :  { %v1774_v24 = vsel %vm296_vm11, %v1366_v15, %v1754_v31  ;;  %v2279_v31 = vld [vmem:[%s3471_s18 + $0xe8] sm:$0xff] }
 0xd3a   :  { %v1760_v16 = vpop.permute.xlu0 %1759 }
 0xd3e   :  { %v1770_v33 = vpop.permute.xlu1 %1769 }
 0xd42   :  { %v1752_v26 = vpop.permute.xlu0 %1751 }
 0xd43   :  { %v1773_v25 = vsel %vm296_vm11, %v1363_v7, %v1752_v26  ;;  %v2281_v26 = vld [vmem:[%s3471_s18 + $0xf8] sm:$0xff] }
 0xd44   :  { %v1775_v20 = vsel %vm336_vm12, %v1773_v25, %v1760_v16  ;;  %v2347_v16 = vld [vmem:[%s3519_s1 + $0x1] ss:$0 sm:$0xff]  ;;  %2027 = vmatpush.msrb.mxu2 %v2281_v26 }
 0xd4a   :  { %v1768_v29 = vpop.permute.xlu0 %1767 }
 0xd4b   :  { %v1777_v30 = vsel %vm822_vm7, %v1775_v20, %v1768_v29  ;;  %v2280_v29 = vld [vmem:[%s3471_s18 + $0xf0] sm:$0xff] }
 0xd4c   :  { %2253 = vmatmul.msk.f32.vlgmr.msrb.gmra.mxu0 %vm135_vm3, %v1777_v30  ;;  %2028 = vmatpush.msrb.mxu2 %v2280_v29 }
 0xd4e   :  { %2029 = vmatpush.msrb.mxu2 %v2279_v31 }
 0xd52   :  { %v1762_v3 = vpop.permute.xlu0 %1761 }
 0xd53   :  { %v1776_v34 = vsel %vm336_vm12, %v1774_v24, %v1762_v3  ;;  %v2278_v3 = vld [vmem:[%s3471_s18 + $0xe0] sm:$0xff] }
 0xd54   :  { %v1778_v28 = vsel %vm822_vm7, %v1776_v34, %v1770_v33  ;;  %2030 = vmatpush.msrb.mxu2 %v2278_v3  ;;  %v2277_v34 = vld [vmem:[%s3471_s18 + $0xd8] sm:$0xff] }
 0xd55   :  { %2254 = vmatmul.msk.f32.gmra.mxu0 %vm135_vm3, %v1778_v28 }
 0xd56   :  { %2031 = vmatpush.msrb.mxu2 %v2277_v34 }
 0xdc9   :  { %v1812_v38 = vpop.f32.mrf.mxu0 }
 0xdca   :  { %v1813_v12 = vadd.f32 %v2344_v52, %v1812_v38 }
 0xdcc   :  { %v3284_v40 = vadd.f32 %v1813_v12, %v3021_v36  ;;  %v2276_v12 = vld [vmem:[%s3471_s18 + $0xd0] sm:$0xff] }
 0xdcd   :  { %2032 = vmatpush.msrb.mxu2 %v2276_v12 }
 0xdce   :  { %v1824_v35 = vsel %vm135_vm3, %v3284_v40, 0.0 }
 0xdcf   :  { %1825 = vadd.xlane.f32.xlu2 %v1824_v35 }
 0xdd2   :  { %v1815_v41 = vpop.f32.mrf.mxu0 }
 0xdd3   :  { %v1816_v43 = vadd.f32 %v2344_v52, %v1815_v41 }
 0xdd5   :  { %v3289_v44 = vadd.f32 %v1816_v43, %v3026_v42 }
 0xdd7   :  { %v1827_v56 = vsel %vm135_vm3, %v3289_v44, 0.0 }
 0xdd8   :  { %1828 = vadd.xlane.f32.xlu0 %v1827_v56  ;;  %v2275_v56 = vld [vmem:[%s3471_s18 + $0xc8] sm:$0xff] }
 0xdd9   :  { %2033 = vmatpush.msrb.mxu2 %v2275_v56 }
 0xe42   :  { %v1826_v45 = vpop.xlane.xlu2 %1825 }
 0xe43   :  { %v1830_v46 = vmul.f32 %v1826_v45, %v2650_v32 }
 0xe45   :  { %v1832_v37 = vsub.f32 %v3284_v40, %v1830_v46 }
 0xe47   :  { %v1834_v36 = vmul.f32 %v1832_v37, %v1832_v37 }
 0xe49   :  { %v1836_v60 = vsel %vm135_vm3, %v1834_v36, 0.0  ;;  %v2274_v36 = vld [vmem:[%s3471_s18 + $0xc0] sm:$0xff] }
 0xe4a   :  { %1837 = vadd.xlane.f32.xlu1 %v1836_v60  ;;  %2034 = vmatpush.msrb.mxu2 %v2274_v36 }
 0xe4b   :  { %v1829_v10 = vpop.xlane.xlu0 %1828 }
 0xe4c   :  { %v1831_v47 = vmul.f32 %v1829_v10, %v2650_v32 }
 0xe4e   :  { %v1833_v48 = vsub.f32 %v3289_v44, %v1831_v47 }
 0xe50   :  { %v1835_v42 = vmul.f32 %v1833_v48, %v1833_v48 }
 0xe52   :  { %v1839_v49 = vsel %vm135_vm3, %v1835_v42, 0.0 }
 0xe53   :  { %1840 = vadd.xlane.f32.xlu2 %v1839_v49 }
 0xebd   :  { %v1838_v53 = vpop.xlane.xlu1 %1837 }
 0xebe   :  { %v1842_v18 = vmul.f32 %v1838_v53, %v2650_v32 }
 0xec0   :  { %v1844_v58 = vadd.f32 1e-05, %v1842_v18 }
 0xec2   :  { %2433 = vrsqrt.f32 %v1844_v58  ;;  %vm1852_vm12 = vweird.f32 %v1844_v58 }
 0xec6   :  { %v1841_v8 = vpop.xlane.xlu2 %1840 }
 0xec7   :  { %v1843_v55 = vmul.f32 %v1841_v8, %v2650_v32  ;;  %v2270_v8 = vld [vmem:[%s3471_s18 + $0xa0] sm:$0xff] }
 0xec8   :  { %v2434_v51 = vpop.eup %2433 }
 0xec9   :  { %v1847_v59 = vmul.f32 %v2434_v51, %v1844_v58  ;;  %v1845_v27 = vadd.f32 1e-05, %v1843_v55  ;;  %vm1853_vm11 = vweird.f32 %v2434_v51 }
 0xeca   :  { %vm1854_vm7 = vmor %vm1852_vm12, %vm1853_vm11 }
 0xecb   :  { %v1848_v6 = vmul.f32 %v2434_v51, %v1847_v59  ;;  %2435 = vrsqrt.f32 %v1845_v27  ;;  %vm1862_vm5 = vweird.f32 %v1845_v27 }
 0xecd   :  { %v1849_v61 = vmul.f32 0.5, %v1848_v6 }
 0xecf   :  { %v1850_v63 = vsub.f32 1.5, %v1849_v61 }
 0xed1   :  { %v2436_v0 = vpop.eup %2435  ;;  %v1851_v1 = vmul.f32 %v2434_v51, %v1850_v63  ;;  %v2268_v63 = vld [vmem:[%s3471_s18 + $0x90] sm:$0xff] }
 0xed2   :  { %v1857_v4 = vmul.f32 %v2436_v0, %v1845_v27  ;;  %vm1863_vm4 = vweird.f32 %v2436_v0 }
 0xed3   :  { %v1855_v5 = vsel %vm1854_vm7, %v2434_v51, %v1851_v1  ;;  %vm1864_vm6 = vmor %vm1862_vm5, %vm1863_vm4  ;;  %v2269_v51 = vld [vmem:[%s3471_s18 + $0x98] sm:$0xff] }
 0xed4   :  { %v1866_v17 = vmul.f32 %v1855_v5, %v1832_v37  ;;  %v1858_v7 = vmul.f32 %v2436_v0, %v1857_v4 }
 0xed6   :  { %v1871_v15 = vmul.f32 %v2345_v2, %v1866_v17  ;;  %v1859_v9 = vmul.f32 0.5, %v1858_v7 }
 0xed8   :  { %v1860_v11 = vsub.f32 1.5, %v1859_v9  ;;  %v1876_v13 = vadd.f32 %v2346_v39, %v1871_v15 }
 0xeda   :  { %v1861_v23 = vmul.f32 %v2436_v0, %v1860_v11  ;;  %2262 = vmatmul.msk.f32.vlgmr.msrb.gmra.mxu1 %vm135_vm3, %v1876_v13 }
 0xedc   :  { %v1865_v14 = vsel %vm1864_vm6, %v2436_v0, %v1861_v23 }
 0xedd   :  { %v1867_v19 = vmul.f32 %v1865_v14, %v1833_v48  ;;  %v2273_v48 = vld [vmem:[%s3471_s18 + $0xb8] sm:$0xff] }
 0xede   :  { %2035 = vmatpush.msrb.mxu2 %v2273_v48 }
 0xedf   :  { %v1872_v21 = vmul.f32 %v2345_v2, %v1867_v19  ;;  %v2267_v2 = vld [vmem:[%s3471_s18 + $0x88] sm:$0xff] }
 0xee0   :  { %2036 = vmatpush.msrb.mxu2 %v2272_v50 }
 0xee1   :  { %v1877_v22 = vadd.f32 %v2346_v39, %v1872_v21  ;;  %v2266_v39 = vld [vmem:[%s3471_s18 + $0x80] sm:$0xff] }
 0xee2   :  { %2037 = vmatpush.msrb.mxu2 %v2271_v57 }
 0xee3   :  { %2263 = vmatmul.msk.f32.gmra.mxu1 %vm135_vm3, %v1877_v22 }
 0xee4   :  { %2038 = vmatpush.msrb.mxu2 %v2270_v8 }
 0xee6   :  { %2039 = vmatpush.msrb.mxu2 %v2269_v51 }
 0xee8   :  { %2040 = vmatpush.msrb.mxu2 %v2268_v63 }
 0xeea   :  { %2041 = vmatpush.msrb.mxu2 %v2267_v2 }
 0xeec   :  { %2042 = vmatpush.msrb.mxu2 %v2266_v39 }
 0xf57   :  { %v1911_v25 = vpop.f32.mrf.mxu1 }
 0xf58   :  { %v3327_v20 = vadd.f32 %v2347_v16, %v1911_v25 }
 0xf5a   :  { %v3333_v30 = vmul.f32 0.70710677, %v3327_v20 }
 0xf5c   :  { %v1921_v24 = vmul.f32 %v3333_v30, %v3333_v30 }
 0xf5e   :  { %v3343_v33 = vmin.f32 %v1921_v24, 16.0 }
 0xf60   :  { %v1923_v28 = vmul.f32 2.1237322e-06, %v3343_v33  ;;  %v1934_v52 = vmul.f32 3.8918573e-05, %v3343_v33  ;;  %v1914_v38 = vpop.f32.mrf.mxu1 }
 0xf61   :  { %v3353_v35 = vadd.f32 %v2347_v16, %v1914_v38 }
 0xf62   :  { %v1924_v41 = vadd.f32 0.00028619796, %v1923_v28  ;;  %v1935_v43 = vadd.f32 0.001143296, %v1934_v52 }
 0xf63   :  { %v3359_v45 = vmul.f32 0.70710677, %v3353_v35 }
 0xf64   :  { %v1925_v46 = vmul.f32 %v1924_v41, %v3343_v33  ;;  %v1936_v37 = vmul.f32 %v1935_v43, %v3343_v33 }
 0xf65   :  { %v1961_v60 = vmul.f32 %v3359_v45, %v3359_v45 }
 0xf66   :  { %v1926_v10 = vadd.f32 0.0036580483, %v1925_v46  ;;  %v1937_v47 = vadd.f32 0.014752088, %v1936_v37 }
 0xf67   :  { %v3371_v42 = vmin.f32 %v1961_v60, 16.0 }
 0xf68   :  { %v1938_v49 = vmul.f32 %v1937_v47, %v3343_v33  ;;  %v1927_v54 = vmul.f32 %v1926_v10, %v3343_v33  ;;  %v1917_v47 = vmul.f32 0.5, %v3327_v20  ;;  %v1918_v20 = vmul.f32 0.5, %v3353_v35 }
 0xf69   :  { %v1963_v62 = vmul.f32 2.1237322e-06, %v3371_v42  ;;  %v1974_v53 = vmul.f32 3.8918573e-05, %v3371_v42 }
 0xf6a   :  { %v1939_v18 = vadd.f32 0.112945676, %v1938_v49  ;;  %v1928_v27 = vadd.f32 0.05243302, %v1927_v54 }
 0xf6b   :  { %v1964_v58 = vadd.f32 0.00028619796, %v1963_v62  ;;  %v1975_v59 = vadd.f32 0.001143296, %v1974_v53 }
 0xf6c   :  { %v1940_v55 = vmul.f32 %v1939_v18, %v3343_v33  ;;  %v1929_v5 = vmul.f32 %v1928_v27, %v3343_v33  ;;  %v2348_v27 = vld [vmem:[%s3472_s19 + $0x1] ss:$0 sm:$0xff] }
 0xf6d   :  { %v1965_v61 = vmul.f32 %v1964_v58, %v3371_v42  ;;  %v1976_v0 = vmul.f32 %v1975_v59, %v3371_v42 }
 0xf6e   :  { %v1941_v6 = vadd.f32 0.4994258, %v1940_v55  ;;  %v1930_v11 = vadd.f32 0.18741608, %v1929_v5 }
 0xf6f   :  { %v1977_v4 = vadd.f32 0.014752088, %v1976_v0  ;;  %v1966_v7 = vadd.f32 0.0036580483, %v1965_v61 }
 0xf70   :  { %v1942_v1 = vmul.f32 %v1941_v6, %v3343_v33  ;;  %v1931_v21 = vmul.f32 %v1930_v11, %v3343_v33 }
 0xf71   :  { %v1978_v15 = vmul.f32 %v1977_v4, %v3371_v42  ;;  %v1967_v13 = vmul.f32 %v1966_v7, %v3371_v42 }
 0xf72   :  { %v1943_v17 = vadd.f32 1.0, %v1942_v1  ;;  %v1932_v31 = vadd.f32 1.1283791, %v1931_v21  ;;  %v2109_v21 = vld [vmem:[%s3475_s22 + $0x8] sm:$0xff] }
 0xf73   :  { %v1979_v9 = vadd.f32 0.112945676, %v1978_v15  ;;  %v1968_v22 = vadd.f32 0.05243302, %v1967_v13 }
 0xf74   :  { %2437 = vrcp.f32 %v1943_v17  ;;  %v1955_v24 = vand.u32 2147483648, %v1943_v17  ;;  %v1953_v28 = vand.u32 2147483647, %v1943_v17  ;;  %vm1949_vm9 = vweird.f32 %v1943_v17 }
 0xf75   :  { %v1980_v23 = vmul.f32 %v1979_v9, %v3371_v42  ;;  %v1969_v3 = vmul.f32 %v1968_v22, %v3371_v42  ;;  %v1933_v33 = vmul.f32 %v1932_v31, %v3333_v30  ;;  %v2108_v22 = vld [vmem:[%s3475_s22] sm:$0xff] }
 0xf76   :  { %v1956_v38 = vor.u32 1.1754944e-38, %v1955_v24  ;;  %vm1954_vm13 = vcmp.eq.f32.partialorder %v1953_v28, 8.507059e+37 }
 0xf77   :  { %v1981_v14 = vadd.f32 0.4994258, %v1980_v23  ;;  %v1970_v12 = vadd.f32 0.18741608, %v1969_v3 }
 0xf79   :  { %v1982_v26 = vmul.f32 %v1981_v14, %v3371_v42  ;;  %v1971_v37 = vmul.f32 %v1970_v12, %v3371_v42  ;;  %v2110_v14 = vld [vmem:[%s3475_s22 + $0x10] sm:$0xff] }
 0xf7a   :  { %v2438_v19 = vpop.eup %2437 }
 0xf7b   :  { %v1945_v16 = vmul.f32 %v2438_v19, %v1943_v17  ;;  %v1983_v29 = vadd.f32 1.0, %v1982_v26  ;;  %vm1950_vm8 = vweird.f32 %v2438_v19  ;;  %v1972_v50 = vadd.f32 1.1283791, %v1971_v37 }
 0xf7c   :  { %vm1951_vm10 = vmor %vm1949_vm9, %vm1950_vm8 }
 0xf7d   :  { %v1946_v25 = vsub.f32 1.0, %v1945_v16  ;;  %2439 = vrcp.f32 %v1983_v29  ;;  %v1995_v49 = vand.u32 2147483648, %v1983_v29  ;;  %v1993_v53 = vand.u32 2147483647, %v1983_v29 }
 0xf7e   :  { %vm1989_vm15 = vweird.f32 %v1983_v29  ;;  %v1973_v57 = vmul.f32 %v1972_v50, %v3359_v45 }
 0xf7f   :  { %v1947_v34 = vmul.f32 %v2438_v19, %v1946_v25  ;;  %v1996_v18 = vor.u32 1.1754944e-38, %v1995_v49  ;;  %vm1994_vm2 = vcmp.eq.f32.partialorder %v1993_v53, 8.507059e+37 }
 0xf81   :  { %v1948_v52 = vadd.f32 %v2438_v19, %v1947_v34 }
 0xf83   :  { %v1952_v41 = vsel %vm1951_vm10, %v2438_v19, %v1948_v52  ;;  %v2440_v56 = vpop.eup %2439 }
 0xf84   :  { %v1957_v43 = vsel %vm1954_vm13, %v1956_v38, %v1952_v41  ;;  %v1985_v36 = vmul.f32 %v2440_v56, %v1983_v29  ;;  %vm1990_vm14 = vweird.f32 %v2440_v56  ;;  %v2349_v38 = vld [vmem:[%s3473_s20] ss:$0 sm:$0xff] }
 0xf85   :  { %v1958_v46 = vmul.f32 %v1957_v43, %v1933_v33  ;;  %vm1991_vm1 = vmor %vm1989_vm15, %vm1990_vm14 }
 0xf86   :  { %v1986_v10 = vsub.f32 1.0, %v1985_v36 }
 0xf87   :  { %v2264_v60 = vclamps-f32 %v1958_v46, 1.0 }
 0xf88   :  { %v1987_v62 = vmul.f32 %v2440_v56, %v1986_v10 }
 0xf89   :  { %v2001_v48 = vadd.f32 1.0, %v2264_v60 }
 0xf8a   :  { %v1988_v30 = vadd.f32 %v2440_v56, %v1987_v62 }
 0xf8b   :  { %v2003_v54 = vmul.f32 %v2001_v48, %v1917_v47 }
 0xf8c   :  { %v1992_v42 = vsel %vm1991_vm1, %v2440_v56, %v1988_v30 }
 0xf8d   :  { %2043 = vmatmul.f32.vlgmr.msrb.gmra.mxu2 %v2003_v54  ;;  %v1997_v58 = vsel %vm1994_vm2, %v1996_v18, %v1992_v42 }
 0xf8e   :  { %v1998_v8 = vmul.f32 %v1997_v58, %v1973_v57 }
 0xf90   :  { %v2265_v55 = vclamps-f32 %v1998_v8, 1.0 }
 0xf92   :  { %v2002_v51 = vadd.f32 1.0, %v2265_v55 }
 0xf94   :  { %v2004_v59 = vmul.f32 %v2002_v51, %v1918_v20 }
 0xf96   :  { %2046 = vmatmul.f32.gmra.mxu2 %v2004_v59 }
0x1010   :  { %v2044_v6 = vpop.f32.mrf.mxu2 }
0x1011   :  { %v2045_v61 = vadd.f32 %v2348_v27, %v2044_v6 }
0x1013   :  { %v2050_v63 = vadd.f32 %v2045_v61, %v3284_v40 }
0x1015   :  { %v2054_v45 = vsel %vm135_vm3, %v2050_v63, 0.0 }
0x1016   :  { %2055 = vadd.xlane.f32.xlu0 %v2054_v45 }
0x1019   :  { %v2047_v0 = vpop.f32.mrf.mxu2 }
0x101a   :  { %v2048_v1 = vadd.f32 %v2348_v27, %v2047_v0 }
0x101c   :  { %v2051_v2 = vadd.f32 %v2048_v1, %v3289_v44  ;;  %v2111_v44 = vld [vmem:[%s3475_s22 + $0x18] sm:$0xff] }
0x101d   :  { %2130 = vmatpush.msra.mxu3 %v2111_v44 }
0x101e   :  { %v2057_v35 = vsel %vm135_vm3, %v2051_v2, 0.0 }
0x101f   :  { %2058 = vadd.xlane.f32.xlu1 %v2057_v35  ;;  %2131 = vmatpush.msra.mxu3 %v2110_v14 }
0x1021   :  { %2132 = vmatpush.msra.mxu3 %v2109_v21 }
0x1023   :  { %2133 = vmatpush.msra.mxu3 %v2108_v22 }
0x1089   :  { %v2056_v4 = vpop.xlane.xlu0 %2055 }
0x108a   :  { %v2060_v5 = vmul.f32 %v2056_v4, %v2650_v32 }
0x108c   :  { %v2062_v17 = vsub.f32 %v2050_v63, %v2060_v5 }
0x108e   :  { %v2064_v7 = vmul.f32 %v2062_v17, %v2062_v17 }
0x1090   :  { %v2066_v39 = vsel %vm135_vm3, %v2064_v7, 0.0 }
0x1091   :  { %2067 = vadd.xlane.f32.xlu2 %v2066_v39 }
0x1092   :  { %v2059_v15 = vpop.xlane.xlu1 %2058 }
0x1093   :  { %v2061_v40 = vmul.f32 %v2059_v15, %v2650_v32 }
0x1095   :  { %v2063_v9 = vsub.f32 %v2051_v2, %v2061_v40 }
0x1097   :  { %v2065_v11 = vmul.f32 %v2063_v9, %v2063_v9 }
0x1099   :  { %v2069_v13 = vsel %vm135_vm3, %v2065_v11, 0.0 }
0x109a   :  { %2070 = vadd.xlane.f32.xlu0 %v2069_v13 }
0x1104   :  { %v2068_v23 = vpop.xlane.xlu2 %2067 }
0x1105   :  { %v2072_v19 = vmul.f32 %v2068_v23, %v2650_v32 }
0x1107   :  { %v2074_v16 = vadd.f32 1e-05, %v2072_v19 }
0x1109   :  { %2441 = vrsqrt.f32 %v2074_v16  ;;  %vm2082_vm12 = vweird.f32 %v2074_v16 }
0x110d   :  { %v2071_v25 = vpop.xlane.xlu0 %2070 }
0x110e   :  { %v2073_v31 = vmul.f32 %v2071_v25, %v2650_v32  ;;  %v2350_v32 = vld [vmem:[%s3474_s21] ss:$0 sm:$0xff] }
0x110f   :  { %v2442_v26 = vpop.eup %2441 }
0x1110   :  { %v2077_v29 = vmul.f32 %v2442_v26, %v2074_v16  ;;  %v2075_v3 = vadd.f32 1e-05, %v2073_v31  ;;  %vm2083_vm11 = vweird.f32 %v2442_v26 }
0x1111   :  { %vm2084_vm7 = vmor %vm2082_vm12, %vm2083_vm11 }
0x1112   :  { %v2078_v24 = vmul.f32 %v2442_v26, %v2077_v29  ;;  %2443 = vrsqrt.f32 %v2075_v3  ;;  %vm2092_vm5 = vweird.f32 %v2075_v3 }
0x1114   :  { %v2079_v34 = vmul.f32 0.5, %v2078_v24 }
0x1116   :  { %v2080_v28 = vsub.f32 1.5, %v2079_v34 }
0x1118   :  { %v2081_v52 = vmul.f32 %v2442_v26, %v2080_v28  ;;  %v2444_v12 = vpop.eup %2443 }
0x1119   :  { %v2087_v43 = vmul.f32 %v2444_v12, %v2075_v3  ;;  %vm2093_vm4 = vweird.f32 %v2444_v12 }
0x111a   :  { %v2085_v33 = vsel %vm2084_vm7, %v2442_v26, %v2081_v52  ;;  %vm2094_vm6 = vmor %vm2092_vm5, %vm2093_vm4 }
0x111b   :  { %v2096_v41 = vmul.f32 %v2085_v33, %v2062_v17  ;;  %v2088_v46 = vmul.f32 %v2444_v12, %v2087_v43 }
0x111d   :  { %v2101_v56 = vmul.f32 %v2349_v38, %v2096_v41  ;;  %v2089_v37 = vmul.f32 0.5, %v2088_v46 }
0x111f   :  { %v2106_v36 = vadd.f32 %v2350_v32, %v2101_v56  ;;  %v2090_v60 = vsub.f32 1.5, %v2089_v37 }
0x1121   :  { %2283 = vmatmul.msk.f32.vlgmr.msra.gmra.mxu3 %vm135_vm3, %v2106_v36  ;;  %v2091_v10 = vmul.f32 %v2444_v12, %v2090_v60 }
0x1123   :  { %v2095_v47 = vsel %vm2094_vm6, %v2444_v12, %v2091_v10 }
0x1124   :  { %v2097_v48 = vmul.f32 %v2095_v47, %v2063_v9 }
0x1126   :  { %v2102_v49 = vmul.f32 %v2349_v38, %v2097_v48 }
0x1128   :  { %v2107_v50 = vadd.f32 %v2350_v32, %v2102_v49 }
0x112a   :  { %2284 = vmatmul.msk.f32.gmra.mxu3 %vm135_vm3, %v2107_v50 }
0x11a4   :  { %v2135_v62 = vpop.f32.mrf.mxu3 }
0x11a5   :  { %2141 = vst.msk [vmem:[#allocation2] sm:$0xff] %vm101_vm0, %v2135_v62 }
0x11ad   :  { %v2138_v53 = vpop.f32.mrf.mxu3 }
0x11ae   :  { %2142 = vst.msk [vmem:[#allocation2 + $0x8] sm:$0xff] %vm101_vm0, %v2138_v53 }
0x11af   :  { %2155 = dma.vmem_to_hbm [thread:$0]  %s2148_s10, 256, %s2150_s16, [#allocation3], %s2483_s14, %s2483_s14, %s3523_s17  }
0x11b0   :  { %2471 = dma.done.wait [#allocation3], 256  }
0x11b1   :  { %2472 = vsyncadd [#allocation3], 4294967040 }
0x11b2   :  { %2160 = vsyncpa [#allocation3], 1 }

</bundles_post_ra>
